<compile_context>
chip_gen: v7x
topology: tpu7x:2x2x1
jax: 0.10.0
libtpu: 0.0.40
codegen_flags: <defaults>
</compile_context>

<pallas_src>
import functools

import jax
import jax.numpy as jnp
from jax.experimental import pallas as pl
from jax.experimental.pallas import tpu as pltpu


# ---------------------------------------------------------------------------
# Config
# ---------------------------------------------------------------------------
CFG = dict(
    vocab_size=50,
    hidden=32,
    num_layers=2,
    num_heads=2,
    intermediate=64,
    max_pos=32,
    type_vocab=2,
    n_vocab_id=10,       # embeddingID vocab; padding_idx = n_vocab_id - 1
    id_emb_dim=130,      # as in the PyTorch module (3*130 = 390 concat)
    num_classes=3,
    seq=8,
    batch=2,
)
NPAD = 128               # lane-dense padded width for the fc output


def _full_spec(shape):
    # single-block spec: block == whole array (everything here fits VMEM)
    return pl.BlockSpec(shape, lambda i: (0,) * len(shape))


# ---------------------------------------------------------------------------
# One fused kernel: embeddings-LN -> L encoder layers -> pooler -> fc
# ---------------------------------------------------------------------------
def _make_fused_kernel(cfg):
    B, S, H = cfg["batch"], cfg["seq"], cfg["hidden"]
    nh = cfg["num_heads"]
    hd = H // nh
    L = cfg["num_layers"]
    scale = 1.0 / float(hd) ** 0.5

    def gelu(x):
        # TODO(synk): BERT uses erf-GELU; tanh approximation used for
        # guaranteed Mosaic lowering (~1e-3 divergence).
        return 0.5 * x * (1.0 + jnp.tanh(0.7978845608028654 *
                                         (x + 0.044715 * x * x * x)))

    def layernorm(x, g, b):
        mu = jnp.mean(x, axis=-1, keepdims=True)
        var = jnp.mean(jnp.square(x - mu), axis=-1, keepdims=True)
        return (x - mu) * jax.lax.rsqrt(var + 1e-12) * g + b

    def kernel(emb_ref, addmask_ref, eln_g_ref, eln_b_ref,
               wqkv_ref, bqkv_ref, wo_ref, bo_ref, ln1_g_ref, ln1_b_ref,
               wi_ref, bi_ref, wo2_ref, bo2_ref, ln2_g_ref, ln2_b_ref,
               pool_w_ref, pool_b_ref, id_ref,
               fcw_pool_ref, fcw_id_ref, fcb_ref, o_ref):
        # ---- embeddings LayerNorm (gathers already summed in JAX glue) ----
        h = layernorm(emb_ref[...], eln_g_ref[...], eln_b_ref[...])   # (B*S,H)
        addmask = addmask_ref[...]                                    # (B, S)

        # ---- encoder layers (static unroll, activations stay in vregs) ----
        for l in range(L):
            # fused QKV projection: one matmul, (B*S, 3H)
            qkv = (jnp.dot(h, wqkv_ref[l],
                           preferred_element_type=jnp.float32) + bqkv_ref[l])
            wo = wo_ref[l]                                            # (H, H)

            per_batch = []
            for b in range(B):
                am = addmask[b:b + 1, :]                              # (1, S)
                r0, r1 = b * S, (b + 1) * S
                acc = jnp.zeros((S, H), jnp.float32)
                for hh in range(nh):
                    c0 = hh * hd
                    qi = qkv[r0:r1, c0:c0 + hd]                       # (S, hd)
                    ki = qkv[r0:r1, H + c0:H + c0 + hd]
                    vi = qkv[r0:r1, 2 * H + c0:2 * H + c0 + hd]
                    s = jnp.einsum("qd,kd->qk", qi, ki,
                                   preferred_element_type=jnp.float32)
                    s = s * scale + am                                # (S, S)
                    s = s - jnp.max(s, axis=-1, keepdims=True)
                    p = jnp.exp(s)
                    p = p * pl.reciprocal(
                        jnp.sum(p, axis=-1, keepdims=True), approx=True)
                    ctx = jnp.dot(p, vi,
                                  preferred_element_type=jnp.float32)  # (S,hd)
                    # merge-heads + output projection fused:
                    # ctx @ wo[hh*hd:(hh+1)*hd, :] summed over heads
                    acc = acc + jnp.dot(ctx, wo[c0:c0 + hd, :],
                                        preferred_element_type=jnp.float32)
                per_batch.append(acc)
            attn_out = jnp.concatenate(per_batch, axis=0) + bo_ref[l]

            # residual + LN1 (fused)
            h = layernorm(attn_out + h, ln1_g_ref[l], ln1_b_ref[l])

            # FFN
            inter = gelu(jnp.dot(h, wi_ref[l],
                                 preferred_element_type=jnp.float32)
                         + bi_ref[l])
            ffn = (jnp.dot(inter, wo2_ref[l],
                           preferred_element_type=jnp.float32) + bo2_ref[l])

            # residual + LN2 (fused)
            h = layernorm(ffn + h, ln2_g_ref[l], ln2_b_ref[l])

        # ---- pooler (first token) + concat-with-id-features + fc ----------
        pool_w = pool_w_ref[...]
        pool_b = pool_b_ref[...]
        fcw_pool = fcw_pool_ref[...]      # (H, NPAD), zero-padded cols >= C
        fcw_id = fcw_id_ref[...]          # (3*ID, NPAD)
        fcb = fcb_ref[...]                # (1, NPAD)
        id_feats = id_ref[...]            # (B, 3*ID)

        for b in range(B):
            first = h[b * S:b * S + 1, :]                             # (1, H)
            pooled = jnp.tanh(jnp.dot(first, pool_w,
                                      preferred_element_type=jnp.float32)
                              + pool_b)
            # concat([pooled, ids]) @ fc_w  ==  pooled@Wp + ids@Wi  (split W)
            logits = (jnp.dot(pooled, fcw_pool,
                              preferred_element_type=jnp.float32)
                      + jnp.dot(id_feats[b:b + 1, :], fcw_id,
                                preferred_element_type=jnp.float32)
                      + fcb)                                          # (1,128)
            o_ref[b:b + 1, :] = logits

    return kernel


# ---------------------------------------------------------------------------
# Deterministic parameter initialization (stacked per-layer layout)
# ---------------------------------------------------------------------------
def init_params(key, cfg):
    def nrm(k, shape, scl=0.02):
        return (scl * jax.random.normal(k, shape)).astype(jnp.float32)

    keys = iter(jax.random.split(key, 64))
    H, I, L = cfg["hidden"], cfg["intermediate"], cfg["num_layers"]
    ID, C = cfg["id_emb_dim"], cfg["num_classes"]

    p = {
        "word_emb": nrm(next(keys), (cfg["vocab_size"], H)),
        "pos_emb": nrm(next(keys), (cfg["max_pos"], H)),
        "type_emb": nrm(next(keys), (cfg["type_vocab"], H)),
        "emb_ln_g": jnp.ones((1, H), jnp.float32),
        "emb_ln_b": jnp.zeros((1, H), jnp.float32),
        # per-layer stacked weights; QKV fused into one (H, 3H) matrix
        "wqkv": nrm(next(keys), (L, H, 3 * H)),
        "bqkv": jnp.zeros((L, 1, 3 * H), jnp.float32),
        "wo": nrm(next(keys), (L, H, H)),
        "bo": jnp.zeros((L, 1, H), jnp.float32),
        "ln1_g": jnp.ones((L, 1, H), jnp.float32),
        "ln1_b": jnp.zeros((L, 1, H), jnp.float32),
        "wi": nrm(next(keys), (L, H, I)),
        "bi": jnp.zeros((L, 1, I), jnp.float32),
        "wo2": nrm(next(keys), (L, I, H)),
        "bo2": jnp.zeros((L, 1, H), jnp.float32),
        "ln2_g": jnp.ones((L, 1, H), jnp.float32),
        "ln2_b": jnp.zeros((L, 1, H), jnp.float32),
        "pool_w": nrm(next(keys), (H, H)),
        "pool_b": jnp.zeros((1, H), jnp.float32),
    }

    # nn.Embedding(n_vocab_id, 130, padding_idx=n_vocab_id-1): pad row is zero
    id_emb = nrm(next(keys), (cfg["n_vocab_id"], ID))
    p["id_emb"] = id_emb.at[cfg["n_vocab_id"] - 1].set(0.0)

    # fc: Linear(hidden + 390, num_classes) — split & zero-pad to 128 lanes so
    # the fused kernel's output store is lane-dense.
    fc_w = nrm(next(keys), (H + 3 * ID, C))
    fc_b = jnp.zeros((C,), jnp.float32)
    p["fc_w_pool"] = jnp.zeros((H, NPAD), jnp.float32).at[:, :C].set(fc_w[:H])
    p["fc_w_id"] = jnp.zeros((3 * ID, NPAD), jnp.float32).at[:, :C].set(fc_w[H:])
    p["fc_b"] = jnp.zeros((1, NPAD), jnp.float32).at[0, :C].set(fc_b)
    return p


# ---------------------------------------------------------------------------
# Forward: JAX glue (gathers) + one fused pallas_call
# ---------------------------------------------------------------------------
@jax.jit
def model_forward(params, context, mask, id_triples):
    """Mirrors Model.forward:
       x[0]=context (B,S) ids, x[2]=mask (B,S), x[3]=id_triples (B,3)."""
    cfg = CFG
    B, S = context.shape
    H = cfg["hidden"]

    # embedding gathers (glue)
    emb = (params["word_emb"][context]
           + params["pos_emb"][:S][None, :, :]
           + params["type_emb"][0][None, None, :])
    emb2d = emb.reshape(B * S, H).astype(jnp.float32)

    # additive attention mask, one row per batch element (broadcast in-kernel)
    addmask = (1.0 - mask.astype(jnp.float32)) * -10000.0              # (B, S)

    # id-embedding gathers + concat (glue)
    id_feats = jnp.concatenate(
        [params["id_emb"][id_triples[:, 0]],
         params["id_emb"][id_triples[:, 1]],
         params["id_emb"][id_triples[:, 2]]], axis=1)                  # (B,390)

    inputs = [emb2d, addmask,
              params["emb_ln_g"], params["emb_ln_b"],
              params["wqkv"], params["bqkv"], params["wo"], params["bo"],
              params["ln1_g"], params["ln1_b"],
              params["wi"], params["bi"], params["wo2"], params["bo2"],
              params["ln2_g"], params["ln2_b"],
              params["pool_w"], params["pool_b"],
              id_feats,
              params["fc_w_pool"], params["fc_w_id"], params["fc_b"]]

    logits_pad = pl.pallas_call(
        _make_fused_kernel(cfg),
        grid=(1,),
        out_shape=jax.ShapeDtypeStruct((B, NPAD), jnp.float32),
        in_specs=[_full_spec(x.shape) for x in inputs],
        out_specs=_full_spec((B, NPAD)),
        compiler_params=pltpu.CompilerParams(
            dimension_semantics=("arbitrary",)),
    )(*inputs)

    return logits_pad[:, :cfg["num_classes"]]


# ---------------------------------------------------------------------------
if __name__ == "__main__":
    key = jax.random.PRNGKey(0)
    k_param, k_ctx, k_ids = jax.random.split(key, 3)

    params = init_params(k_param, CFG)

    B, S = CFG["batch"], CFG["seq"]
    context = jax.random.randint(k_ctx, (B, S), 0, CFG["vocab_size"],
                                 dtype=jnp.int32)
    # attention mask: second example has 2 padded positions at the end
    mask = jnp.ones((B, S), jnp.int32).at[1, S - 2:].set(0)
    id_triples = jax.random.randint(k_ids, (B, 3), 0, CFG["n_vocab_id"],
                                    dtype=jnp.int32)

    out = model_forward(params, context, mask, id_triples)
    out = jax.block_until_ready(out)
    assert out.shape == (B, CFG["num_classes"])
    assert bool(jnp.all(jnp.isfinite(out)))
    print("KERNEL_OK")
</pallas_src>

<mosaic_0001>
module attributes {stable_mosaic.version = 11 : i64} {
  func.func @kernel(%arg0: i32, %arg1: memref<16x32xf32, #tpu.memory_space<vmem>>, %arg2: memref<2x8xf32, #tpu.memory_space<vmem>>, %arg3: memref<1x32xf32, #tpu.memory_space<vmem>>, %arg4: memref<1x32xf32, #tpu.memory_space<vmem>>, %arg5: memref<2x32x96xf32, #tpu.memory_space<vmem>>, %arg6: memref<2x1x96xf32, #tpu.memory_space<vmem>>, %arg7: memref<2x32x32xf32, #tpu.memory_space<vmem>>, %arg8: memref<2x1x32xf32, #tpu.memory_space<vmem>>, %arg9: memref<2x1x32xf32, #tpu.memory_space<vmem>>, %arg10: memref<2x1x32xf32, #tpu.memory_space<vmem>>, %arg11: memref<2x32x64xf32, #tpu.memory_space<vmem>>, %arg12: memref<2x1x64xf32, #tpu.memory_space<vmem>>, %arg13: memref<2x64x32xf32, #tpu.memory_space<vmem>>, %arg14: memref<2x1x32xf32, #tpu.memory_space<vmem>>, %arg15: memref<2x1x32xf32, #tpu.memory_space<vmem>>, %arg16: memref<2x1x32xf32, #tpu.memory_space<vmem>>, %arg17: memref<32x32xf32, #tpu.memory_space<vmem>>, %arg18: memref<1x32xf32, #tpu.memory_space<vmem>>, %arg19: memref<2x390xf32, #tpu.memory_space<vmem>>, %arg20: memref<32x128xf32, #tpu.memory_space<vmem>>, %arg21: memref<390x128xf32, #tpu.memory_space<vmem>>, %arg22: memref<1x128xf32, #tpu.memory_space<vmem>>, %arg23: memref<2x128xf32, #tpu.memory_space<vmem>>) attributes {dimension_semantics = [#tpu.dimension_semantics<arbitrary>], iteration_bounds = array<i64: 1>, scalar_prefetch = 0 : i64, scratch_operands = 0 : i64, tpu.core_type = #tpu.core_type<tc>, window_params = [{pipeline_mode = #tpu.pipeline_mode<synchronous>, transform_indices = @transform_0, window_bounds = array<i64: 16, 32>}, {pipeline_mode = #tpu.pipeline_mode<synchronous>, transform_indices = @transform_1, window_bounds = array<i64: 2, 8>}, {pipeline_mode = #tpu.pipeline_mode<synchronous>, transform_indices = @transform_2, window_bounds = array<i64: 1, 32>}, {pipeline_mode = #tpu.pipeline_mode<synchronous>, transform_indices = @transform_3, window_bounds = array<i64: 1, 32>}, {pipeline_mode = #tpu.pipeline_mode<synchronous>, transform_indices = @transform_4, window_bounds = array<i64: 2, 32, 96>}, {pipeline_mode = #tpu.pipeline_mode<synchronous>, transform_indices = @transform_5, window_bounds = array<i64: 2, 1, 96>}, {pipeline_mode = #tpu.pipeline_mode<synchronous>, transform_indices = @transform_6, window_bounds = array<i64: 2, 32, 32>}, {pipeline_mode = #tpu.pipeline_mode<synchronous>, transform_indices = @transform_7, window_bounds = array<i64: 2, 1, 32>}, {pipeline_mode = #tpu.pipeline_mode<synchronous>, transform_indices = @transform_8, window_bounds = array<i64: 2, 1, 32>}, {pipeline_mode = #tpu.pipeline_mode<synchronous>, transform_indices = @transform_9, window_bounds = array<i64: 2, 1, 32>}, {pipeline_mode = #tpu.pipeline_mode<synchronous>, transform_indices = @transform_10, window_bounds = array<i64: 2, 32, 64>}, {pipeline_mode = #tpu.pipeline_mode<synchronous>, transform_indices = @transform_11, window_bounds = array<i64: 2, 1, 64>}, {pipeline_mode = #tpu.pipeline_mode<synchronous>, transform_indices = @transform_12, window_bounds = array<i64: 2, 64, 32>}, {pipeline_mode = #tpu.pipeline_mode<synchronous>, transform_indices = @transform_13, window_bounds = array<i64: 2, 1, 32>}, {pipeline_mode = #tpu.pipeline_mode<synchronous>, transform_indices = @transform_14, window_bounds = array<i64: 2, 1, 32>}, {pipeline_mode = #tpu.pipeline_mode<synchronous>, transform_indices = @transform_15, window_bounds = array<i64: 2, 1, 32>}, {pipeline_mode = #tpu.pipeline_mode<synchronous>, transform_indices = @transform_16, window_bounds = array<i64: 32, 32>}, {pipeline_mode = #tpu.pipeline_mode<synchronous>, transform_indices = @transform_17, window_bounds = array<i64: 1, 32>}, {pipeline_mode = #tpu.pipeline_mode<synchronous>, transform_indices = @transform_18, window_bounds = array<i64: 2, 390>}, {pipeline_mode = #tpu.pipeline_mode<synchronous>, transform_indices = @transform_19, window_bounds = array<i64: 32, 128>}, {pipeline_mode = #tpu.pipeline_mode<synchronous>, transform_indices = @transform_20, window_bounds = array<i64: 390, 128>}, {pipeline_mode = #tpu.pipeline_mode<synchronous>, transform_indices = @transform_21, window_bounds = array<i64: 1, 128>}, {pipeline_mode = #tpu.pipeline_mode<synchronous>, transform_indices = @transform_22, window_bounds = array<i64: 2, 128>}]} {
    %c0 = arith.constant 0 : index
    %c0_0 = arith.constant 0 : index
    %0 = vector.load %arg1[%c0, %c0_0] : memref<16x32xf32, #tpu.memory_space<vmem>>, vector<16x32xf32>
    %c0_1 = arith.constant 0 : index
    %c0_2 = arith.constant 0 : index
    %1 = vector.load %arg3[%c0_1, %c0_2] : memref<1x32xf32, #tpu.memory_space<vmem>>, vector<1x32xf32>
    %c0_3 = arith.constant 0 : index
    %c0_4 = arith.constant 0 : index
    %2 = vector.load %arg4[%c0_3, %c0_4] : memref<1x32xf32, #tpu.memory_space<vmem>>, vector<1x32xf32>
    %cst = arith.constant dense<0.000000e+00> : vector<16xf32>
    %3 = vector.multi_reduction <add>, %0, %cst [1] : vector<16x32xf32> to vector<16xf32>
    %4 = vector.shape_cast %3 : vector<16xf32> to vector<16x1xf32>
    %cst_5 = arith.constant 3.200000e+01 : f32
    %5 = vector.broadcast %cst_5 : f32 to vector<16x1xf32>
    %6 = arith.divf %4, %5 : vector<16x1xf32>
    %7 = vector.broadcast %6 : vector<16x1xf32> to vector<16x32xf32>
    %8 = arith.subf %0, %7 : vector<16x32xf32>
    %9 = arith.mulf %8, %8 : vector<16x32xf32>
    %cst_6 = arith.constant dense<0.000000e+00> : vector<16xf32>
    %10 = vector.multi_reduction <add>, %9, %cst_6 [1] : vector<16x32xf32> to vector<16xf32>
    %11 = vector.shape_cast %10 : vector<16xf32> to vector<16x1xf32>
    %cst_7 = arith.constant 3.200000e+01 : f32
    %12 = vector.broadcast %cst_7 : f32 to vector<16x1xf32>
    %13 = arith.divf %11, %12 : vector<16x1xf32>
    %14 = vector.broadcast %6 : vector<16x1xf32> to vector<16x32xf32>
    %15 = arith.subf %0, %14 : vector<16x32xf32>
    %cst_8 = arith.constant 9.99999996E-13 : f32
    %16 = vector.broadcast %cst_8 : f32 to vector<16x1xf32>
    %17 = arith.addf %13, %16 : vector<16x1xf32>
    %18 = math.rsqrt %17 : vector<16x1xf32>
    %19 = vector.broadcast %18 : vector<16x1xf32> to vector<16x32xf32>
    %20 = arith.mulf %15, %19 : vector<16x32xf32>
    %21 = vector.broadcast %1 : vector<1x32xf32> to vector<16x32xf32>
    %22 = arith.mulf %20, %21 : vector<16x32xf32>
    %23 = vector.broadcast %2 : vector<1x32xf32> to vector<16x32xf32>
    %24 = arith.addf %22, %23 : vector<16x32xf32>
    %c0_9 = arith.constant 0 : index
    %c0_10 = arith.constant 0 : index
    %25 = vector.load %arg2[%c0_9, %c0_10] : memref<2x8xf32, #tpu.memory_space<vmem>>, vector<2x8xf32>
    %c0_11 = arith.constant 0 : index
    %c0_12 = arith.constant 0 : index
    %c0_13 = arith.constant 0 : index
    %26 = vector.load %arg5[%c0_11, %c0_12, %c0_13] : memref<2x32x96xf32, #tpu.memory_space<vmem>>, vector<1x32x96xf32>
    %27 = vector.shape_cast %26 : vector<1x32x96xf32> to vector<32x96xf32>
    %cst_14 = arith.constant dense<0.000000e+00> : vector<16x96xf32>
    %28 = tpu.matmul %24, %27, %cst_14 {dimension_numbers = #tpu.dot_dimension_numbers<[1], [0], [0], [1], [0, 0, 1, 1], [], []>} : vector<16x32xf32>, vector<32x96xf32>, vector<16x96xf32> -> vector<16x96xf32>
    %c0_15 = arith.constant 0 : index
    %c0_16 = arith.constant 0 : index
    %c0_17 = arith.constant 0 : index
    %29 = vector.load %arg6[%c0_15, %c0_16, %c0_17] : memref<2x1x96xf32, #tpu.memory_space<vmem>>, vector<1x1x96xf32>
    %30 = vector.shape_cast %29 : vector<1x1x96xf32> to vector<1x96xf32>
    %31 = vector.broadcast %30 : vector<1x96xf32> to vector<16x96xf32>
    %32 = arith.addf %28, %31 : vector<16x96xf32>
    %c0_18 = arith.constant 0 : index
    %c0_19 = arith.constant 0 : index
    %c0_20 = arith.constant 0 : index
    %33 = vector.load %arg7[%c0_18, %c0_19, %c0_20] : memref<2x32x32xf32, #tpu.memory_space<vmem>>, vector<1x32x32xf32>
    %34 = vector.shape_cast %33 : vector<1x32x32xf32> to vector<32x32xf32>
    %35 = vector.extract_strided_slice %25 {offsets = [0, 0], sizes = [1, 8], strides = [1, 1]} : vector<2x8xf32> to vector<1x8xf32>
    %cst_21 = arith.constant 0.000000e+00 : f32
    %36 = vector.broadcast %cst_21 : f32 to vector<8x32xf32>
    %37 = vector.extract_strided_slice %32 {offsets = [0, 0], sizes = [8, 16], strides = [1, 1]} : vector<16x96xf32> to vector<8x16xf32>
    %38 = vector.extract_strided_slice %32 {offsets = [0, 32], sizes = [8, 16], strides = [1, 1]} : vector<16x96xf32> to vector<8x16xf32>
    %39 = vector.extract_strided_slice %32 {offsets = [0, 64], sizes = [8, 16], strides = [1, 1]} : vector<16x96xf32> to vector<8x16xf32>
    "tpu.trace_start"() <{level = 10 : i32, message = "qd,kd->qk"}> : () -> ()
    %cst_22 = arith.constant dense<0.000000e+00> : vector<8x8xf32>
    %40 = tpu.matmul %37, %38, %cst_22 {dimension_numbers = #tpu.dot_dimension_numbers<[1], [1], [0], [0], [0, 0, 1, 0], [], []>} : vector<8x16xf32>, vector<8x16xf32>, vector<8x8xf32> -> vector<8x8xf32>
    "tpu.trace_stop"() : () -> ()
    %cst_23 = arith.constant 2.500000e-01 : f32
    %41 = vector.broadcast %cst_23 : f32 to vector<8x8xf32>
    %42 = arith.mulf %40, %41 : vector<8x8xf32>
    %43 = vector.broadcast %35 : vector<1x8xf32> to vector<8x8xf32>
    %44 = arith.addf %42, %43 : vector<8x8xf32>
    %cst_24 = arith.constant dense<0xFF800000> : vector<8xf32>
    %45 = vector.multi_reduction <maximumf>, %44, %cst_24 [1] : vector<8x8xf32> to vector<8xf32>
    %46 = vector.shape_cast %45 : vector<8xf32> to vector<8x1xf32>
    %47 = vector.broadcast %46 : vector<8x1xf32> to vector<8x8xf32>
    %48 = arith.subf %44, %47 : vector<8x8xf32>
    %49 = math.exp %48 : vector<8x8xf32>
    %cst_25 = arith.constant dense<0.000000e+00> : vector<8xf32>
    %50 = vector.multi_reduction <add>, %49, %cst_25 [1] : vector<8x8xf32> to vector<8xf32>
    %51 = vector.shape_cast %50 : vector<8xf32> to vector<8x1xf32>
    %52 = tpu.reciprocal %51 {approx = true} : vector<8x1xf32> -> vector<8x1xf32>
    %53 = vector.broadcast %52 : vector<8x1xf32> to vector<8x8xf32>
    %54 = arith.mulf %49, %53 : vector<8x8xf32>
    %cst_26 = arith.constant dense<0.000000e+00> : vector<8x16xf32>
    %55 = tpu.matmul %54, %39, %cst_26 {dimension_numbers = #tpu.dot_dimension_numbers<[1], [0], [0], [1], [0, 0, 1, 1], [], []>} : vector<8x8xf32>, vector<8x16xf32>, vector<8x16xf32> -> vector<8x16xf32>
    %56 = vector.extract_strided_slice %34 {offsets = [0, 0], sizes = [16, 32], strides = [1, 1]} : vector<32x32xf32> to vector<16x32xf32>
    %cst_27 = arith.constant dense<0.000000e+00> : vector<8x32xf32>
    %57 = tpu.matmul %55, %56, %cst_27 {dimension_numbers = #tpu.dot_dimension_numbers<[1], [0], [0], [1], [0, 0, 1, 1], [], []>} : vector<8x16xf32>, vector<16x32xf32>, vector<8x32xf32> -> vector<8x32xf32>
    %58 = arith.addf %36, %57 : vector<8x32xf32>
    %59 = vector.extract_strided_slice %32 {offsets = [0, 16], sizes = [8, 16], strides = [1, 1]} : vector<16x96xf32> to vector<8x16xf32>
    %60 = vector.extract_strided_slice %32 {offsets = [0, 48], sizes = [8, 16], strides = [1, 1]} : vector<16x96xf32> to vector<8x16xf32>
    %61 = vector.extract_strided_slice %32 {offsets = [0, 80], sizes = [8, 16], strides = [1, 1]} : vector<16x96xf32> to vector<8x16xf32>
    "tpu.trace_start"() <{level = 10 : i32, message = "qd,kd->qk"}> : () -> ()
    %cst_28 = arith.constant dense<0.000000e+00> : vector<8x8xf32>
    %62 = tpu.matmul %59, %60, %cst_28 {dimension_numbers = #tpu.dot_dimension_numbers<[1], [1], [0], [0], [0, 0, 1, 0], [], []>} : vector<8x16xf32>, vector<8x16xf32>, vector<8x8xf32> -> vector<8x8xf32>
    "tpu.trace_stop"() : () -> ()
    %cst_29 = arith.constant 2.500000e-01 : f32
    %63 = vector.broadcast %cst_29 : f32 to vector<8x8xf32>
    %64 = arith.mulf %62, %63 : vector<8x8xf32>
    %65 = vector.broadcast %35 : vector<1x8xf32> to vector<8x8xf32>
    %66 = arith.addf %64, %65 : vector<8x8xf32>
    %cst_30 = arith.constant dense<0xFF800000> : vector<8xf32>
    %67 = vector.multi_reduction <maximumf>, %66, %cst_30 [1] : vector<8x8xf32> to vector<8xf32>
    %68 = vector.shape_cast %67 : vector<8xf32> to vector<8x1xf32>
    %69 = vector.broadcast %68 : vector<8x1xf32> to vector<8x8xf32>
    %70 = arith.subf %66, %69 : vector<8x8xf32>
    %71 = math.exp %70 : vector<8x8xf32>
    %cst_31 = arith.constant dense<0.000000e+00> : vector<8xf32>
    %72 = vector.multi_reduction <add>, %71, %cst_31 [1] : vector<8x8xf32> to vector<8xf32>
    %73 = vector.shape_cast %72 : vector<8xf32> to vector<8x1xf32>
    %74 = tpu.reciprocal %73 {approx = true} : vector<8x1xf32> -> vector<8x1xf32>
    %75 = vector.broadcast %74 : vector<8x1xf32> to vector<8x8xf32>
    %76 = arith.mulf %71, %75 : vector<8x8xf32>
    %cst_32 = arith.constant dense<0.000000e+00> : vector<8x16xf32>
    %77 = tpu.matmul %76, %61, %cst_32 {dimension_numbers = #tpu.dot_dimension_numbers<[1], [0], [0], [1], [0, 0, 1, 1], [], []>} : vector<8x8xf32>, vector<8x16xf32>, vector<8x16xf32> -> vector<8x16xf32>
    %78 = vector.extract_strided_slice %34 {offsets = [16, 0], sizes = [16, 32], strides = [1, 1]} : vector<32x32xf32> to vector<16x32xf32>
    %cst_33 = arith.constant dense<0.000000e+00> : vector<8x32xf32>
    %79 = tpu.matmul %77, %78, %cst_33 {dimension_numbers = #tpu.dot_dimension_numbers<[1], [0], [0], [1], [0, 0, 1, 1], [], []>} : vector<8x16xf32>, vector<16x32xf32>, vector<8x32xf32> -> vector<8x32xf32>
    %80 = arith.addf %58, %79 : vector<8x32xf32>
    %81 = vector.extract_strided_slice %25 {offsets = [1, 0], sizes = [1, 8], strides = [1, 1]} : vector<2x8xf32> to vector<1x8xf32>
    %cst_34 = arith.constant 0.000000e+00 : f32
    %82 = vector.broadcast %cst_34 : f32 to vector<8x32xf32>
    %83 = vector.extract_strided_slice %32 {offsets = [8, 0], sizes = [8, 16], strides = [1, 1]} : vector<16x96xf32> to vector<8x16xf32>
    %84 = vector.extract_strided_slice %32 {offsets = [8, 32], sizes = [8, 16], strides = [1, 1]} : vector<16x96xf32> to vector<8x16xf32>
    %85 = vector.extract_strided_slice %32 {offsets = [8, 64], sizes = [8, 16], strides = [1, 1]} : vector<16x96xf32> to vector<8x16xf32>
    "tpu.trace_start"() <{level = 10 : i32, message = "qd,kd->qk"}> : () -> ()
    %cst_35 = arith.constant dense<0.000000e+00> : vector<8x8xf32>
    %86 = tpu.matmul %83, %84, %cst_35 {dimension_numbers = #tpu.dot_dimension_numbers<[1], [1], [0], [0], [0, 0, 1, 0], [], []>} : vector<8x16xf32>, vector<8x16xf32>, vector<8x8xf32> -> vector<8x8xf32>
    "tpu.trace_stop"() : () -> ()
    %cst_36 = arith.constant 2.500000e-01 : f32
    %87 = vector.broadcast %cst_36 : f32 to vector<8x8xf32>
    %88 = arith.mulf %86, %87 : vector<8x8xf32>
    %89 = vector.broadcast %81 : vector<1x8xf32> to vector<8x8xf32>
    %90 = arith.addf %88, %89 : vector<8x8xf32>
    %cst_37 = arith.constant dense<0xFF800000> : vector<8xf32>
    %91 = vector.multi_reduction <maximumf>, %90, %cst_37 [1] : vector<8x8xf32> to vector<8xf32>
    %92 = vector.shape_cast %91 : vector<8xf32> to vector<8x1xf32>
    %93 = vector.broadcast %92 : vector<8x1xf32> to vector<8x8xf32>
    %94 = arith.subf %90, %93 : vector<8x8xf32>
    %95 = math.exp %94 : vector<8x8xf32>
    %cst_38 = arith.constant dense<0.000000e+00> : vector<8xf32>
    %96 = vector.multi_reduction <add>, %95, %cst_38 [1] : vector<8x8xf32> to vector<8xf32>
    %97 = vector.shape_cast %96 : vector<8xf32> to vector<8x1xf32>
    %98 = tpu.reciprocal %97 {approx = true} : vector<8x1xf32> -> vector<8x1xf32>
    %99 = vector.broadcast %98 : vector<8x1xf32> to vector<8x8xf32>
    %100 = arith.mulf %95, %99 : vector<8x8xf32>
    %cst_39 = arith.constant dense<0.000000e+00> : vector<8x16xf32>
    %101 = tpu.matmul %100, %85, %cst_39 {dimension_numbers = #tpu.dot_dimension_numbers<[1], [0], [0], [1], [0, 0, 1, 1], [], []>} : vector<8x8xf32>, vector<8x16xf32>, vector<8x16xf32> -> vector<8x16xf32>
    %102 = vector.extract_strided_slice %34 {offsets = [0, 0], sizes = [16, 32], strides = [1, 1]} : vector<32x32xf32> to vector<16x32xf32>
    %cst_40 = arith.constant dense<0.000000e+00> : vector<8x32xf32>
    %103 = tpu.matmul %101, %102, %cst_40 {dimension_numbers = #tpu.dot_dimension_numbers<[1], [0], [0], [1], [0, 0, 1, 1], [], []>} : vector<8x16xf32>, vector<16x32xf32>, vector<8x32xf32> -> vector<8x32xf32>
    %104 = arith.addf %82, %103 : vector<8x32xf32>
    %105 = vector.extract_strided_slice %32 {offsets = [8, 16], sizes = [8, 16], strides = [1, 1]} : vector<16x96xf32> to vector<8x16xf32>
    %106 = vector.extract_strided_slice %32 {offsets = [8, 48], sizes = [8, 16], strides = [1, 1]} : vector<16x96xf32> to vector<8x16xf32>
    %107 = vector.extract_strided_slice %32 {offsets = [8, 80], sizes = [8, 16], strides = [1, 1]} : vector<16x96xf32> to vector<8x16xf32>
    "tpu.trace_start"() <{level = 10 : i32, message = "qd,kd->qk"}> : () -> ()
    %cst_41 = arith.constant dense<0.000000e+00> : vector<8x8xf32>
    %108 = tpu.matmul %105, %106, %cst_41 {dimension_numbers = #tpu.dot_dimension_numbers<[1], [1], [0], [0], [0, 0, 1, 0], [], []>} : vector<8x16xf32>, vector<8x16xf32>, vector<8x8xf32> -> vector<8x8xf32>
    "tpu.trace_stop"() : () -> ()
    %cst_42 = arith.constant 2.500000e-01 : f32
    %109 = vector.broadcast %cst_42 : f32 to vector<8x8xf32>
    %110 = arith.mulf %108, %109 : vector<8x8xf32>
    %111 = vector.broadcast %81 : vector<1x8xf32> to vector<8x8xf32>
    %112 = arith.addf %110, %111 : vector<8x8xf32>
    %cst_43 = arith.constant dense<0xFF800000> : vector<8xf32>
    %113 = vector.multi_reduction <maximumf>, %112, %cst_43 [1] : vector<8x8xf32> to vector<8xf32>
    %114 = vector.shape_cast %113 : vector<8xf32> to vector<8x1xf32>
    %115 = vector.broadcast %114 : vector<8x1xf32> to vector<8x8xf32>
    %116 = arith.subf %112, %115 : vector<8x8xf32>
    %117 = math.exp %116 : vector<8x8xf32>
    %cst_44 = arith.constant dense<0.000000e+00> : vector<8xf32>
    %118 = vector.multi_reduction <add>, %117, %cst_44 [1] : vector<8x8xf32> to vector<8xf32>
    %119 = vector.shape_cast %118 : vector<8xf32> to vector<8x1xf32>
    %120 = tpu.reciprocal %119 {approx = true} : vector<8x1xf32> -> vector<8x1xf32>
    %121 = vector.broadcast %120 : vector<8x1xf32> to vector<8x8xf32>
    %122 = arith.mulf %117, %121 : vector<8x8xf32>
    %cst_45 = arith.constant dense<0.000000e+00> : vector<8x16xf32>
    %123 = tpu.matmul %122, %107, %cst_45 {dimension_numbers = #tpu.dot_dimension_numbers<[1], [0], [0], [1], [0, 0, 1, 1], [], []>} : vector<8x8xf32>, vector<8x16xf32>, vector<8x16xf32> -> vector<8x16xf32>
    %124 = vector.extract_strided_slice %34 {offsets = [16, 0], sizes = [16, 32], strides = [1, 1]} : vector<32x32xf32> to vector<16x32xf32>
    %cst_46 = arith.constant dense<0.000000e+00> : vector<8x32xf32>
    %125 = tpu.matmul %123, %124, %cst_46 {dimension_numbers = #tpu.dot_dimension_numbers<[1], [0], [0], [1], [0, 0, 1, 1], [], []>} : vector<8x16xf32>, vector<16x32xf32>, vector<8x32xf32> -> vector<8x32xf32>
    %126 = arith.addf %104, %125 : vector<8x32xf32>
    %127 = tpu.concatenate %80, %126 in 0 : vector<8x32xf32>, vector<8x32xf32> -> vector<16x32xf32>
    %c0_47 = arith.constant 0 : index
    %c0_48 = arith.constant 0 : index
    %c0_49 = arith.constant 0 : index
    %128 = vector.load %arg8[%c0_47, %c0_48, %c0_49] : memref<2x1x32xf32, #tpu.memory_space<vmem>>, vector<1x1x32xf32>
    %129 = vector.shape_cast %128 : vector<1x1x32xf32> to vector<1x32xf32>
    %130 = vector.broadcast %129 : vector<1x32xf32> to vector<16x32xf32>
    %131 = arith.addf %127, %130 : vector<16x32xf32>
    %132 = arith.addf %131, %24 : vector<16x32xf32>
    %c0_50 = arith.constant 0 : index
    %c0_51 = arith.constant 0 : index
    %c0_52 = arith.constant 0 : index
    %133 = vector.load %arg9[%c0_50, %c0_51, %c0_52] : memref<2x1x32xf32, #tpu.memory_space<vmem>>, vector<1x1x32xf32>
    %134 = vector.shape_cast %133 : vector<1x1x32xf32> to vector<1x32xf32>
    %c0_53 = arith.constant 0 : index
    %c0_54 = arith.constant 0 : index
    %c0_55 = arith.constant 0 : index
    %135 = vector.load %arg10[%c0_53, %c0_54, %c0_55] : memref<2x1x32xf32, #tpu.memory_space<vmem>>, vector<1x1x32xf32>
    %136 = vector.shape_cast %135 : vector<1x1x32xf32> to vector<1x32xf32>
    %cst_56 = arith.constant dense<0.000000e+00> : vector<16xf32>
    %137 = vector.multi_reduction <add>, %132, %cst_56 [1] : vector<16x32xf32> to vector<16xf32>
    %138 = vector.shape_cast %137 : vector<16xf32> to vector<16x1xf32>
    %cst_57 = arith.constant 3.200000e+01 : f32
    %139 = vector.broadcast %cst_57 : f32 to vector<16x1xf32>
    %140 = arith.divf %138, %139 : vector<16x1xf32>
    %141 = vector.broadcast %140 : vector<16x1xf32> to vector<16x32xf32>
    %142 = arith.subf %132, %141 : vector<16x32xf32>
    %143 = arith.mulf %142, %142 : vector<16x32xf32>
    %cst_58 = arith.constant dense<0.000000e+00> : vector<16xf32>
    %144 = vector.multi_reduction <add>, %143, %cst_58 [1] : vector<16x32xf32> to vector<16xf32>
    %145 = vector.shape_cast %144 : vector<16xf32> to vector<16x1xf32>
    %cst_59 = arith.constant 3.200000e+01 : f32
    %146 = vector.broadcast %cst_59 : f32 to vector<16x1xf32>
    %147 = arith.divf %145, %146 : vector<16x1xf32>
    %148 = vector.broadcast %140 : vector<16x1xf32> to vector<16x32xf32>
    %149 = arith.subf %132, %148 : vector<16x32xf32>
    %cst_60 = arith.constant 9.99999996E-13 : f32
    %150 = vector.broadcast %cst_60 : f32 to vector<16x1xf32>
    %151 = arith.addf %147, %150 : vector<16x1xf32>
    %152 = math.rsqrt %151 : vector<16x1xf32>
    %153 = vector.broadcast %152 : vector<16x1xf32> to vector<16x32xf32>
    %154 = arith.mulf %149, %153 : vector<16x32xf32>
    %155 = vector.broadcast %134 : vector<1x32xf32> to vector<16x32xf32>
    %156 = arith.mulf %154, %155 : vector<16x32xf32>
    %157 = vector.broadcast %136 : vector<1x32xf32> to vector<16x32xf32>
    %158 = arith.addf %156, %157 : vector<16x32xf32>
    %c0_61 = arith.constant 0 : index
    %c0_62 = arith.constant 0 : index
    %c0_63 = arith.constant 0 : index
    %159 = vector.load %arg11[%c0_61, %c0_62, %c0_63] : memref<2x32x64xf32, #tpu.memory_space<vmem>>, vector<1x32x64xf32>
    %160 = vector.shape_cast %159 : vector<1x32x64xf32> to vector<32x64xf32>
    %cst_64 = arith.constant dense<0.000000e+00> : vector<16x64xf32>
    %161 = tpu.matmul %158, %160, %cst_64 {dimension_numbers = #tpu.dot_dimension_numbers<[1], [0], [0], [1], [0, 0, 1, 1], [], []>} : vector<16x32xf32>, vector<32x64xf32>, vector<16x64xf32> -> vector<16x64xf32>
    %c0_65 = arith.constant 0 : index
    %c0_66 = arith.constant 0 : index
    %c0_67 = arith.constant 0 : index
    %162 = vector.load %arg12[%c0_65, %c0_66, %c0_67] : memref<2x1x64xf32, #tpu.memory_space<vmem>>, vector<1x1x64xf32>
    %163 = vector.shape_cast %162 : vector<1x1x64xf32> to vector<1x64xf32>
    %164 = vector.broadcast %163 : vector<1x64xf32> to vector<16x64xf32>
    %165 = arith.addf %161, %164 : vector<16x64xf32>
    %cst_68 = arith.constant 5.000000e-01 : f32
    %166 = vector.broadcast %cst_68 : f32 to vector<16x64xf32>
    %167 = arith.mulf %166, %165 : vector<16x64xf32>
    %cst_69 = arith.constant 4.471500e-02 : f32
    %168 = vector.broadcast %cst_69 : f32 to vector<16x64xf32>
    %169 = arith.mulf %168, %165 : vector<16x64xf32>
    %170 = arith.mulf %169, %165 : vector<16x64xf32>
    %171 = arith.mulf %170, %165 : vector<16x64xf32>
    %172 = arith.addf %165, %171 : vector<16x64xf32>
    %cst_70 = arith.constant 0.797884583 : f32
    %173 = vector.broadcast %cst_70 : f32 to vector<16x64xf32>
    %174 = arith.mulf %173, %172 : vector<16x64xf32>
    %175 = math.tanh %174 : vector<16x64xf32>
    %cst_71 = arith.constant 1.000000e+00 : f32
    %176 = vector.broadcast %cst_71 : f32 to vector<16x64xf32>
    %177 = arith.addf %176, %175 : vector<16x64xf32>
    %178 = arith.mulf %167, %177 : vector<16x64xf32>
    %c0_72 = arith.constant 0 : index
    %c0_73 = arith.constant 0 : index
    %c0_74 = arith.constant 0 : index
    %179 = vector.load %arg13[%c0_72, %c0_73, %c0_74] : memref<2x64x32xf32, #tpu.memory_space<vmem>>, vector<1x64x32xf32>
    %180 = vector.shape_cast %179 : vector<1x64x32xf32> to vector<64x32xf32>
    %cst_75 = arith.constant dense<0.000000e+00> : vector<16x32xf32>
    %181 = tpu.matmul %178, %180, %cst_75 {dimension_numbers = #tpu.dot_dimension_numbers<[1], [0], [0], [1], [0, 0, 1, 1], [], []>} : vector<16x64xf32>, vector<64x32xf32>, vector<16x32xf32> -> vector<16x32xf32>
    %c0_76 = arith.constant 0 : index
    %c0_77 = arith.constant 0 : index
    %c0_78 = arith.constant 0 : index
    %182 = vector.load %arg14[%c0_76, %c0_77, %c0_78] : memref<2x1x32xf32, #tpu.memory_space<vmem>>, vector<1x1x32xf32>
    %183 = vector.shape_cast %182 : vector<1x1x32xf32> to vector<1x32xf32>
    %184 = vector.broadcast %183 : vector<1x32xf32> to vector<16x32xf32>
    %185 = arith.addf %181, %184 : vector<16x32xf32>
    %186 = arith.addf %185, %158 : vector<16x32xf32>
    %c0_79 = arith.constant 0 : index
    %c0_80 = arith.constant 0 : index
    %c0_81 = arith.constant 0 : index
    %187 = vector.load %arg15[%c0_79, %c0_80, %c0_81] : memref<2x1x32xf32, #tpu.memory_space<vmem>>, vector<1x1x32xf32>
    %188 = vector.shape_cast %187 : vector<1x1x32xf32> to vector<1x32xf32>
    %c0_82 = arith.constant 0 : index
    %c0_83 = arith.constant 0 : index
    %c0_84 = arith.constant 0 : index
    %189 = vector.load %arg16[%c0_82, %c0_83, %c0_84] : memref<2x1x32xf32, #tpu.memory_space<vmem>>, vector<1x1x32xf32>
    %190 = vector.shape_cast %189 : vector<1x1x32xf32> to vector<1x32xf32>
    %cst_85 = arith.constant dense<0.000000e+00> : vector<16xf32>
    %191 = vector.multi_reduction <add>, %186, %cst_85 [1] : vector<16x32xf32> to vector<16xf32>
    %192 = vector.shape_cast %191 : vector<16xf32> to vector<16x1xf32>
    %cst_86 = arith.constant 3.200000e+01 : f32
    %193 = vector.broadcast %cst_86 : f32 to vector<16x1xf32>
    %194 = arith.divf %192, %193 : vector<16x1xf32>
    %195 = vector.broadcast %194 : vector<16x1xf32> to vector<16x32xf32>
    %196 = arith.subf %186, %195 : vector<16x32xf32>
    %197 = arith.mulf %196, %196 : vector<16x32xf32>
    %cst_87 = arith.constant dense<0.000000e+00> : vector<16xf32>
    %198 = vector.multi_reduction <add>, %197, %cst_87 [1] : vector<16x32xf32> to vector<16xf32>
    %199 = vector.shape_cast %198 : vector<16xf32> to vector<16x1xf32>
    %cst_88 = arith.constant 3.200000e+01 : f32
    %200 = vector.broadcast %cst_88 : f32 to vector<16x1xf32>
    %201 = arith.divf %199, %200 : vector<16x1xf32>
    %202 = vector.broadcast %194 : vector<16x1xf32> to vector<16x32xf32>
    %203 = arith.subf %186, %202 : vector<16x32xf32>
    %cst_89 = arith.constant 9.99999996E-13 : f32
    %204 = vector.broadcast %cst_89 : f32 to vector<16x1xf32>
    %205 = arith.addf %201, %204 : vector<16x1xf32>
    %206 = math.rsqrt %205 : vector<16x1xf32>
    %207 = vector.broadcast %206 : vector<16x1xf32> to vector<16x32xf32>
    %208 = arith.mulf %203, %207 : vector<16x32xf32>
    %209 = vector.broadcast %188 : vector<1x32xf32> to vector<16x32xf32>
    %210 = arith.mulf %208, %209 : vector<16x32xf32>
    %211 = vector.broadcast %190 : vector<1x32xf32> to vector<16x32xf32>
    %212 = arith.addf %210, %211 : vector<16x32xf32>
    %c1 = arith.constant 1 : index
    %c0_90 = arith.constant 0 : index
    %c0_91 = arith.constant 0 : index
    %213 = vector.load %arg5[%c1, %c0_90, %c0_91] : memref<2x32x96xf32, #tpu.memory_space<vmem>>, vector<1x32x96xf32>
    %214 = vector.shape_cast %213 : vector<1x32x96xf32> to vector<32x96xf32>
    %cst_92 = arith.constant dense<0.000000e+00> : vector<16x96xf32>
    %215 = tpu.matmul %212, %214, %cst_92 {dimension_numbers = #tpu.dot_dimension_numbers<[1], [0], [0], [1], [0, 0, 1, 1], [], []>} : vector<16x32xf32>, vector<32x96xf32>, vector<16x96xf32> -> vector<16x96xf32>
    %c1_93 = arith.constant 1 : index
    %c0_94 = arith.constant 0 : index
    %c0_95 = arith.constant 0 : index
    %216 = vector.load %arg6[%c1_93, %c0_94, %c0_95] : memref<2x1x96xf32, #tpu.memory_space<vmem>>, vector<1x1x96xf32>
    %217 = vector.shape_cast %216 : vector<1x1x96xf32> to vector<1x96xf32>
    %218 = vector.broadcast %217 : vector<1x96xf32> to vector<16x96xf32>
    %219 = arith.addf %215, %218 : vector<16x96xf32>
    %c1_96 = arith.constant 1 : index
    %c0_97 = arith.constant 0 : index
    %c0_98 = arith.constant 0 : index
    %220 = vector.load %arg7[%c1_96, %c0_97, %c0_98] : memref<2x32x32xf32, #tpu.memory_space<vmem>>, vector<1x32x32xf32>
    %221 = vector.shape_cast %220 : vector<1x32x32xf32> to vector<32x32xf32>
    %222 = vector.extract_strided_slice %25 {offsets = [0, 0], sizes = [1, 8], strides = [1, 1]} : vector<2x8xf32> to vector<1x8xf32>
    %cst_99 = arith.constant 0.000000e+00 : f32
    %223 = vector.broadcast %cst_99 : f32 to vector<8x32xf32>
    %224 = vector.extract_strided_slice %219 {offsets = [0, 0], sizes = [8, 16], strides = [1, 1]} : vector<16x96xf32> to vector<8x16xf32>
    %225 = vector.extract_strided_slice %219 {offsets = [0, 32], sizes = [8, 16], strides = [1, 1]} : vector<16x96xf32> to vector<8x16xf32>
    %226 = vector.extract_strided_slice %219 {offsets = [0, 64], sizes = [8, 16], strides = [1, 1]} : vector<16x96xf32> to vector<8x16xf32>
    "tpu.trace_start"() <{level = 10 : i32, message = "qd,kd->qk"}> : () -> ()
    %cst_100 = arith.constant dense<0.000000e+00> : vector<8x8xf32>
    %227 = tpu.matmul %224, %225, %cst_100 {dimension_numbers = #tpu.dot_dimension_numbers<[1], [1], [0], [0], [0, 0, 1, 0], [], []>} : vector<8x16xf32>, vector<8x16xf32>, vector<8x8xf32> -> vector<8x8xf32>
    "tpu.trace_stop"() : () -> ()
    %cst_101 = arith.constant 2.500000e-01 : f32
    %228 = vector.broadcast %cst_101 : f32 to vector<8x8xf32>
    %229 = arith.mulf %227, %228 : vector<8x8xf32>
    %230 = vector.broadcast %222 : vector<1x8xf32> to vector<8x8xf32>
    %231 = arith.addf %229, %230 : vector<8x8xf32>
    %cst_102 = arith.constant dense<0xFF800000> : vector<8xf32>
    %232 = vector.multi_reduction <maximumf>, %231, %cst_102 [1] : vector<8x8xf32> to vector<8xf32>
    %233 = vector.shape_cast %232 : vector<8xf32> to vector<8x1xf32>
    %234 = vector.broadcast %233 : vector<8x1xf32> to vector<8x8xf32>
    %235 = arith.subf %231, %234 : vector<8x8xf32>
    %236 = math.exp %235 : vector<8x8xf32>
    %cst_103 = arith.constant dense<0.000000e+00> : vector<8xf32>
    %237 = vector.multi_reduction <add>, %236, %cst_103 [1] : vector<8x8xf32> to vector<8xf32>
    %238 = vector.shape_cast %237 : vector<8xf32> to vector<8x1xf32>
    %239 = tpu.reciprocal %238 {approx = true} : vector<8x1xf32> -> vector<8x1xf32>
    %240 = vector.broadcast %239 : vector<8x1xf32> to vector<8x8xf32>
    %241 = arith.mulf %236, %240 : vector<8x8xf32>
    %cst_104 = arith.constant dense<0.000000e+00> : vector<8x16xf32>
    %242 = tpu.matmul %241, %226, %cst_104 {dimension_numbers = #tpu.dot_dimension_numbers<[1], [0], [0], [1], [0, 0, 1, 1], [], []>} : vector<8x8xf32>, vector<8x16xf32>, vector<8x16xf32> -> vector<8x16xf32>
    %243 = vector.extract_strided_slice %221 {offsets = [0, 0], sizes = [16, 32], strides = [1, 1]} : vector<32x32xf32> to vector<16x32xf32>
    %cst_105 = arith.constant dense<0.000000e+00> : vector<8x32xf32>
    %244 = tpu.matmul %242, %243, %cst_105 {dimension_numbers = #tpu.dot_dimension_numbers<[1], [0], [0], [1], [0, 0, 1, 1], [], []>} : vector<8x16xf32>, vector<16x32xf32>, vector<8x32xf32> -> vector<8x32xf32>
    %245 = arith.addf %223, %244 : vector<8x32xf32>
    %246 = vector.extract_strided_slice %219 {offsets = [0, 16], sizes = [8, 16], strides = [1, 1]} : vector<16x96xf32> to vector<8x16xf32>
    %247 = vector.extract_strided_slice %219 {offsets = [0, 48], sizes = [8, 16], strides = [1, 1]} : vector<16x96xf32> to vector<8x16xf32>
    %248 = vector.extract_strided_slice %219 {offsets = [0, 80], sizes = [8, 16], strides = [1, 1]} : vector<16x96xf32> to vector<8x16xf32>
    "tpu.trace_start"() <{level = 10 : i32, message = "qd,kd->qk"}> : () -> ()
    %cst_106 = arith.constant dense<0.000000e+00> : vector<8x8xf32>
    %249 = tpu.matmul %246, %247, %cst_106 {dimension_numbers = #tpu.dot_dimension_numbers<[1], [1], [0], [0], [0, 0, 1, 0], [], []>} : vector<8x16xf32>, vector<8x16xf32>, vector<8x8xf32> -> vector<8x8xf32>
    "tpu.trace_stop"() : () -> ()
    %cst_107 = arith.constant 2.500000e-01 : f32
    %250 = vector.broadcast %cst_107 : f32 to vector<8x8xf32>
    %251 = arith.mulf %249, %250 : vector<8x8xf32>
    %252 = vector.broadcast %222 : vector<1x8xf32> to vector<8x8xf32>
    %253 = arith.addf %251, %252 : vector<8x8xf32>
    %cst_108 = arith.constant dense<0xFF800000> : vector<8xf32>
    %254 = vector.multi_reduction <maximumf>, %253, %cst_108 [1] : vector<8x8xf32> to vector<8xf32>
    %255 = vector.shape_cast %254 : vector<8xf32> to vector<8x1xf32>
    %256 = vector.broadcast %255 : vector<8x1xf32> to vector<8x8xf32>
    %257 = arith.subf %253, %256 : vector<8x8xf32>
    %258 = math.exp %257 : vector<8x8xf32>
    %cst_109 = arith.constant dense<0.000000e+00> : vector<8xf32>
    %259 = vector.multi_reduction <add>, %258, %cst_109 [1] : vector<8x8xf32> to vector<8xf32>
    %260 = vector.shape_cast %259 : vector<8xf32> to vector<8x1xf32>
    %261 = tpu.reciprocal %260 {approx = true} : vector<8x1xf32> -> vector<8x1xf32>
    %262 = vector.broadcast %261 : vector<8x1xf32> to vector<8x8xf32>
    %263 = arith.mulf %258, %262 : vector<8x8xf32>
    %cst_110 = arith.constant dense<0.000000e+00> : vector<8x16xf32>
    %264 = tpu.matmul %263, %248, %cst_110 {dimension_numbers = #tpu.dot_dimension_numbers<[1], [0], [0], [1], [0, 0, 1, 1], [], []>} : vector<8x8xf32>, vector<8x16xf32>, vector<8x16xf32> -> vector<8x16xf32>
    %265 = vector.extract_strided_slice %221 {offsets = [16, 0], sizes = [16, 32], strides = [1, 1]} : vector<32x32xf32> to vector<16x32xf32>
    %cst_111 = arith.constant dense<0.000000e+00> : vector<8x32xf32>
    %266 = tpu.matmul %264, %265, %cst_111 {dimension_numbers = #tpu.dot_dimension_numbers<[1], [0], [0], [1], [0, 0, 1, 1], [], []>} : vector<8x16xf32>, vector<16x32xf32>, vector<8x32xf32> -> vector<8x32xf32>
    %267 = arith.addf %245, %266 : vector<8x32xf32>
    %268 = vector.extract_strided_slice %25 {offsets = [1, 0], sizes = [1, 8], strides = [1, 1]} : vector<2x8xf32> to vector<1x8xf32>
    %cst_112 = arith.constant 0.000000e+00 : f32
    %269 = vector.broadcast %cst_112 : f32 to vector<8x32xf32>
    %270 = vector.extract_strided_slice %219 {offsets = [8, 0], sizes = [8, 16], strides = [1, 1]} : vector<16x96xf32> to vector<8x16xf32>
    %271 = vector.extract_strided_slice %219 {offsets = [8, 32], sizes = [8, 16], strides = [1, 1]} : vector<16x96xf32> to vector<8x16xf32>
    %272 = vector.extract_strided_slice %219 {offsets = [8, 64], sizes = [8, 16], strides = [1, 1]} : vector<16x96xf32> to vector<8x16xf32>
    "tpu.trace_start"() <{level = 10 : i32, message = "qd,kd->qk"}> : () -> ()
    %cst_113 = arith.constant dense<0.000000e+00> : vector<8x8xf32>
    %273 = tpu.matmul %270, %271, %cst_113 {dimension_numbers = #tpu.dot_dimension_numbers<[1], [1], [0], [0], [0, 0, 1, 0], [], []>} : vector<8x16xf32>, vector<8x16xf32>, vector<8x8xf32> -> vector<8x8xf32>
    "tpu.trace_stop"() : () -> ()
    %cst_114 = arith.constant 2.500000e-01 : f32
    %274 = vector.broadcast %cst_114 : f32 to vector<8x8xf32>
    %275 = arith.mulf %273, %274 : vector<8x8xf32>
    %276 = vector.broadcast %268 : vector<1x8xf32> to vector<8x8xf32>
    %277 = arith.addf %275, %276 : vector<8x8xf32>
    %cst_115 = arith.constant dense<0xFF800000> : vector<8xf32>
    %278 = vector.multi_reduction <maximumf>, %277, %cst_115 [1] : vector<8x8xf32> to vector<8xf32>
    %279 = vector.shape_cast %278 : vector<8xf32> to vector<8x1xf32>
    %280 = vector.broadcast %279 : vector<8x1xf32> to vector<8x8xf32>
    %281 = arith.subf %277, %280 : vector<8x8xf32>
    %282 = math.exp %281 : vector<8x8xf32>
    %cst_116 = arith.constant dense<0.000000e+00> : vector<8xf32>
    %283 = vector.multi_reduction <add>, %282, %cst_116 [1] : vector<8x8xf32> to vector<8xf32>
    %284 = vector.shape_cast %283 : vector<8xf32> to vector<8x1xf32>
    %285 = tpu.reciprocal %284 {approx = true} : vector<8x1xf32> -> vector<8x1xf32>
    %286 = vector.broadcast %285 : vector<8x1xf32> to vector<8x8xf32>
    %287 = arith.mulf %282, %286 : vector<8x8xf32>
    %cst_117 = arith.constant dense<0.000000e+00> : vector<8x16xf32>
    %288 = tpu.matmul %287, %272, %cst_117 {dimension_numbers = #tpu.dot_dimension_numbers<[1], [0], [0], [1], [0, 0, 1, 1], [], []>} : vector<8x8xf32>, vector<8x16xf32>, vector<8x16xf32> -> vector<8x16xf32>
    %289 = vector.extract_strided_slice %221 {offsets = [0, 0], sizes = [16, 32], strides = [1, 1]} : vector<32x32xf32> to vector<16x32xf32>
    %cst_118 = arith.constant dense<0.000000e+00> : vector<8x32xf32>
    %290 = tpu.matmul %288, %289, %cst_118 {dimension_numbers = #tpu.dot_dimension_numbers<[1], [0], [0], [1], [0, 0, 1, 1], [], []>} : vector<8x16xf32>, vector<16x32xf32>, vector<8x32xf32> -> vector<8x32xf32>
    %291 = arith.addf %269, %290 : vector<8x32xf32>
    %292 = vector.extract_strided_slice %219 {offsets = [8, 16], sizes = [8, 16], strides = [1, 1]} : vector<16x96xf32> to vector<8x16xf32>
    %293 = vector.extract_strided_slice %219 {offsets = [8, 48], sizes = [8, 16], strides = [1, 1]} : vector<16x96xf32> to vector<8x16xf32>
    %294 = vector.extract_strided_slice %219 {offsets = [8, 80], sizes = [8, 16], strides = [1, 1]} : vector<16x96xf32> to vector<8x16xf32>
    "tpu.trace_start"() <{level = 10 : i32, message = "qd,kd->qk"}> : () -> ()
    %cst_119 = arith.constant dense<0.000000e+00> : vector<8x8xf32>
    %295 = tpu.matmul %292, %293, %cst_119 {dimension_numbers = #tpu.dot_dimension_numbers<[1], [1], [0], [0], [0, 0, 1, 0], [], []>} : vector<8x16xf32>, vector<8x16xf32>, vector<8x8xf32> -> vector<8x8xf32>
    "tpu.trace_stop"() : () -> ()
    %cst_120 = arith.constant 2.500000e-01 : f32
    %296 = vector.broadcast %cst_120 : f32 to vector<8x8xf32>
    %297 = arith.mulf %295, %296 : vector<8x8xf32>
    %298 = vector.broadcast %268 : vector<1x8xf32> to vector<8x8xf32>
    %299 = arith.addf %297, %298 : vector<8x8xf32>
    %cst_121 = arith.constant dense<0xFF800000> : vector<8xf32>
    %300 = vector.multi_reduction <maximumf>, %299, %cst_121 [1] : vector<8x8xf32> to vector<8xf32>
    %301 = vector.shape_cast %300 : vector<8xf32> to vector<8x1xf32>
    %302 = vector.broadcast %301 : vector<8x1xf32> to vector<8x8xf32>
    %303 = arith.subf %299, %302 : vector<8x8xf32>
    %304 = math.exp %303 : vector<8x8xf32>
    %cst_122 = arith.constant dense<0.000000e+00> : vector<8xf32>
    %305 = vector.multi_reduction <add>, %304, %cst_122 [1] : vector<8x8xf32> to vector<8xf32>
    %306 = vector.shape_cast %305 : vector<8xf32> to vector<8x1xf32>
    %307 = tpu.reciprocal %306 {approx = true} : vector<8x1xf32> -> vector<8x1xf32>
    %308 = vector.broadcast %307 : vector<8x1xf32> to vector<8x8xf32>
    %309 = arith.mulf %304, %308 : vector<8x8xf32>
    %cst_123 = arith.constant dense<0.000000e+00> : vector<8x16xf32>
    %310 = tpu.matmul %309, %294, %cst_123 {dimension_numbers = #tpu.dot_dimension_numbers<[1], [0], [0], [1], [0, 0, 1, 1], [], []>} : vector<8x8xf32>, vector<8x16xf32>, vector<8x16xf32> -> vector<8x16xf32>
    %311 = vector.extract_strided_slice %221 {offsets = [16, 0], sizes = [16, 32], strides = [1, 1]} : vector<32x32xf32> to vector<16x32xf32>
    %cst_124 = arith.constant dense<0.000000e+00> : vector<8x32xf32>
    %312 = tpu.matmul %310, %311, %cst_124 {dimension_numbers = #tpu.dot_dimension_numbers<[1], [0], [0], [1], [0, 0, 1, 1], [], []>} : vector<8x16xf32>, vector<16x32xf32>, vector<8x32xf32> -> vector<8x32xf32>
    %313 = arith.addf %291, %312 : vector<8x32xf32>
    %314 = tpu.concatenate %267, %313 in 0 : vector<8x32xf32>, vector<8x32xf32> -> vector<16x32xf32>
    %c1_125 = arith.constant 1 : index
    %c0_126 = arith.constant 0 : index
    %c0_127 = arith.constant 0 : index
    %315 = vector.load %arg8[%c1_125, %c0_126, %c0_127] : memref<2x1x32xf32, #tpu.memory_space<vmem>>, vector<1x1x32xf32>
    %316 = vector.shape_cast %315 : vector<1x1x32xf32> to vector<1x32xf32>
    %317 = vector.broadcast %316 : vector<1x32xf32> to vector<16x32xf32>
    %318 = arith.addf %314, %317 : vector<16x32xf32>
    %319 = arith.addf %318, %212 : vector<16x32xf32>
    %c1_128 = arith.constant 1 : index
    %c0_129 = arith.constant 0 : index
    %c0_130 = arith.constant 0 : index
    %320 = vector.load %arg9[%c1_128, %c0_129, %c0_130] : memref<2x1x32xf32, #tpu.memory_space<vmem>>, vector<1x1x32xf32>
    %321 = vector.shape_cast %320 : vector<1x1x32xf32> to vector<1x32xf32>
    %c1_131 = arith.constant 1 : index
    %c0_132 = arith.constant 0 : index
    %c0_133 = arith.constant 0 : index
    %322 = vector.load %arg10[%c1_131, %c0_132, %c0_133] : memref<2x1x32xf32, #tpu.memory_space<vmem>>, vector<1x1x32xf32>
    %323 = vector.shape_cast %322 : vector<1x1x32xf32> to vector<1x32xf32>
    %cst_134 = arith.constant dense<0.000000e+00> : vector<16xf32>
    %324 = vector.multi_reduction <add>, %319, %cst_134 [1] : vector<16x32xf32> to vector<16xf32>
    %325 = vector.shape_cast %324 : vector<16xf32> to vector<16x1xf32>
    %cst_135 = arith.constant 3.200000e+01 : f32
    %326 = vector.broadcast %cst_135 : f32 to vector<16x1xf32>
    %327 = arith.divf %325, %326 : vector<16x1xf32>
    %328 = vector.broadcast %327 : vector<16x1xf32> to vector<16x32xf32>
    %329 = arith.subf %319, %328 : vector<16x32xf32>
    %330 = arith.mulf %329, %329 : vector<16x32xf32>
    %cst_136 = arith.constant dense<0.000000e+00> : vector<16xf32>
    %331 = vector.multi_reduction <add>, %330, %cst_136 [1] : vector<16x32xf32> to vector<16xf32>
    %332 = vector.shape_cast %331 : vector<16xf32> to vector<16x1xf32>
    %cst_137 = arith.constant 3.200000e+01 : f32
    %333 = vector.broadcast %cst_137 : f32 to vector<16x1xf32>
    %334 = arith.divf %332, %333 : vector<16x1xf32>
    %335 = vector.broadcast %327 : vector<16x1xf32> to vector<16x32xf32>
    %336 = arith.subf %319, %335 : vector<16x32xf32>
    %cst_138 = arith.constant 9.99999996E-13 : f32
    %337 = vector.broadcast %cst_138 : f32 to vector<16x1xf32>
    %338 = arith.addf %334, %337 : vector<16x1xf32>
    %339 = math.rsqrt %338 : vector<16x1xf32>
    %340 = vector.broadcast %339 : vector<16x1xf32> to vector<16x32xf32>
    %341 = arith.mulf %336, %340 : vector<16x32xf32>
    %342 = vector.broadcast %321 : vector<1x32xf32> to vector<16x32xf32>
    %343 = arith.mulf %341, %342 : vector<16x32xf32>
    %344 = vector.broadcast %323 : vector<1x32xf32> to vector<16x32xf32>
    %345 = arith.addf %343, %344 : vector<16x32xf32>
    %c1_139 = arith.constant 1 : index
    %c0_140 = arith.constant 0 : index
    %c0_141 = arith.constant 0 : index
    %346 = vector.load %arg11[%c1_139, %c0_140, %c0_141] : memref<2x32x64xf32, #tpu.memory_space<vmem>>, vector<1x32x64xf32>
    %347 = vector.shape_cast %346 : vector<1x32x64xf32> to vector<32x64xf32>
    %cst_142 = arith.constant dense<0.000000e+00> : vector<16x64xf32>
    %348 = tpu.matmul %345, %347, %cst_142 {dimension_numbers = #tpu.dot_dimension_numbers<[1], [0], [0], [1], [0, 0, 1, 1], [], []>} : vector<16x32xf32>, vector<32x64xf32>, vector<16x64xf32> -> vector<16x64xf32>
    %c1_143 = arith.constant 1 : index
    %c0_144 = arith.constant 0 : index
    %c0_145 = arith.constant 0 : index
    %349 = vector.load %arg12[%c1_143, %c0_144, %c0_145] : memref<2x1x64xf32, #tpu.memory_space<vmem>>, vector<1x1x64xf32>
    %350 = vector.shape_cast %349 : vector<1x1x64xf32> to vector<1x64xf32>
    %351 = vector.broadcast %350 : vector<1x64xf32> to vector<16x64xf32>
    %352 = arith.addf %348, %351 : vector<16x64xf32>
    %cst_146 = arith.constant 5.000000e-01 : f32
    %353 = vector.broadcast %cst_146 : f32 to vector<16x64xf32>
    %354 = arith.mulf %353, %352 : vector<16x64xf32>
    %cst_147 = arith.constant 4.471500e-02 : f32
    %355 = vector.broadcast %cst_147 : f32 to vector<16x64xf32>
    %356 = arith.mulf %355, %352 : vector<16x64xf32>
    %357 = arith.mulf %356, %352 : vector<16x64xf32>
    %358 = arith.mulf %357, %352 : vector<16x64xf32>
    %359 = arith.addf %352, %358 : vector<16x64xf32>
    %cst_148 = arith.constant 0.797884583 : f32
    %360 = vector.broadcast %cst_148 : f32 to vector<16x64xf32>
    %361 = arith.mulf %360, %359 : vector<16x64xf32>
    %362 = math.tanh %361 : vector<16x64xf32>
    %cst_149 = arith.constant 1.000000e+00 : f32
    %363 = vector.broadcast %cst_149 : f32 to vector<16x64xf32>
    %364 = arith.addf %363, %362 : vector<16x64xf32>
    %365 = arith.mulf %354, %364 : vector<16x64xf32>
    %c1_150 = arith.constant 1 : index
    %c0_151 = arith.constant 0 : index
    %c0_152 = arith.constant 0 : index
    %366 = vector.load %arg13[%c1_150, %c0_151, %c0_152] : memref<2x64x32xf32, #tpu.memory_space<vmem>>, vector<1x64x32xf32>
    %367 = vector.shape_cast %366 : vector<1x64x32xf32> to vector<64x32xf32>
    %cst_153 = arith.constant dense<0.000000e+00> : vector<16x32xf32>
    %368 = tpu.matmul %365, %367, %cst_153 {dimension_numbers = #tpu.dot_dimension_numbers<[1], [0], [0], [1], [0, 0, 1, 1], [], []>} : vector<16x64xf32>, vector<64x32xf32>, vector<16x32xf32> -> vector<16x32xf32>
    %c1_154 = arith.constant 1 : index
    %c0_155 = arith.constant 0 : index
    %c0_156 = arith.constant 0 : index
    %369 = vector.load %arg14[%c1_154, %c0_155, %c0_156] : memref<2x1x32xf32, #tpu.memory_space<vmem>>, vector<1x1x32xf32>
    %370 = vector.shape_cast %369 : vector<1x1x32xf32> to vector<1x32xf32>
    %371 = vector.broadcast %370 : vector<1x32xf32> to vector<16x32xf32>
    %372 = arith.addf %368, %371 : vector<16x32xf32>
    %373 = arith.addf %372, %345 : vector<16x32xf32>
    %c1_157 = arith.constant 1 : index
    %c0_158 = arith.constant 0 : index
    %c0_159 = arith.constant 0 : index
    %374 = vector.load %arg15[%c1_157, %c0_158, %c0_159] : memref<2x1x32xf32, #tpu.memory_space<vmem>>, vector<1x1x32xf32>
    %375 = vector.shape_cast %374 : vector<1x1x32xf32> to vector<1x32xf32>
    %c1_160 = arith.constant 1 : index
    %c0_161 = arith.constant 0 : index
    %c0_162 = arith.constant 0 : index
    %376 = vector.load %arg16[%c1_160, %c0_161, %c0_162] : memref<2x1x32xf32, #tpu.memory_space<vmem>>, vector<1x1x32xf32>
    %377 = vector.shape_cast %376 : vector<1x1x32xf32> to vector<1x32xf32>
    %cst_163 = arith.constant dense<0.000000e+00> : vector<16xf32>
    %378 = vector.multi_reduction <add>, %373, %cst_163 [1] : vector<16x32xf32> to vector<16xf32>
    %379 = vector.shape_cast %378 : vector<16xf32> to vector<16x1xf32>
    %cst_164 = arith.constant 3.200000e+01 : f32
    %380 = vector.broadcast %cst_164 : f32 to vector<16x1xf32>
    %381 = arith.divf %379, %380 : vector<16x1xf32>
    %382 = vector.broadcast %381 : vector<16x1xf32> to vector<16x32xf32>
    %383 = arith.subf %373, %382 : vector<16x32xf32>
    %384 = arith.mulf %383, %383 : vector<16x32xf32>
    %cst_165 = arith.constant dense<0.000000e+00> : vector<16xf32>
    %385 = vector.multi_reduction <add>, %384, %cst_165 [1] : vector<16x32xf32> to vector<16xf32>
    %386 = vector.shape_cast %385 : vector<16xf32> to vector<16x1xf32>
    %cst_166 = arith.constant 3.200000e+01 : f32
    %387 = vector.broadcast %cst_166 : f32 to vector<16x1xf32>
    %388 = arith.divf %386, %387 : vector<16x1xf32>
    %389 = vector.broadcast %381 : vector<16x1xf32> to vector<16x32xf32>
    %390 = arith.subf %373, %389 : vector<16x32xf32>
    %cst_167 = arith.constant 9.99999996E-13 : f32
    %391 = vector.broadcast %cst_167 : f32 to vector<16x1xf32>
    %392 = arith.addf %388, %391 : vector<16x1xf32>
    %393 = math.rsqrt %392 : vector<16x1xf32>
    %394 = vector.broadcast %393 : vector<16x1xf32> to vector<16x32xf32>
    %395 = arith.mulf %390, %394 : vector<16x32xf32>
    %396 = vector.broadcast %375 : vector<1x32xf32> to vector<16x32xf32>
    %397 = arith.mulf %395, %396 : vector<16x32xf32>
    %398 = vector.broadcast %377 : vector<1x32xf32> to vector<16x32xf32>
    %399 = arith.addf %397, %398 : vector<16x32xf32>
    %c0_168 = arith.constant 0 : index
    %c0_169 = arith.constant 0 : index
    %400 = vector.load %arg17[%c0_168, %c0_169] : memref<32x32xf32, #tpu.memory_space<vmem>>, vector<32x32xf32>
    %c0_170 = arith.constant 0 : index
    %c0_171 = arith.constant 0 : index
    %401 = vector.load %arg18[%c0_170, %c0_171] : memref<1x32xf32, #tpu.memory_space<vmem>>, vector<1x32xf32>
    %c0_172 = arith.constant 0 : index
    %c0_173 = arith.constant 0 : index
    %402 = vector.load %arg20[%c0_172, %c0_173] : memref<32x128xf32, #tpu.memory_space<vmem>>, vector<32x128xf32>
    %c0_174 = arith.constant 0 : index
    %c0_175 = arith.constant 0 : index
    %403 = vector.load %arg21[%c0_174, %c0_175] : memref<390x128xf32, #tpu.memory_space<vmem>>, vector<390x128xf32>
    %c0_176 = arith.constant 0 : index
    %c0_177 = arith.constant 0 : index
    %404 = vector.load %arg22[%c0_176, %c0_177] : memref<1x128xf32, #tpu.memory_space<vmem>>, vector<1x128xf32>
    %c0_178 = arith.constant 0 : index
    %c0_179 = arith.constant 0 : index
    %405 = vector.load %arg19[%c0_178, %c0_179] : memref<2x390xf32, #tpu.memory_space<vmem>>, vector<2x390xf32>
    %406 = vector.extract_strided_slice %399 {offsets = [0, 0], sizes = [1, 32], strides = [1, 1]} : vector<16x32xf32> to vector<1x32xf32>
    %cst_180 = arith.constant dense<0.000000e+00> : vector<1x32xf32>
    %407 = tpu.matmul %406, %400, %cst_180 {dimension_numbers = #tpu.dot_dimension_numbers<[1], [0], [0], [1], [0, 0, 1, 1], [], []>} : vector<1x32xf32>, vector<32x32xf32>, vector<1x32xf32> -> vector<1x32xf32>
    %408 = arith.addf %407, %401 : vector<1x32xf32>
    %409 = math.tanh %408 : vector<1x32xf32>
    %cst_181 = arith.constant dense<0.000000e+00> : vector<1x128xf32>
    %410 = tpu.matmul %409, %402, %cst_181 {dimension_numbers = #tpu.dot_dimension_numbers<[1], [0], [0], [1], [0, 0, 1, 1], [], []>} : vector<1x32xf32>, vector<32x128xf32>, vector<1x128xf32> -> vector<1x128xf32>
    %411 = vector.extract_strided_slice %405 {offsets = [0, 0], sizes = [1, 390], strides = [1, 1]} : vector<2x390xf32> to vector<1x390xf32>
    %cst_182 = arith.constant dense<0.000000e+00> : vector<1x128xf32>
    %412 = tpu.matmul %411, %403, %cst_182 {dimension_numbers = #tpu.dot_dimension_numbers<[1], [0], [0], [1], [0, 0, 1, 1], [], []>} : vector<1x390xf32>, vector<390x128xf32>, vector<1x128xf32> -> vector<1x128xf32>
    %413 = arith.addf %410, %412 : vector<1x128xf32>
    %414 = arith.addf %413, %404 : vector<1x128xf32>
    %c0_183 = arith.constant 0 : index
    %c0_184 = arith.constant 0 : index
    %415 = vector.load %arg23[%c0_183, %c0_184] : memref<2x128xf32, #tpu.memory_space<vmem>>, vector<1x128xf32>
    tpu.vector_store %arg23[%c0_183, %c0_184], %414 {strides = array<i32>} : memref<2x128xf32, #tpu.memory_space<vmem>>, vector<1x128xf32>,
    %416 = vector.extract_strided_slice %399 {offsets = [8, 0], sizes = [1, 32], strides = [1, 1]} : vector<16x32xf32> to vector<1x32xf32>
    %cst_185 = arith.constant dense<0.000000e+00> : vector<1x32xf32>
    %417 = tpu.matmul %416, %400, %cst_185 {dimension_numbers = #tpu.dot_dimension_numbers<[1], [0], [0], [1], [0, 0, 1, 1], [], []>} : vector<1x32xf32>, vector<32x32xf32>, vector<1x32xf32> -> vector<1x32xf32>
    %418 = arith.addf %417, %401 : vector<1x32xf32>
    %419 = math.tanh %418 : vector<1x32xf32>
    %cst_186 = arith.constant dense<0.000000e+00> : vector<1x128xf32>
    %420 = tpu.matmul %419, %402, %cst_186 {dimension_numbers = #tpu.dot_dimension_numbers<[1], [0], [0], [1], [0, 0, 1, 1], [], []>} : vector<1x32xf32>, vector<32x128xf32>, vector<1x128xf32> -> vector<1x128xf32>
    %421 = vector.extract_strided_slice %405 {offsets = [1, 0], sizes = [1, 390], strides = [1, 1]} : vector<2x390xf32> to vector<1x390xf32>
    %cst_187 = arith.constant dense<0.000000e+00> : vector<1x128xf32>
    %422 = tpu.matmul %421, %403, %cst_187 {dimension_numbers = #tpu.dot_dimension_numbers<[1], [0], [0], [1], [0, 0, 1, 1], [], []>} : vector<1x390xf32>, vector<390x128xf32>, vector<1x128xf32> -> vector<1x128xf32>
    %423 = arith.addf %420, %422 : vector<1x128xf32>
    %424 = arith.addf %423, %404 : vector<1x128xf32>
    %c1_188 = arith.constant 1 : index
    %c0_189 = arith.constant 0 : index
    %425 = vector.load %arg23[%c1_188, %c0_189] : memref<2x128xf32, #tpu.memory_space<vmem>>, vector<1x128xf32>
    tpu.vector_store %arg23[%c1_188, %c0_189], %424 {strides = array<i32>} : memref<2x128xf32, #tpu.memory_space<vmem>>, vector<1x128xf32>,
    return
  }
  func.func @transform_0(%arg0: i32) -> (i32, i32) {
    %c0_i32 = arith.constant 0 : i32
    %c0_i32_0 = arith.constant 0 : i32
    %c0_i32_1 = arith.constant 0 : i32
    return %c0_i32, %c0_i32_0 : i32, i32
  }
  func.func @transform_1(%arg0: i32) -> (i32, i32) {
    %c0_i32 = arith.constant 0 : i32
    %c0_i32_0 = arith.constant 0 : i32
    %c0_i32_1 = arith.constant 0 : i32
    return %c0_i32, %c0_i32_0 : i32, i32
  }
  func.func @transform_2(%arg0: i32) -> (i32, i32) {
    %c0_i32 = arith.constant 0 : i32
    %c0_i32_0 = arith.constant 0 : i32
    %c0_i32_1 = arith.constant 0 : i32
    return %c0_i32, %c0_i32_0 : i32, i32
  }
  func.func @transform_3(%arg0: i32) -> (i32, i32) {
    %c0_i32 = arith.constant 0 : i32
    %c0_i32_0 = arith.constant 0 : i32
    %c0_i32_1 = arith.constant 0 : i32
    return %c0_i32, %c0_i32_0 : i32, i32
  }
  func.func @transform_4(%arg0: i32) -> (i32, i32, i32) {
    %c0_i32 = arith.constant 0 : i32
    %c0_i32_0 = arith.constant 0 : i32
    %c0_i32_1 = arith.constant 0 : i32
    %c0_i32_2 = arith.constant 0 : i32
    return %c0_i32, %c0_i32_0, %c0_i32_1 : i32, i32, i32
  }
  func.func @transform_5(%arg0: i32) -> (i32, i32, i32) {
    %c0_i32 = arith.constant 0 : i32
    %c0_i32_0 = arith.constant 0 : i32
    %c0_i32_1 = arith.constant 0 : i32
    %c0_i32_2 = arith.constant 0 : i32
    return %c0_i32, %c0_i32_0, %c0_i32_1 : i32, i32, i32
  }
  func.func @transform_6(%arg0: i32) -> (i32, i32, i32) {
    %c0_i32 = arith.constant 0 : i32
    %c0_i32_0 = arith.constant 0 : i32
    %c0_i32_1 = arith.constant 0 : i32
    %c0_i32_2 = arith.constant 0 : i32
    return %c0_i32, %c0_i32_0, %c0_i32_1 : i32, i32, i32
  }
  func.func @transform_7(%arg0: i32) -> (i32, i32, i32) {
    %c0_i32 = arith.constant 0 : i32
    %c0_i32_0 = arith.constant 0 : i32
    %c0_i32_1 = arith.constant 0 : i32
    %c0_i32_2 = arith.constant 0 : i32
    return %c0_i32, %c0_i32_0, %c0_i32_1 : i32, i32, i32
  }
  func.func @transform_8(%arg0: i32) -> (i32, i32, i32) {
    %c0_i32 = arith.constant 0 : i32
    %c0_i32_0 = arith.constant 0 : i32
    %c0_i32_1 = arith.constant 0 : i32
    %c0_i32_2 = arith.constant 0 : i32
    return %c0_i32, %c0_i32_0, %c0_i32_1 : i32, i32, i32
  }
  func.func @transform_9(%arg0: i32) -> (i32, i32, i32) {
    %c0_i32 = arith.constant 0 : i32
    %c0_i32_0 = arith.constant 0 : i32
    %c0_i32_1 = arith.constant 0 : i32
    %c0_i32_2 = arith.constant 0 : i32
    return %c0_i32, %c0_i32_0, %c0_i32_1 : i32, i32, i32
  }
  func.func @transform_10(%arg0: i32) -> (i32, i32, i32) {
    %c0_i32 = arith.constant 0 : i32
    %c0_i32_0 = arith.constant 0 : i32
    %c0_i32_1 = arith.constant 0 : i32
    %c0_i32_2 = arith.constant 0 : i32
    return %c0_i32, %c0_i32_0, %c0_i32_1 : i32, i32, i32
  }
  func.func @transform_11(%arg0: i32) -> (i32, i32, i32) {
    %c0_i32 = arith.constant 0 : i32
    %c0_i32_0 = arith.constant 0 : i32
    %c0_i32_1 = arith.constant 0 : i32
    %c0_i32_2 = arith.constant 0 : i32
    return %c0_i32, %c0_i32_0, %c0_i32_1 : i32, i32, i32
  }
  func.func @transform_12(%arg0: i32) -> (i32, i32, i32) {
    %c0_i32 = arith.constant 0 : i32
    %c0_i32_0 = arith.constant 0 : i32
    %c0_i32_1 = arith.constant 0 : i32
    %c0_i32_2 = arith.constant 0 : i32
    return %c0_i32, %c0_i32_0, %c0_i32_1 : i32, i32, i32
  }
  func.func @transform_13(%arg0: i32) -> (i32, i32, i32) {
    %c0_i32 = arith.constant 0 : i32
    %c0_i32_0 = arith.constant 0 : i32
    %c0_i32_1 = arith.constant 0 : i32
    %c0_i32_2 = arith.constant 0 : i32
    return %c0_i32, %c0_i32_0, %c0_i32_1 : i32, i32, i32
  }
  func.func @transform_14(%arg0: i32) -> (i32, i32, i32) {
    %c0_i32 = arith.constant 0 : i32
    %c0_i32_0 = arith.constant 0 : i32
    %c0_i32_1 = arith.constant 0 : i32
    %c0_i32_2 = arith.constant 0 : i32
    return %c0_i32, %c0_i32_0, %c0_i32_1 : i32, i32, i32
  }
  func.func @transform_15(%arg0: i32) -> (i32, i32, i32) {
    %c0_i32 = arith.constant 0 : i32
    %c0_i32_0 = arith.constant 0 : i32
    %c0_i32_1 = arith.constant 0 : i32
    %c0_i32_2 = arith.constant 0 : i32
    return %c0_i32, %c0_i32_0, %c0_i32_1 : i32, i32, i32
  }
  func.func @transform_16(%arg0: i32) -> (i32, i32) {
    %c0_i32 = arith.constant 0 : i32
    %c0_i32_0 = arith.constant 0 : i32
    %c0_i32_1 = arith.constant 0 : i32
    return %c0_i32, %c0_i32_0 : i32, i32
  }
  func.func @transform_17(%arg0: i32) -> (i32, i32) {
    %c0_i32 = arith.constant 0 : i32
    %c0_i32_0 = arith.constant 0 : i32
    %c0_i32_1 = arith.constant 0 : i32
    return %c0_i32, %c0_i32_0 : i32, i32
  }
  func.func @transform_18(%arg0: i32) -> (i32, i32) {
    %c0_i32 = arith.constant 0 : i32
    %c0_i32_0 = arith.constant 0 : i32
    %c0_i32_1 = arith.constant 0 : i32
    return %c0_i32, %c0_i32_0 : i32, i32
  }
  func.func @transform_19(%arg0: i32) -> (i32, i32) {
    %c0_i32 = arith.constant 0 : i32
    %c0_i32_0 = arith.constant 0 : i32
    %c0_i32_1 = arith.constant 0 : i32
    return %c0_i32, %c0_i32_0 : i32, i32
  }
  func.func @transform_20(%arg0: i32) -> (i32, i32) {
    %c0_i32 = arith.constant 0 : i32
    %c0_i32_0 = arith.constant 0 : i32
    %c0_i32_1 = arith.constant 0 : i32
    return %c0_i32, %c0_i32_0 : i32, i32
  }
  func.func @transform_21(%arg0: i32) -> (i32, i32) {
    %c0_i32 = arith.constant 0 : i32
    %c0_i32_0 = arith.constant 0 : i32
    %c0_i32_1 = arith.constant 0 : i32
    return %c0_i32, %c0_i32_0 : i32, i32
  }
  func.func @transform_22(%arg0: i32) -> (i32, i32) {
    %c0_i32 = arith.constant 0 : i32
    %c0_i32_0 = arith.constant 0 : i32
    %c0_i32_1 = arith.constant 0 : i32
    return %c0_i32, %c0_i32_0 : i32, i32
  }
}

</mosaic_0001>

<bundles_post_ra>
// kernel: model_forward.1
= control target key start
LH: loop header
LB: loop body
LE: loop exit
PB: predicated region body
PF: predicated region fallthrough
CT: control target
= control target key end

     0   :  { %s5916_s0 = inlined_call_operand.vmem [shape: f32[16,32], index: 0, kind: input, shape index: {}]   ;;  %s5917_s1 = inlined_call_operand.vmem [shape: f32[2,8], index: 1, kind: input, shape index: {}]   ;;  %s5918_s2 = inlined_call_operand.hbm [shape: f32[1,32], index: 2, kind: input, shape index: {}]   ;;  %s5919_s3 = inlined_call_operand.hbm [shape: f32[1,32], index: 3, kind: input, shape index: {}]   ;;  %s5920_s4 = inlined_call_operand.vmem [shape: f32[2,32,96], index: 4, kind: input, shape index: {}]   ;;  %s5921_s5 = inlined_call_operand.hbm [shape: f32[2,1,96], index: 5, kind: input, shape index: {}]   ;;  %s5922_s6 = inlined_call_operand.vmem [shape: f32[2,32,32], index: 6, kind: input, shape index: {}]   ;;  %s5923_s7 = inlined_call_operand.hbm [shape: f32[2,1,32], index: 7, kind: input, shape index: {}]   ;;  %s5924_s8 = inlined_call_operand.hbm [shape: f32[2,1,32], index: 8, kind: input, shape index: {}]   ;;  %s5925_s9 = inlined_call_operand.hbm [shape: f32[2,1,32], index: 9, kind: input, shape index: {}]   ;;  %s5926_s10 = inlined_call_operand.vmem [shape: f32[2,32,64], index: 10, kind: input, shape index: {}]   ;;  %s5927_s11 = inlined_call_operand.hbm [shape: f32[2,1,64], index: 11, kind: input, shape index: {}]   ;;  %s5928_s12 = inlined_call_operand.vmem [shape: f32[2,64,32], index: 12, kind: input, shape index: {}]   ;;  %s5929_s13 = inlined_call_operand.hbm [shape: f32[2,1,32], index: 13, kind: input, shape index: {}]   ;;  %s5930_s14 = inlined_call_operand.hbm [shape: f32[2,1,32], index: 14, kind: input, shape index: {}]   ;;  %s5931_s15 = inlined_call_operand.hbm [shape: f32[2,1,32], index: 15, kind: input, shape index: {}]   ;;  %s5932_s16 = inlined_call_operand.vmem [shape: f32[32,32], index: 16, kind: input, shape index: {}]   ;;  %s5933_s17 = inlined_call_operand.hbm [shape: f32[1,32], index: 17, kind: input, shape index: {}]   ;;  %s5934_s18 = inlined_call_operand.vmem [shape: f32[2,390], index: 18, kind: input, shape index: {}]   ;;  %s5935_s19 = inlined_call_operand.vmem [shape: f32[32,128], index: 19, kind: input, shape index: {}]   ;;  %s5936_s20 = inlined_call_operand.vmem [shape: f32[390,128], index: 20, kind: input, shape index: {}]   ;;  %s5937_s21 = inlined_call_operand.hbm [shape: f32[1,128], index: 21, kind: input, shape index: {}]   ;;  %s5938_s22 = inlined_call_operand.hbm [shape: f32[2,128], index: 22, kind: output, shape index: {}]  }
   0x1   :  { %5945 = sst [smem:[#allocation31_spill]] %s5916_s0 }
   0x2   :  { %5946 = sst [smem:[#allocation32_spill]] %s5917_s1 }
   0x3   :  { %5947 = sst [smem:[#allocation33_spill]] %s5918_s2 }
   0x4   :  { %5948 = sst [smem:[#allocation34_spill]] %s5919_s3 }
   0x5   :  { %5949 = sst [smem:[#allocation35_spill]] %s5920_s4 }
   0x6   :  { %5950 = sst [smem:[#allocation36_spill]] %s5921_s5 }
   0x7   :  { %5951 = sst [smem:[#allocation37_spill]] %s5922_s6 }
   0x8   :  { %27 = vsyncpa [#allocation3], 0 }
   0x9   :  { %28 = vsyncpa [#allocation6], 0 }
   0xa   :  { %29 = vsyncpa [#allocation9], 0 }
   0xb   :  { %30 = vsyncpa [#allocation12], 0 }
   0xc   :  { %31 = vsyncpa [#allocation15], 0 }
   0xd   :  { %32 = vsyncpa [#allocation18], 0 }
   0xe   :  { %33 = vsyncpa [#allocation21], 0 }
   0xf   :  { %34 = vsyncpa [#allocation4], 0  ;;  %s4883_s3 = smov [#allocation5]   ;;  %s5952_s4 = sld [smem:[#allocation34_spill]] }
  0x10   :  { %s55_s28 = sshll.u32 %s4883_s3, 4  ;;  %s56_s28 = int_to_ptr.vmem [resolvable:$true] %s55_s28 }
  0x15   :  { %s4581_s0 = scalar_lea.hbm %s5952_s4, 16 }
  0x16   :  { %p4582_p0 = scmp.ne.s32.totalorder %s5952_s4, %s4581_s0  ;;  %p4585_p1 = scmp.lt.u32.totalorder %s4581_s0, %s5952_s4 }
  0x18   :  { %p4587_p2 = pnand %p4585_p1, %p4582_p0 }
  0x1a   :  { %4590 = shalt.err (!%p4587_p2)
}
  0x1b   :  { %s4591_s6 = scalar_lea.vmem %s56_s28, 16  ;;  %s4595_s25 = scalar_lea.vmem %s56_s28, 32 }
  0x1c   :  { %p4592_p3 = scmp.ne.s32.totalorder %s56_s28, %s4591_s6  ;;  %p4596_p4 = scmp.lt.s32.totalorder %s56_s28, %s56_s28 }
  0x1d   :  { %p4597_p5 = scmp.lt.s32.totalorder %s4595_s25, %s4591_s6 }
  0x1f   :  { %p4598_p6 = por %p4597_p5, %p4596_p4 }
  0x21   :  { %p4599_p7 = pnand %p4598_p6, %p4592_p3 }
  0x23   :  { %4602 = shalt.err (!%p4599_p7)
}
  0x24   :  { %58 = dma.hbm_to_vmem [thread:$0]  %s5952_s4, 16, %s56_s28, [#allocation6]  }
  0x25   :  { %s4884_s27 = smov [#allocation8]   ;;  %s4885_s29 = smov [#allocation11]  }
  0x26   :  { %s80_s3 = sshll.u32 %s4884_s27, 4  ;;  %s104_s30 = sshll.u32 %s4885_s29, 4  ;;  %s81_s3 = int_to_ptr.vmem [resolvable:$true] %s80_s3  ;;  %s105_s30 = int_to_ptr.vmem [resolvable:$true] %s104_s30 }
  0x27   :  { %s4603_s1 = scalar_lea.hbm %s5923_s7, 32 }
  0x28   :  { %p4604_p8 = scmp.ne.s32.totalorder %s5923_s7, %s4603_s1  ;;  %p4607_p9 = scmp.lt.u32.totalorder %s4603_s1, %s5923_s7 }
  0x2a   :  { %p4609_p10 = pnand %p4607_p9, %p4604_p8 }
  0x2c   :  { %4612 = shalt.err (!%p4609_p10)
}
  0x2d   :  { %s4613_s28 = scalar_lea.vmem %s81_s3, 32  ;;  %p4618_p12 = scmp.lt.s32.totalorder %s81_s3, %s81_s3 }
  0x2e   :  { %p4614_p11 = scmp.ne.s32.totalorder %s81_s3, %s4613_s28  ;;  %p4619_p13 = scmp.lt.s32.totalorder %s4613_s28, %s4613_s28 }
  0x30   :  { %p4620_p0 = por %p4619_p13, %p4618_p12 }
  0x32   :  { %p4621_p1 = pnand %p4620_p0, %p4614_p11 }
  0x34   :  { %4624 = shalt.err (!%p4621_p1)
}
  0x35   :  { %s4886_s4 = smov 16   ;;  %s4887_s26 = smov 1  }
  0x36   :  { %86 = dma.hbm_to_vmem [thread:$0]  %s5923_s7, 32, %s81_s3, [#allocation9], %s4886_s4, %s4886_s4, %s4887_s26  }
  0x37   :  { %s4625_s23 = scalar_lea.hbm %s5925_s9, 32 }
  0x38   :  { %p4626_p2 = scmp.ne.s32.totalorder %s5925_s9, %s4625_s23  ;;  %p4629_p3 = scmp.lt.u32.totalorder %s4625_s23, %s5925_s9 }
  0x3a   :  { %p4631_p4 = pnand %p4629_p3, %p4626_p2 }
  0x3c   :  { %4634 = shalt.err (!%p4631_p4)
}
  0x3d   :  { %s4635_s25 = scalar_lea.vmem %s105_s30, 32  ;;  %p4640_p6 = scmp.lt.s32.totalorder %s105_s30, %s105_s30 }
  0x3e   :  { %p4636_p5 = scmp.ne.s32.totalorder %s105_s30, %s4635_s25  ;;  %p4641_p7 = scmp.lt.s32.totalorder %s4635_s25, %s4635_s25 }
  0x40   :  { %p4642_p8 = por %p4641_p7, %p4640_p6 }
  0x42   :  { %p4643_p9 = pnand %p4642_p8, %p4636_p5 }
  0x44   :  { %4646 = shalt.err (!%p4643_p9)
}
  0x45   :  { %110 = dma.hbm_to_vmem [thread:$0]  %s5925_s9, 32, %s105_s30, [#allocation12], %s4886_s4, %s4886_s4, %s4887_s26  }
  0x46   :  { %s4888_s28 = smov [#allocation14]   ;;  %s4889_s27 = smov [#allocation17]  }
  0x47   :  { %s132_s2 = sshll.u32 %s4888_s28, 4  ;;  %s156_s29 = sshll.u32 %s4889_s27, 4  ;;  %s133_s2 = int_to_ptr.vmem [resolvable:$true] %s132_s2  ;;  %s157_s29 = int_to_ptr.vmem [resolvable:$true] %s156_s29 }
  0x48   :  { %s4647_s1 = scalar_lea.hbm %s5929_s13, 32 }
  0x49   :  { %p4648_p10 = scmp.ne.s32.totalorder %s5929_s13, %s4647_s1  ;;  %p4651_p11 = scmp.lt.u32.totalorder %s4647_s1, %s5929_s13 }
  0x4b   :  { %p4653_p12 = pnand %p4651_p11, %p4648_p10 }
  0x4d   :  { %4656 = shalt.err (!%p4653_p12)
}
  0x4e   :  { %s4657_s9 = scalar_lea.vmem %s133_s2, 32  ;;  %p4662_p0 = scmp.lt.s32.totalorder %s133_s2, %s133_s2 }
  0x4f   :  { %p4658_p13 = scmp.ne.s32.totalorder %s133_s2, %s4657_s9  ;;  %p4663_p1 = scmp.lt.s32.totalorder %s4657_s9, %s4657_s9 }
  0x51   :  { %p4664_p2 = por %p4663_p1, %p4662_p0 }
  0x53   :  { %p4665_p3 = pnand %p4664_p2, %p4658_p13 }
  0x55   :  { %4668 = shalt.err (!%p4665_p3)
}
  0x56   :  { %138 = dma.hbm_to_vmem [thread:$0]  %s5929_s13, 32, %s133_s2, [#allocation15], %s4886_s4, %s4886_s4, %s4887_s26  }
  0x57   :  { %s4669_s27 = scalar_lea.hbm %s5931_s15, 32 }
  0x58   :  { %p4670_p4 = scmp.ne.s32.totalorder %s5931_s15, %s4669_s27  ;;  %p4673_p5 = scmp.lt.u32.totalorder %s4669_s27, %s5931_s15 }
  0x5a   :  { %p4675_p6 = pnand %p4673_p5, %p4670_p4 }
  0x5c   :  { %4678 = shalt.err (!%p4675_p6)
}
  0x5d   :  { %s4679_s24 = scalar_lea.vmem %s157_s29, 32  ;;  %p4684_p8 = scmp.lt.s32.totalorder %s157_s29, %s157_s29 }
  0x5e   :  { %p4680_p7 = scmp.ne.s32.totalorder %s157_s29, %s4679_s24  ;;  %p4685_p9 = scmp.lt.s32.totalorder %s4679_s24, %s4679_s24 }
  0x60   :  { %p4686_p10 = por %p4685_p9, %p4684_p8 }
  0x62   :  { %p4687_p11 = pnand %p4686_p10, %p4680_p7 }
  0x64   :  { %4690 = shalt.err (!%p4687_p11)
}
  0x65   :  { %162 = dma.hbm_to_vmem [thread:$0]  %s5931_s15, 32, %s157_s29, [#allocation18], %s4886_s4, %s4886_s4, %s4887_s26  }
  0x66   :  { %s4890_s6 = smov [#allocation2]   ;;  %s4891_s9 = smov [#allocation7]  }
  0x67   :  { %s45_s25 = sshll.u32 %s4890_s6, 4  ;;  %s66_s30 = sshll.u32 %s4891_s9, 4  ;;  %s46_s25 = int_to_ptr.vmem [resolvable:$true] %s45_s25  ;;  %s67_s30 = int_to_ptr.vmem [resolvable:$true] %s66_s30 }
  0x68   :  { %s5953_s28 = sld [smem:[#allocation33_spill]] }
  0x6e   :  { %s4691_s27 = scalar_lea.hbm %s5953_s28, 16 }
  0x6f   :  { %p4692_p12 = scmp.ne.s32.totalorder %s5953_s28, %s4691_s27  ;;  %p4695_p13 = scmp.lt.u32.totalorder %s4691_s27, %s5953_s28 }
  0x71   :  { %p4697_p0 = pnand %p4695_p13, %p4692_p12 }
  0x73   :  { %4700 = shalt.err (!%p4697_p0)
}
  0x74   :  { %s4701_s15 = scalar_lea.vmem %s46_s25, 16  ;;  %s4705_s29 = scalar_lea.vmem %s46_s25, 32 }
  0x75   :  { %p4702_p1 = scmp.ne.s32.totalorder %s46_s25, %s4701_s15  ;;  %p4706_p2 = scmp.lt.s32.totalorder %s46_s25, %s46_s25 }
  0x76   :  { %p4707_p3 = scmp.lt.s32.totalorder %s4705_s29, %s4701_s15 }
  0x78   :  { %p4708_p4 = por %p4707_p3, %p4706_p2 }
  0x7a   :  { %p4709_p5 = pnand %p4708_p4, %p4702_p1 }
  0x7c   :  { %4712 = shalt.err (!%p4709_p5)
}
  0x7d   :  { %48 = dma.hbm_to_vmem [thread:$0]  %s5953_s28, 16, %s46_s25, [#allocation3]  }
  0x7e   :  { %s5954_s9 = sld [smem:[#allocation36_spill]] }
  0x84   :  { %s4713_s7 = scalar_lea.hbm %s5954_s9, 32 }
  0x85   :  { %p4714_p6 = scmp.ne.s32.totalorder %s5954_s9, %s4713_s7  ;;  %p4717_p7 = scmp.lt.u32.totalorder %s4713_s7, %s5954_s9 }
  0x87   :  { %p4719_p8 = pnand %p4717_p7, %p4714_p6 }
  0x89   :  { %4722 = shalt.err (!%p4719_p8)
}
  0x8a   :  { %s4723_s1 = scalar_lea.vmem %s67_s30, 32  ;;  %p4728_p10 = scmp.lt.s32.totalorder %s67_s30, %s67_s30 }
  0x8b   :  { %p4724_p9 = scmp.ne.s32.totalorder %s67_s30, %s4723_s1  ;;  %p4729_p11 = scmp.lt.s32.totalorder %s4723_s1, %s4723_s1 }
  0x8d   :  { %p4730_p12 = por %p4729_p11, %p4728_p10 }
  0x8f   :  { %p4731_p13 = pnand %p4730_p12, %p4724_p9 }
  0x91   :  { %4734 = shalt.err (!%p4731_p13)
}
  0x92   :  { %72 = dma.hbm_to_vmem [thread:$0]  %s5954_s9, 32, %s67_s30, [#allocation6], %s4886_s4, %s4886_s4, %s4887_s26  }
  0x93   :  { %s4892_s5 = smov [#allocation10]   ;;  %s4893_s29 = smov [#allocation13]  }
  0x94   :  { %s92_s15 = sshll.u32 %s4892_s5, 4  ;;  %s118_s24 = sshll.u32 %s4893_s29, 4  ;;  %s93_s15 = int_to_ptr.vmem [resolvable:$true] %s92_s15  ;;  %s119_s24 = int_to_ptr.vmem [resolvable:$true] %s118_s24 }
  0x95   :  { %s4735_s6 = scalar_lea.hbm %s5924_s8, 32 }
  0x96   :  { %p4736_p0 = scmp.ne.s32.totalorder %s5924_s8, %s4735_s6  ;;  %p4739_p1 = scmp.lt.u32.totalorder %s4735_s6, %s5924_s8 }
  0x98   :  { %p4741_p2 = pnand %p4739_p1, %p4736_p0 }
  0x9a   :  { %4744 = shalt.err (!%p4741_p2)
}
  0x9b   :  { %s4745_s30 = scalar_lea.vmem %s93_s15, 32  ;;  %p4750_p4 = scmp.lt.s32.totalorder %s93_s15, %s93_s15 }
  0x9c   :  { %p4746_p3 = scmp.ne.s32.totalorder %s93_s15, %s4745_s30  ;;  %p4751_p5 = scmp.lt.s32.totalorder %s4745_s30, %s4745_s30 }
  0x9e   :  { %p4752_p6 = por %p4751_p5, %p4750_p4 }
  0xa0   :  { %p4753_p7 = pnand %p4752_p6, %p4746_p3 }
  0xa2   :  { %4756 = shalt.err (!%p4753_p7)
}
  0xa3   :  { %98 = dma.hbm_to_vmem [thread:$0]  %s5924_s8, 32, %s93_s15, [#allocation9], %s4886_s4, %s4886_s4, %s4887_s26  }
  0xa4   :  { %s4757_s28 = scalar_lea.hbm %s5927_s11, 32 }
  0xa5   :  { %p4758_p8 = scmp.ne.s32.totalorder %s5927_s11, %s4757_s28  ;;  %p4761_p9 = scmp.lt.u32.totalorder %s4757_s28, %s5927_s11 }
  0xa7   :  { %p4763_p10 = pnand %p4761_p9, %p4758_p8 }
  0xa9   :  { %4766 = shalt.err (!%p4763_p10)
}
  0xaa   :  { %s4767_s6 = scalar_lea.vmem %s119_s24, 32  ;;  %p4772_p12 = scmp.lt.s32.totalorder %s119_s24, %s119_s24 }
  0xab   :  { %p4768_p11 = scmp.ne.s32.totalorder %s119_s24, %s4767_s6  ;;  %p4773_p13 = scmp.lt.s32.totalorder %s4767_s6, %s4767_s6 }
  0xad   :  { %p4774_p0 = por %p4773_p13, %p4772_p12 }
  0xaf   :  { %p4775_p1 = pnand %p4774_p0, %p4768_p11 }
  0xb1   :  { %4778 = shalt.err (!%p4775_p1)
}
  0xb2   :  { %124 = dma.hbm_to_vmem [thread:$0]  %s5927_s11, 32, %s119_s24, [#allocation12], %s4886_s4, %s4886_s4, %s4887_s26  }
  0xb3   :  { %s4894_s7 = smov [#allocation16]   ;;  %s4895_s27 = smov [#allocation19]  }
  0xb4   :  { %s144_s3 = sshll.u32 %s4894_s7, 4  ;;  %s171_s0 = sshll.u32 %s4895_s27, 4  ;;  %s145_s3 = int_to_ptr.vmem [resolvable:$true] %s144_s3  ;;  %s172_s0 = int_to_ptr.vmem [resolvable:$true] %s171_s0 }
  0xb5   :  { %s4779_s23 = scalar_lea.hbm %s5930_s14, 32 }
  0xb6   :  { %p4780_p2 = scmp.ne.s32.totalorder %s5930_s14, %s4779_s23  ;;  %p4783_p3 = scmp.lt.u32.totalorder %s4779_s23, %s5930_s14 }
  0xb8   :  { %p4785_p4 = pnand %p4783_p3, %p4780_p2 }
  0xba   :  { %4788 = shalt.err (!%p4785_p4)
}
  0xbb   :  { %s4789_s11 = scalar_lea.vmem %s145_s3, 32  ;;  %p4794_p6 = scmp.lt.s32.totalorder %s145_s3, %s145_s3 }
  0xbc   :  { %p4790_p5 = scmp.ne.s32.totalorder %s145_s3, %s4789_s11  ;;  %p4795_p7 = scmp.lt.s32.totalorder %s4789_s11, %s4789_s11 }
  0xbe   :  { %p4796_p8 = por %p4795_p7, %p4794_p6 }
  0xc0   :  { %p4797_p9 = pnand %p4796_p8, %p4790_p5 }
  0xc2   :  { %4800 = shalt.err (!%p4797_p9)
}
  0xc3   :  { %150 = dma.hbm_to_vmem [thread:$0]  %s5930_s14, 32, %s145_s3, [#allocation15], %s4886_s4, %s4886_s4, %s4887_s26  }
  0xc4   :  { %s4801_s6 = scalar_lea.hbm %s5933_s17, 16 }
  0xc5   :  { %p4802_p10 = scmp.ne.s32.totalorder %s5933_s17, %s4801_s6  ;;  %p4805_p11 = scmp.lt.u32.totalorder %s4801_s6, %s5933_s17 }
  0xc7   :  { %p4807_p12 = pnand %p4805_p11, %p4802_p10 }
  0xc9   :  { %4810 = shalt.err (!%p4807_p12)
}
  0xca   :  { %s4811_s30 = scalar_lea.vmem %s172_s0, 16  ;;  %s4815_s9 = scalar_lea.vmem %s172_s0, 32 }
  0xcb   :  { %p4812_p13 = scmp.ne.s32.totalorder %s172_s0, %s4811_s30  ;;  %p4816_p0 = scmp.lt.s32.totalorder %s172_s0, %s172_s0 }
  0xcc   :  { %p4817_p1 = scmp.lt.s32.totalorder %s4815_s9, %s4811_s30 }
  0xce   :  { %p4818_p2 = por %p4817_p1, %p4816_p0 }
  0xd0   :  { %p4819_p3 = pnand %p4818_p2, %p4812_p13 }
  0xd2   :  { %4822 = shalt.err (!%p4819_p3)
}
  0xd3   :  { %174 = dma.hbm_to_vmem [thread:$0]  %s5933_s17, 16, %s172_s0, [#allocation18]  }
  0xd4   :  { %s4896_s26 = smov [#allocation20]   ;;  %s4823_s25 = scalar_lea.hbm %s5937_s21, 16 }
  0xd5   :  { %s187_s3 = sshll.u32 %s4896_s26, 4  ;;  %p4824_p4 = scmp.ne.s32.totalorder %s5937_s21, %s4823_s25  ;;  %s188_s3 = int_to_ptr.vmem [resolvable:$true] %s187_s3 }
  0xd6   :  { %p4827_p5 = scmp.lt.u32.totalorder %s4823_s25, %s5937_s21 }
  0xd8   :  { %p4829_p6 = pnand %p4827_p5, %p4824_p4 }
  0xda   :  { %4832 = shalt.err (!%p4829_p6)
}
  0xdb   :  { %s4833_s29 = scalar_lea.vmem %s188_s3, 16  ;;  %s4837_s17 = scalar_lea.vmem %s188_s3, 32 }
  0xdc   :  { %p4834_p7 = scmp.ne.s32.totalorder %s188_s3, %s4833_s29  ;;  %p4838_p8 = scmp.lt.s32.totalorder %s188_s3, %s188_s3 }
  0xdd   :  { %p4839_p9 = scmp.lt.s32.totalorder %s4837_s17, %s4833_s29 }
  0xdf   :  { %p4840_p10 = por %p4839_p9, %p4838_p8 }
  0xe1   :  { %p4841_p11 = pnand %p4840_p10, %p4834_p7 }
  0xe3   :  { %4844 = shalt.err (!%p4841_p11)
}
  0xe4   :  { %190 = dma.hbm_to_vmem [thread:$0]  %s5937_s21, 16, %s188_s3, [#allocation21]  }
  0xe5   :  { %4867 = dma.done.wait [#allocation3], 16  }
  0xe6   :  { %4868 = vsyncadd [#allocation3], 4294967280 }
  0xe7   :  { %4869 = dma.done.wait [#allocation6], 48  }
  0xe8   :  { %4870 = vsyncadd [#allocation6], 4294967248 }
  0xe9   :  { %4871 = dma.done.wait [#allocation9], 64  }
  0xea   :  { %4872 = vsyncadd [#allocation9], 4294967232 }
  0xeb   :  { %4873 = dma.done.wait [#allocation12], 64  }
  0xec   :  { %4874 = vsyncadd [#allocation12], 4294967232 }
  0xed   :  { %4875 = dma.done.wait [#allocation15], 64  }
  0xee   :  { %4876 = vsyncadd [#allocation15], 4294967232 }
  0xef   :  { %4877 = dma.done.wait [#allocation18], 48  }
  0xf0   :  { %4878 = vsyncadd [#allocation18], 4294967248 }
  0xf1   :  { %4879 = dma.done.wait [#allocation21], 16  }
  0xf2   :  { %4880 = vsyncadd [#allocation21], 4294967280  ;;  %vm231_vm0 = vcmask 261120   ;;  %s5955_s8 = sld [smem:[#allocation31_spill]]  ;;  %s5956_s30 = sld [smem:[#allocation35_spill]]  ;;  %v4897_v36 = vmov 0.0   ;;  %v451_v45 = vlaneseq }
  0xf3   :  { %v3728_v27 = vld [vmem:[#allocation2] ss:$0 sm:$0xff]  ;;  %v3729_v29 = vld [vmem:[#allocation5] ss:$0 sm:$0xff]  ;;  %4019 = vmatprep.subr.mxu1 %v4897_v36  ;;  %vm4898_vm1 = vmmov 0   ;;  %s4899_s1 = smov 80  }
  0xf4   :  { %4021 = vmatprep.mubr.msk.f32.mxu1 %vm4898_vm1, %v4897_v36  ;;  %v3730_v37 = vld [vmem:[#allocation7] ss:$0 sm:$0xff]  ;;  %s4900_s25 = smov 96   ;;  %s4901_s28 = smov 112   ;;  %vm375_vm2 = vcmask 130048   ;;  %v5239_v46 = vshrl.u32 %v451_v45, 7 }
  0xf5   :  { %s5957_s24 = sld [smem:[#allocation32_spill]]  ;;  %vm456_vm3 = vcmask 64512   ;;  %s4902_s29 = smov 64   ;;  %vm1520_vm4 = vcmask 523264   ;;  %vm3178_vm5 = vcmask 1045504   ;;  %vm3175_vm6 = vcmask 48128  }
  0xf6   :  { %v453_v47 = vsub.s32 0, %v5239_v46  ;;  %s4903_s17 = smov 48   ;;  %s5958_s2 = sld [smem:[#allocation37_spill]] }
  0xf8   :  { %v227_v0 = vld [vmem:[%s5955_s8] sm:$0xff]  ;;  %v228_v1 = vld [vmem:[%s5955_s8 + $0x8] sm:$0xff]  ;;  %v278_v16 = vld [vmem:[%s5956_s30 + $0x10] sm:$0xff] }
  0xf9   :  { %v232_v2 = vsel %vm231_vm0, %v227_v0, 0.0  ;;  %v235_v3 = vsel %vm231_vm0, %v228_v1, 0.0  ;;  %v276_v14 = vld [vmem:[%s5956_s30] sm:$0xff]  ;;  %v277_v15 = vld [vmem:[%s5956_s30 + $0x8] sm:$0xff]  ;;  %v279_v18 = vld [vmem:[%s5956_s30 + $0x18] sm:$0xff] }
  0xfa   :  { %233 = vadd.xlane.f32.xlu0 %v232_v2  ;;  %v4270_v17 = vpack.c.bf16 %v277_v15, %v276_v14  ;;  %v4274_v19 = vpack.c.bf16 %v279_v18, %v278_v16 }
  0xfb   :  { %v5245_v48 = vld [vmem:[%s5957_s24] sm:$0x3] }
  0xfc   :  { %4271 = vmatprep.subr.bf16.mxu0 %v4270_v17  ;;  %v5250_v49 = vrot.slane %v5245_v48, %v453_v47  ;;  %v368_v15 = vld [vmem:[%s5958_s2] sm:$0xff]  ;;  %v369_v16 = vld [vmem:[%s5958_s2 + $0x8] sm:$0xff] }
  0xfd   :  { %4273 = vmatpush3.bf16.msra.mxu0 %v4270_v17 }
  0xfe   :  { %236 = vadd.xlane.f32.xlu0 %v235_v3  ;;  %4275 = vmatprep.subr.bf16.mxu0 %v4274_v19 }
 0x101   :  { %4277 = vmatpush3.bf16.msra.mxu0 %v4274_v19  ;;  %v5284_v19 = vpack.c.bf16 %v369_v16, %v368_v15 }
 0x102   :  { %4029 = vmatprep.subr.mxu0 %v4897_v36 }
 0x187   :  { %v234_v4 = vpop.xlane.xlu0 %233 }
 0x188   :  { %v239_v5 = vmul.f32 0.03125, %v234_v4 }
 0x18a   :  { %v241_v6 = vsub.f32 %v227_v0, %v239_v5 }
 0x18b   :  { %v237_v7 = vpop.xlane.xlu0 %236 }
 0x18c   :  { %v240_v8 = vmul.f32 0.03125, %v237_v7  ;;  %v243_v9 = vmul.f32 %v241_v6, %v241_v6  ;;  %v370_v7 = vld [vmem:[%s5958_s2 + $0x10] sm:$0xff] }
 0x18e   :  { %v242_v10 = vsub.f32 %v228_v1, %v240_v8  ;;  %v245_v11 = vsel %vm231_vm0, %v243_v9, 0.0  ;;  %v371_v8 = vld [vmem:[%s5958_s2 + $0x18] sm:$0xff]  ;;  %v4904_v9 = vmov 0.0|0.0  }
 0x18f   :  { %246 = vadd.xlane.f32.xlu1 %v245_v11 }
 0x190   :  { %v244_v12 = vmul.f32 %v242_v10, %v242_v10 }
 0x192   :  { %v248_v13 = vsel %vm231_vm0, %v244_v12, 0.0 }
 0x193   :  { %249 = vadd.xlane.f32.xlu1 %v248_v13 }
 0x21c   :  { %v247_v20 = vpop.xlane.xlu1 %246 }
 0x21d   :  { %v251_v21 = vmul.f32 0.03125, %v247_v20 }
 0x21f   :  { %v253_v22 = vadd.f32 1e-12, %v251_v21 }
 0x220   :  { %v250_v23 = vpop.xlane.xlu1 %249 }
 0x221   :  { %4517 = vrsqrt.f32 %v253_v22  ;;  %v252_v24 = vmul.f32 0.03125, %v250_v23 }
 0x223   :  { %v254_v25 = vadd.f32 1e-12, %v252_v24 }
 0x225   :  { %4519 = vrsqrt.f32 %v254_v25 }
 0x22b   :  { %v4518_v26 = vpop.eup %4517 }
 0x22c   :  { %v257_v28 = vmul.f32 %v4518_v26, %v241_v6 }
 0x22e   :  { %v265_v30 = vmul.f32 %v3728_v27, %v257_v28 }
 0x22f   :  { %v4520_v31 = vpop.eup %4519 }
 0x230   :  { %v258_v32 = vmul.f32 %v4520_v31, %v242_v10  ;;  %v5211_v33 = vadd.f32 %v3729_v29, %v265_v30  ;;  %v4279_v10 = vpack.c.bf16 %v371_v8, %v370_v7  ;;  %v937_v30 = vsub.s32 1, %v5239_v46 }
 0x232   :  { %v266_v34 = vmul.f32 %v3728_v27, %v258_v32  ;;  %4016 = vmatprep.mubr.msk.f32.mxu0 %vm231_vm0, %v5211_v33 }
 0x234   :  { %v5215_v35 = vadd.f32 %v3729_v29, %v266_v34 }
 0x236   :  { %4017 = vmatmul.mubr.msk.f32.vlgmr.msra.gmra.mrb[0].mxu0 %vm231_vm0, %v5215_v35 }
 0x237   :  { %4031 = vmatprep.mubr.msk.f32.mxu0 %vm4898_vm1, %v4897_v36 }
 0x309   :  { %v4018_v38 = vpop.f32.mrb[0].mxu0 }
 0x30a   :  { %v5225_v39 = vadd.f32 %v4018_v38, %v3730_v37  ;;  %v359_v40 = vpop.f32.mrb[1].mxu0 }
 0x30b   :  { %v360_v41 = vadd.f32 %v3730_v37, %v359_v40  ;;  %v5313_v37 = vrot.slane %v5245_v48, %v937_v30  ;;  %v3749_v48 = vld [vmem:[#allocation8] ss:$0 sm:$0xff] }
 0x30d   :  { %546 = vrot.lane.b32.xlu1 %v360_v41, %s4899_s1  ;;  %373 = vrot.lane.b32.xlu0 %v360_v41, %s4900_s25 }
 0x311   :  { %544 = vrot.lane.b32.xlu1 %v360_v41, %s4901_s28 }
 0x37f   :  { %v547_v42 = vpop.permute.xlu1 %546  ;;  %v374_v43 = vpop.permute.xlu0 %373 }
 0x380   :  { %4020 = vmatpush3.xpose.msk.msra.mxu1 %vm375_vm2, %v374_v43  ;;  %4030 = vmatpush3.xpose.msk.msra.mxu0 %vm375_vm2, %v547_v42 }
 0x381   :  { %4024 = vmatprep.subr.mxu1 %v4897_v36  ;;  %4278 = vmatprep.subr.bf16.mxu0 %v4904_v9 }
 0x383   :  { %v545_v44 = vpop.permute.xlu1 %544  ;;  %4022 = vmatmul.mubr.msk.f32.vlgmr.msra.gmra.mrb[0].mxu1 %vm375_vm2, %v360_v41 }
 0x384   :  { %4032 = vmatmul.mubr.msk.f32.vlgmr.msra.gmra.mrb[2].mxu0 %vm375_vm2, %v545_v44  ;;  %4026 = vmatprep.mubr.msk.f32.mxu1 %vm4898_vm1, %v4897_v36 }
 0x385   :  { %4043 = vmatprep.mubr.msk.f32.mxu0 %vm4898_vm1, %v4897_v36  ;;  %4280 = vmatpush3.bf16.msra.mxu0 %v4279_v10 }
 0x386   :  { %4053 = vmatprep.subr.mxu0 %v4897_v36 }
 0x456   :  { %v446_v50 = vpop.f32.mrb[0].mxu1 }
 0x457   :  { %v450_v51 = vmul.f32 0.25, %v446_v50  ;;  %v4023_v52 = vpop.f32.mrb[1].mxu1  ;;  %v618_v53 = vpop.f32.mrb[2].mxu0 }
 0x458   :  { %v622_v54 = vmul.f32 0.25, %v618_v53  ;;  %v4033_v55 = vpop.f32.mrb[3].mxu0 }
 0x459   :  { %v455_v56 = vadd.f32 %v5250_v49, %v450_v51 }
 0x45a   :  { %v623_v57 = vadd.f32 %v622_v54, %v5250_v49 }
 0x45b   :  { %v457_v58 = vsel %vm456_vm3, %v455_v56, -inf }
 0x45c   :  { %458 = vmax.xlane.f32.xlu1 %v457_v58  ;;  %v624_v59 = vsel %vm456_vm3, %v623_v57, -inf }
 0x45d   :  { %625 = vmax.xlane.f32.xlu0 %v624_v59 }
 0x46d   :  { %468 = vrot.lane.b32.xlu1 %v360_v41, %s4902_s29 }
 0x471   :  { %858 = vrot.lane.b32.xlu1 %v5225_v39, %s4900_s25 }
 0x475   :  { %1029 = vrot.lane.b32.xlu1 %v5225_v39, %s4899_s1 }
 0x479   :  { %1027 = vrot.lane.b32.xlu1 %v5225_v39, %s4901_s28 }
 0x4e9   :  { %v459_v60 = vpop.xlane.xlu1 %458 }
 0x4ea   :  { %v460_v61 = vsub.f32 %v455_v56, %v459_v60  ;;  %v626_v62 = vpop.xlane.xlu0 %625 }
 0x4eb   :  { %v627_v63 = vsub.f32 %v623_v57, %v626_v62 }
 0x4ec   :  { %v461_v0 = vmul.f32 1.442695, %v460_v61 }
 0x4ed   :  { %v628_v1 = vmul.f32 1.442695, %v627_v63  ;;  %v469_v2 = vpop.permute.xlu1 %468 }
 0x4ee   :  { %4521 = vpow2.f32 %v461_v0  ;;  %4025 = vmatpush3.msra.mxu1 %v469_v2 }
 0x4ef   :  { %4034 = vmatprep.subr.mxu1 %v4897_v36  ;;  %4523 = vpow2.f32 %v628_v1 }
 0x4f1   :  { %v859_v21 = vpop.permute.xlu1 %858 }
 0x4f5   :  { %v1030_v26 = vpop.permute.xlu1 %1029 }
 0x4f8   :  { %v4522_v3 = vpop.eup %4521 }
 0x4f9   :  { %v463_v4 = vsel %vm456_vm3, %v4522_v3, 0.0  ;;  %v4524_v5 = vpop.eup %4523  ;;  %v1028_v27 = vpop.permute.xlu1 %1027 }
 0x4fa   :  { %464 = vadd.xlane.f32.xlu0 %v463_v4  ;;  %v630_v6 = vsel %vm456_vm3, %v4524_v5, 0.0 }
 0x4fe   :  { %631 = vadd.xlane.f32.xlu0 %v630_v6 }
 0x514   :  { %635 = vrot.lane.b32.xlu0 %v360_v41, %s4903_s17 }
 0x587   :  { %v465_v11 = vpop.xlane.xlu0 %464 }
 0x588   :  { %4525 = vrcp.f32 %v465_v11 }
 0x58b   :  { %v632_v12 = vpop.xlane.xlu0 %631 }
 0x58c   :  { %4527 = vrcp.f32 %v632_v12 }
 0x58f   :  { %v636_v17 = vpop.permute.xlu0 %635 }
 0x592   :  { %v4526_v13 = vpop.eup %4525 }
 0x593   :  { %v467_v14 = vmul.f32 %v4526_v13, %v4522_v3 }
 0x595   :  { %4027 = vmatmul.mubr.msk.f32.vlgmr.msra.gmra.mrb[2].mxu1 %vm456_vm3, %v467_v14 }
 0x596   :  { %v4528_v18 = vpop.eup %4527  ;;  %4035 = vmatpush3.msra.mxu1 %v636_v17  ;;  %4036 = vmatprep.mubr.msk.f32.mxu1 %vm4898_vm1, %v4897_v36 }
 0x597   :  { %v634_v20 = vmul.f32 %v4528_v18, %v4524_v5  ;;  %4281 = vmatprep.subr.bf16.mxu1 %v4904_v9 }
 0x599   :  { %4037 = vmatmul.mubr.msk.f32.vlgmr.msra.gmra.mrb[4].mxu1 %vm456_vm3, %v634_v20 }
 0x59a   :  { %4283 = vmatpush3.bf16.msra.mxu1 %v5284_v19  ;;  %4050 = vmatprep.mubr.msk.f32.mxu1 %vm4898_vm1, %v4897_v36 }
 0x59b   :  { %4058 = vmatprep.subr.mxu1 %v4897_v36 }
 0x668   :  { %v540_v22 = vpop.f32.mrb[2].mxu1 }
 0x669   :  { %v4028_v23 = vpop.f32.mrb[3].mxu1  ;;  %4051 = vmatmul.mubr.msk.f32.vlgmr.msra.gmra.mrb[6].mxu1 %vm375_vm2, %v540_v22 }
 0x66a   :  { %4060 = vmatprep.mubr.msk.f32.mxu1 %vm4898_vm1, %v4897_v36 }
 0x66c   :  { %v707_v24 = vpop.f32.mrb[4].mxu1 }
 0x66d   :  { %v4038_v25 = vpop.f32.mrb[5].mxu1  ;;  %4044 = vmatmul.mubr.msk.f32.vlgmr.msra.gmra.mrb[4].mxu0 %vm375_vm2, %v707_v24 }
 0x66e   :  { %4054 = vmatpush3.xpose.msk.msra.mxu0 %vm375_vm2, %v859_v21  ;;  %4055 = vmatprep.mubr.msk.f32.mxu0 %vm4898_vm1, %v4897_v36 }
 0x66f   :  { %4063 = vmatprep.subr.mxu0 %v4897_v36 }
 0x671   :  { %4056 = vmatmul.mubr.msk.f32.vlgmr.msra.gmra.mrb[6].mxu0 %vm375_vm2, %v5225_v39 }
 0x672   :  { %4064 = vmatpush3.xpose.msk.msra.mxu0 %vm375_vm2, %v1030_v26  ;;  %4065 = vmatprep.mubr.msk.f32.mxu0 %vm4898_vm1, %v4897_v36 }
 0x673   :  { %4284 = vmatprep.subr.bf16.mxu0 %v4904_v9 }
 0x675   :  { %4066 = vmatmul.mubr.msk.f32.vlgmr.msra.gmra.mrb[8].mxu0 %vm375_vm2, %v1028_v27 }
 0x676   :  { %4286 = vmatpush3.bf16.msra.mxu0 %v4279_v10  ;;  %4077 = vmatprep.mubr.msk.f32.mxu0 %vm4898_vm1, %v4897_v36 }
 0x73c   :  { %v853_v28 = vpop.f32.mrb[6].mxu1 }
 0x73d   :  { %v4052_v29 = vpop.f32.mrb[7].mxu1 }
 0x740   :  { %v780_v31 = vpop.f32.mrb[4].mxu0 }
 0x741   :  { %v854_v32 = vadd.f32 %v853_v28, %v780_v31  ;;  %v4045_v34 = vpop.f32.mrb[5].mxu0 }
 0x743   :  { %v1347_v53 = vadd.f32 %v3749_v48, %v854_v32 }
 0x744   :  { %v930_v38 = vpop.f32.mrb[6].mxu0 }
 0x745   :  { %v934_v40 = vmul.f32 0.25, %v930_v38  ;;  %v4057_v41 = vpop.f32.mrb[7].mxu0  ;;  %v1349_v54 = vadd.f32 %v1347_v53, %v5211_v33 }
 0x747   :  { %v939_v42 = vadd.f32 %v5313_v37, %v934_v40  ;;  %v1353_v55 = vsel %vm231_vm0, %v1349_v54, 0.0 }
 0x748   :  { %v1101_v43 = vpop.f32.mrb[8].mxu0 }
 0x749   :  { %v1105_v44 = vmul.f32 0.25, %v1101_v43  ;;  %v4067_v45 = vpop.f32.mrb[9].mxu0  ;;  %v940_v50 = vsel %vm456_vm3, %v939_v42, -inf }
 0x74a   :  { %941 = vmax.xlane.f32.xlu0 %v940_v50  ;;  %v1395_v45 = vld [vmem:[%s5926_s10] sm:$0xff]  ;;  %v1396_v50 = vld [vmem:[%s5926_s10 + $0x8] sm:$0xff] }
 0x74b   :  { %v1106_v51 = vadd.f32 %v1105_v44, %v5313_v37 }
 0x74d   :  { %v1107_v52 = vsel %vm456_vm3, %v1106_v51, -inf }
 0x74e   :  { %1108 = vmax.xlane.f32.xlu1 %v1107_v52  ;;  %v1397_v52 = vld [vmem:[%s5926_s10 + $0x10] sm:$0xff] }
 0x75f   :  { %1118 = vrot.lane.b32.xlu1 %v5225_v39, %s4903_s17 }
 0x783   :  { %1354 = vadd.xlane.f32.xlu1 %v1353_v55 }
 0x7d7   :  { %v942_v56 = vpop.xlane.xlu0 %941 }
 0x7d8   :  { %v943_v57 = vsub.f32 %v939_v42, %v942_v56  ;;  %v3751_v42 = vld [vmem:[#allocation11] ss:$0 sm:$0xff] }
 0x7da   :  { %v944_v58 = vmul.f32 1.442695, %v943_v57 }
 0x7db   :  { %v1109_v59 = vpop.xlane.xlu1 %1108 }
 0x7dc   :  { %4529 = vpow2.f32 %v944_v58  ;;  %v1110_v60 = vsub.f32 %v1106_v51, %v1109_v59  ;;  %v4290_v51 = vpack.c.bf16 %v1396_v50, %v1395_v45 }
 0x7de   :  { %v1111_v61 = vmul.f32 1.442695, %v1110_v60  ;;  %4291 = vmatprep.subr.bf16.mxu0 %v4290_v51 }
 0x7df   :  { %v1119_v6 = vpop.permute.xlu1 %1118 }
 0x7e0   :  { %4531 = vpow2.f32 %v1111_v61  ;;  %v1505_v61 = vld [vmem:[%s5928_s12] sm:$0xff] }
 0x7e6   :  { %v4530_v62 = vpop.eup %4529 }
 0x7e7   :  { %v946_v63 = vsel %vm456_vm3, %v4530_v62, 0.0 }
 0x7e8   :  { %947 = vadd.xlane.f32.xlu0 %v946_v63 }
 0x7ea   :  { %v4532_v0 = vpop.eup %4531 }
 0x7eb   :  { %v1113_v1 = vsel %vm456_vm3, %v4532_v0, 0.0 }
 0x7ec   :  { %1114 = vadd.xlane.f32.xlu0 %v1113_v1  ;;  %v1508_v1 = vld [vmem:[%s5928_s12 + $0x18] sm:$0xff] }
 0x802   :  { %951 = vrot.lane.b32.xlu0 %v5225_v39, %s4902_s29 }
 0x810   :  { %v1355_v13 = vpop.xlane.xlu1 %1354 }
 0x811   :  { %v1359_v16 = vmul.f32 0.03125, %v1355_v13 }
 0x813   :  { %v1361_v21 = vsub.f32 %v1349_v54, %v1359_v16 }
 0x815   :  { %v1363_v24 = vmul.f32 %v1361_v21, %v1361_v21 }
 0x817   :  { %v1365_v25 = vsel %vm231_vm0, %v1363_v24, 0.0 }
 0x875   :  { %v948_v33 = vpop.xlane.xlu0 %947 }
 0x876   :  { %4533 = vrcp.f32 %v948_v33 }
 0x879   :  { %v1115_v2 = vpop.xlane.xlu0 %1114 }
 0x87a   :  { %4535 = vrcp.f32 %v1115_v2  ;;  %v1509_v2 = vld [vmem:[%s5928_s12 + $0x20] sm:$0xff] }
 0x87d   :  { %v952_v3 = vpop.permute.xlu0 %951 }
 0x87e   :  { %4059 = vmatpush3.msra.mxu1 %v952_v3  ;;  %v1510_v3 = vld [vmem:[%s5928_s12 + $0x28] sm:$0xff] }
 0x87f   :  { %4068 = vmatprep.subr.mxu1 %v4897_v36 }
 0x880   :  { %v4534_v4 = vpop.eup %4533 }
 0x881   :  { %v950_v5 = vmul.f32 %v4534_v4, %v4530_v62  ;;  %v1506_v62 = vld [vmem:[%s5928_s12 + $0x8] sm:$0xff]  ;;  %v4306_v4 = vpack.c.bf16 %v1510_v3, %v1509_v2 }
 0x882   :  { %v4298_v63 = vpack.c.bf16 %v1506_v62, %v1505_v61  ;;  %v3762_v61 = vld [vmem:[%s5956_s30 + $0x30] sm:$0xff]  ;;  %v3763_v62 = vld [vmem:[%s5956_s30 + $0x38] sm:$0xff] }
 0x883   :  { %4061 = vmatmul.mubr.msk.f32.vlgmr.msra.gmra.mrb[8].mxu1 %vm456_vm3, %v950_v5  ;;  %v1511_v5 = vld [vmem:[%s5928_s12 + $0x30] sm:$0xff] }
 0x884   :  { %v4536_v7 = vpop.eup %4535  ;;  %4069 = vmatpush3.msra.mxu1 %v1119_v6  ;;  %4070 = vmatprep.mubr.msk.f32.mxu1 %vm4898_vm1, %v4897_v36  ;;  %v1512_v6 = vld [vmem:[%s5928_s12 + $0x38] sm:$0xff] }
 0x885   :  { %v1117_v8 = vmul.f32 %v4536_v7, %v4532_v0  ;;  %4287 = vmatprep.subr.bf16.mxu1 %v4904_v9  ;;  %v1507_v0 = vld [vmem:[%s5928_s12 + $0x10] sm:$0xff]  ;;  %v4310_v7 = vpack.c.bf16 %v1512_v6, %v1511_v5 }
 0x886   :  { %v4302_v33 = vpack.c.bf16 %v1508_v1, %v1507_v0  ;;  %v3758_v6 = vld [vmem:[#allocation16] ss:$0 sm:$0xff] }
 0x887   :  { %4071 = vmatmul.mubr.msk.f32.vlgmr.msra.gmra.mrb[10].mxu1 %vm456_vm3, %v1117_v8  ;;  %v3752_v8 = vld [vmem:[#allocation13] ss:$0 sm:$0xff] }
 0x888   :  { %4289 = vmatpush3.bf16.msra.mxu1 %v5284_v19  ;;  %4084 = vmatprep.mubr.msk.f32.mxu1 %vm4898_vm1, %v4897_v36 }
 0x889   :  { %4299 = vmatprep.subr.bf16.mxu1 %v4298_v63 }
 0x956   :  { %v1023_v39 = vpop.f32.mrb[8].mxu1 }
 0x957   :  { %v4062_v10 = vpop.f32.mrb[9].mxu1  ;;  %4085 = vmatmul.mubr.msk.f32.vlgmr.msra.gmra.mrb[12].mxu1 %vm375_vm2, %v1023_v39 }
 0x958   :  { %4301 = vmatpush3.bf16.msra.mxu1 %v4298_v63  ;;  %v4318_v63 = vpack.c.bf16 %v3763_v62, %v3762_v61 }
 0x959   :  { %4303 = vmatprep.subr.bf16.mxu1 %v4302_v33 }
 0x95a   :  { %v1190_v11 = vpop.f32.mrb[10].mxu1 }
 0x95b   :  { %v4072_v12 = vpop.f32.mrb[11].mxu1  ;;  %4078 = vmatmul.mubr.msk.f32.vlgmr.msra.gmra.mrb[10].mxu0 %vm375_vm2, %v1190_v11 }
 0x95c   :  { %4293 = vmatpush3.bf16.msra.mxu0 %v4290_v51  ;;  %4305 = vmatpush3.bf16.msra.mxu1 %v4302_v33 }
 0x95d   :  { %4307 = vmatprep.subr.bf16.mxu1 %v4306_v4 }
 0x960   :  { %4309 = vmatpush3.bf16.msra.mxu1 %v4306_v4 }
 0x961   :  { %4311 = vmatprep.subr.bf16.mxu1 %v4310_v7 }
 0x964   :  { %4313 = vmatpush3.bf16.msra.mxu1 %v4310_v7 }
 0x965   :  { %4133 = vmatprep.subr.mxu1 %v4897_v36 }
 0xa2a   :  { %v1336_v14 = vpop.f32.mrb[12].mxu1 }
 0xa2b   :  { %v4086_v15 = vpop.f32.mrb[13].mxu1 }
 0xa2e   :  { %v1263_v17 = vpop.f32.mrb[10].mxu0 }
 0xa2f   :  { %v1337_v18 = vadd.f32 %v1336_v14, %v1263_v17  ;;  %v4079_v20 = vpop.f32.mrb[11].mxu0 }
 0xa31   :  { %v1348_v19 = vadd.f32 %v3749_v48, %v1337_v18  ;;  %v1398_v48 = vld [vmem:[%s5926_s10 + $0x18] sm:$0xff] }
 0xa32   :  { %v4294_v53 = vpack.c.bf16 %v1398_v48, %v1397_v52 }
 0xa33   :  { %v1350_v22 = vadd.f32 %v1348_v19, %v5215_v35  ;;  %v3750_v35 = vld [vmem:[#allocation10] ss:$0 sm:$0xff] }
 0xa34   :  { %4295 = vmatprep.subr.bf16.mxu0 %v4294_v53 }
 0xa35   :  { %v1356_v23 = vsel %vm231_vm0, %v1350_v22, 0.0  ;;  %4297 = vmatpush3.bf16.msra.mxu0 %v4294_v53 }
 0xa36   :  { %1357 = vadd.xlane.f32.xlu0 %v1356_v23 }
 0xa3a   :  { %1366 = vadd.xlane.f32.xlu0 %v1365_v25 }
 0xac3   :  { %v1358_v26 = vpop.xlane.xlu0 %1357 }
 0xac4   :  { %v1360_v27 = vmul.f32 0.03125, %v1358_v26 }
 0xac6   :  { %v1362_v28 = vsub.f32 %v1350_v22, %v1360_v27 }
 0xac7   :  { %v1367_v29 = vpop.xlane.xlu0 %1366 }
 0xac8   :  { %v1371_v31 = vmul.f32 0.03125, %v1367_v29  ;;  %v1364_v32 = vmul.f32 %v1362_v28, %v1362_v28 }
 0xaca   :  { %v1373_v34 = vadd.f32 1e-12, %v1371_v31  ;;  %v1368_v38 = vsel %vm231_vm0, %v1364_v32, 0.0  ;;  %v3755_v32 = vld [vmem:[#allocation14] ss:$0 sm:$0xff] }
 0xacb   :  { %1369 = vadd.xlane.f32.xlu1 %v1368_v38 }
 0xacc   :  { %4537 = vrsqrt.f32 %v1373_v34 }
 0xad6   :  { %v4538_v40 = vpop.eup %4537 }
 0xad7   :  { %v1377_v41 = vmul.f32 %v4538_v40, %v1361_v21 }
 0xad9   :  { %v1385_v43 = vmul.f32 %v3750_v35, %v1377_v41 }
 0xadb   :  { %v5342_v44 = vadd.f32 %v3751_v42, %v1385_v43 }
 0xadd   :  { %4095 = vmatprep.mubr.msk.f32.mxu0 %vm231_vm0, %v5342_v44 }
 0xb58   :  { %v1370_v54 = vpop.xlane.xlu1 %1369 }
 0xb59   :  { %v1372_v55 = vmul.f32 0.03125, %v1370_v54 }
 0xb5b   :  { %v1374_v56 = vadd.f32 1e-12, %v1372_v55 }
 0xb5d   :  { %4539 = vrsqrt.f32 %v1374_v56 }
 0xb67   :  { %v4540_v57 = vpop.eup %4539 }
 0xb68   :  { %v1378_v58 = vmul.f32 %v4540_v57, %v1362_v28 }
 0xb6a   :  { %v1386_v59 = vmul.f32 %v3750_v35, %v1378_v58 }
 0xb6c   :  { %v1394_v60 = vadd.f32 %v3751_v42, %v1386_v59  ;;  %v3761_v59 = vld [vmem:[%s5956_s30 + $0x28] sm:$0xff] }
 0xb6e   :  { %4096 = vmatmul.mubr.msk.f32.vlgmr.msra.gmra.mrb[12].mxu0 %vm231_vm0, %v1394_v60 }
 0xc41   :  { %v4097_v39 = vpop.f32.mrb[12].mxu0 }
 0xc42   :  { %v1484_v10 = vadd.f32 %v4097_v39, %v3752_v8  ;;  %v1478_v11 = vpop.f32.mrb[13].mxu0 }
 0xc43   :  { %v1479_v12 = vadd.f32 %v3752_v8, %v1478_v11 }
 0xc44   :  { %v1490_v13 = vmul.f32 0.044715, %v1484_v10  ;;  %v1488_v28 = vmul.f32 0.5, %v1484_v10 }
 0xc45   :  { %v1489_v14 = vmul.f32 0.044715, %v1479_v12  ;;  %v1487_v26 = vmul.f32 0.5, %v1479_v12 }
 0xc46   :  { %v1492_v15 = vmul.f32 %v1490_v13, %v1484_v10 }
 0xc47   :  { %v1491_v16 = vmul.f32 %v1489_v14, %v1479_v12 }
 0xc48   :  { %v1494_v17 = vmul.f32 %v1492_v15, %v1484_v10  ;;  %v3764_v15 = vld [vmem:[#allocation7 + $0x1] ss:$0 sm:$0xff] }
 0xc49   :  { %v1493_v18 = vmul.f32 %v1491_v16, %v1479_v12 }
 0xc4a   :  { %v1496_v20 = vadd.f32 %v1494_v17, %v1484_v10  ;;  %v3759_v10 = vld [vmem:[#allocation17] ss:$0 sm:$0xff] }
 0xc4b   :  { %v1495_v21 = vadd.f32 %v1493_v18, %v1479_v12 }
 0xc4c   :  { %v1498_v19 = vmul.f32 0.7978846, %v1496_v20 }
 0xc4d   :  { %v1497_v22 = vmul.f32 0.7978846, %v1495_v21 }
 0xc4e   :  { %4541 = vtanh.f32 %v1498_v19 }
 0xc4f   :  { %4543 = vtanh.f32 %v1497_v22 }
 0xc58   :  { %v4542_v23 = vpop.eup %4541 }
 0xc59   :  { %v4544_v24 = vpop.eup %4543  ;;  %v1502_v25 = vadd.f32 1.0, %v4542_v23 }
 0xc5a   :  { %v1501_v27 = vadd.f32 1.0, %v4544_v24 }
 0xc5b   :  { %v1504_v31 = vmul.f32 %v1502_v25, %v1488_v28 }
 0xc5c   :  { %v1503_v29 = vmul.f32 %v1501_v27, %v1487_v26 }
 0xc5e   :  { %4114 = vmatprep.mubr.msk.f32.mxu1 %vm1520_vm4, %v1503_v29 }
 0xc5f   :  { %4115 = vmatmul.mubr.msk.f32.vlgmr.msra.gmra.mrb[14].mxu1 %vm1520_vm4, %v1504_v31 }
 0xc60   :  { %4135 = vmatprep.mubr.msk.f32.mxu1 %vm4898_vm1, %v4897_v36 }
 0xd32   :  { %v4116_v34 = vpop.f32.mrb[14].mxu1 }
 0xd33   :  { %v1599_v38 = vadd.f32 %v4116_v34, %v3755_v32  ;;  %v1593_v40 = vpop.f32.mrb[15].mxu1 }
 0xd34   :  { %v1594_v35 = vadd.f32 %v3755_v32, %v1593_v40 }
 0xd35   :  { %v1603_v41 = vadd.f32 %v1599_v38, %v1394_v60 }
 0xd36   :  { %v1602_v42 = vadd.f32 %v1594_v35, %v5342_v44  ;;  %v3760_v44 = vld [vmem:[%s5956_s30 + $0x20] sm:$0xff] }
 0xd37   :  { %v1609_v43 = vsel %vm231_vm0, %v1603_v41, 0.0  ;;  %v4314_v60 = vpack.c.bf16 %v3761_v59, %v3760_v44  ;;  %v3767_v44 = vld [vmem:[%s5958_s2 + $0x20] sm:$0xff]  ;;  %v3768_v59 = vld [vmem:[%s5958_s2 + $0x28] sm:$0xff] }
 0xd38   :  { %1610 = vadd.xlane.f32.xlu1 %v1609_v43  ;;  %v1606_v45 = vsel %vm231_vm0, %v1602_v42, 0.0  ;;  %v5462_v62 = vpack.c.bf16 %v3768_v59, %v3767_v44 }
 0xd39   :  { %1607 = vadd.xlane.f32.xlu0 %v1606_v45  ;;  %4315 = vmatprep.subr.bf16.mxu0 %v4314_v60 }
 0xd3a   :  { %4317 = vmatpush3.bf16.msra.mxu0 %v4314_v60 }
 0xd3b   :  { %4319 = vmatprep.subr.bf16.mxu0 %v4318_v63 }
 0xd3e   :  { %4321 = vmatpush3.bf16.msra.mxu0 %v4318_v63 }
 0xd3f   :  { %4128 = vmatprep.subr.mxu0 %v4897_v36 }
 0xdc5   :  { %v1611_v50 = vpop.xlane.xlu1 %1610 }
 0xdc6   :  { %v1613_v51 = vmul.f32 0.03125, %v1611_v50  ;;  %v1608_v52 = vpop.xlane.xlu0 %1607 }
 0xdc7   :  { %v1612_v48 = vmul.f32 0.03125, %v1608_v52 }
 0xdc8   :  { %v1615_v53 = vsub.f32 %v1603_v41, %v1613_v51 }
 0xdc9   :  { %v1614_v54 = vsub.f32 %v1602_v42, %v1612_v48  ;;  %v3769_v48 = vld [vmem:[%s5958_s2 + $0x30] sm:$0xff] }
 0xdca   :  { %v1617_v55 = vmul.f32 %v1615_v53, %v1615_v53 }
 0xdcb   :  { %v1616_v56 = vmul.f32 %v1614_v54, %v1614_v54 }
 0xdcc   :  { %v1621_v57 = vsel %vm231_vm0, %v1617_v55, 0.0 }
 0xdcd   :  { %1622 = vadd.xlane.f32.xlu1 %v1621_v57  ;;  %v1618_v58 = vsel %vm231_vm0, %v1616_v56, 0.0 }
 0xdce   :  { %1619 = vadd.xlane.f32.xlu0 %v1618_v58 }
 0xe5a   :  { %v1623_v0 = vpop.xlane.xlu1 %1622 }
 0xe5b   :  { %v1625_v1 = vmul.f32 0.03125, %v1623_v0  ;;  %v1620_v33 = vpop.xlane.xlu0 %1619 }
 0xe5c   :  { %v1624_v2 = vmul.f32 0.03125, %v1620_v33 }
 0xe5d   :  { %v1627_v3 = vadd.f32 1e-12, %v1625_v1 }
 0xe5e   :  { %v1626_v4 = vadd.f32 1e-12, %v1624_v2 }
 0xe5f   :  { %4545 = vrsqrt.f32 %v1627_v3 }
 0xe60   :  { %4547 = vrsqrt.f32 %v1626_v4 }
 0xe69   :  { %v4546_v5 = vpop.eup %4545 }
 0xe6a   :  { %v4548_v7 = vpop.eup %4547  ;;  %v1631_v8 = vmul.f32 %v4546_v5, %v1615_v53  ;;  %v3770_v53 = vld [vmem:[%s5958_s2 + $0x38] sm:$0xff] }
 0xe6b   :  { %v1630_v39 = vmul.f32 %v4548_v7, %v1614_v54  ;;  %v4323_v54 = vpack.c.bf16 %v3770_v53, %v3769_v48 }
 0xe6c   :  { %v1639_v11 = vmul.f32 %v3758_v6, %v1631_v8 }
 0xe6d   :  { %v1638_v12 = vmul.f32 %v3758_v6, %v1630_v39 }
 0xe6e   :  { %v5408_v14 = vadd.f32 %v3759_v10, %v1639_v11 }
 0xe6f   :  { %v5406_v13 = vadd.f32 %v3759_v10, %v1638_v12 }
 0xe71   :  { %4125 = vmatprep.mubr.msk.f32.mxu0 %vm231_vm0, %v5406_v13 }
 0xe72   :  { %4126 = vmatmul.mubr.msk.f32.vlgmr.msra.gmra.mrb[14].mxu0 %vm231_vm0, %v5408_v14 }
 0xe73   :  { %4130 = vmatprep.mubr.msk.f32.mxu0 %vm4898_vm1, %v4897_v36 }
 0xf45   :  { %v4127_v16 = vpop.f32.mrb[14].mxu0 }
 0xf46   :  { %v5416_v17 = vadd.f32 %v4127_v16, %v3764_v15  ;;  %v1733_v18 = vpop.f32.mrb[15].mxu0 }
 0xf47   :  { %v1734_v20 = vadd.f32 %v3764_v15, %v1733_v18 }
 0xf49   :  { %1915 = vrot.lane.b32.xlu1 %v1734_v20, %s4899_s1  ;;  %1748 = vrot.lane.b32.xlu0 %v1734_v20, %s4900_s25 }
 0xf4d   :  { %1913 = vrot.lane.b32.xlu1 %v1734_v20, %s4901_s28 }
 0xfbb   :  { %v1749_v21 = vpop.permute.xlu0 %1748  ;;  %v1916_v19 = vpop.permute.xlu1 %1915 }
 0xfbc   :  { %4129 = vmatpush3.xpose.msk.msra.mxu0 %vm375_vm2, %v1749_v21 }
 0xfbd   :  { %4138 = vmatprep.subr.mxu0 %v4897_v36 }
 0xfbf   :  { %4131 = vmatmul.mubr.msk.f32.vlgmr.msra.gmra.mrb[16].mxu0 %vm375_vm2, %v1734_v20  ;;  %v1914_v22 = vpop.permute.xlu1 %1913 }
 0xfc0   :  { %4139 = vmatpush3.xpose.msk.msra.mxu0 %vm375_vm2, %v1916_v19  ;;  %4140 = vmatprep.mubr.msk.f32.mxu0 %vm4898_vm1, %v4897_v36 }
 0xfc1   :  { %4322 = vmatprep.subr.bf16.mxu0 %v4904_v9 }
 0xfc3   :  { %4141 = vmatmul.mubr.msk.f32.vlgmr.msra.gmra.mrb[18].mxu0 %vm375_vm2, %v1914_v22 }
 0xfc4   :  { %4152 = vmatprep.mubr.msk.f32.mxu0 %vm4898_vm1, %v4897_v36  ;;  %4324 = vmatpush3.bf16.msra.mxu0 %v4323_v54 }
 0xfc5   :  { %4162 = vmatprep.subr.mxu0 %v4897_v36 }
0x1092   :  { %v1820_v23 = vpop.f32.mrb[16].mxu0 }
0x1093   :  { %v1824_v24 = vmul.f32 0.25, %v1820_v23  ;;  %v4132_v25 = vpop.f32.mrb[17].mxu0 }
0x1095   :  { %v1825_v26 = vadd.f32 %v1824_v24, %v5250_v49  ;;  %v3787_v24 = vld [vmem:[#allocation8 + $0x1] ss:$0 sm:$0xff] }
0x1096   :  { %v1987_v27 = vpop.f32.mrb[18].mxu0 }
0x1097   :  { %v1991_v28 = vmul.f32 0.25, %v1987_v27  ;;  %v4142_v29 = vpop.f32.mrb[19].mxu0  ;;  %v1826_v31 = vsel %vm456_vm3, %v1825_v26, -inf }
0x1098   :  { %1827 = vmax.xlane.f32.xlu1 %v1826_v31 }
0x1099   :  { %v1992_v32 = vadd.f32 %v1991_v28, %v5250_v49 }
0x109b   :  { %v1993_v34 = vsel %vm456_vm3, %v1992_v32, -inf }
0x109c   :  { %1994 = vmax.xlane.f32.xlu0 %v1993_v34 }
0x10a9   :  { %1837 = vrot.lane.b32.xlu1 %v1734_v20, %s4902_s29 }
0x10ad   :  { %2227 = vrot.lane.b32.xlu1 %v5416_v17, %s4900_s25 }
0x10b1   :  { %2394 = vrot.lane.b32.xlu1 %v5416_v17, %s4899_s1 }
0x10b5   :  { %2392 = vrot.lane.b32.xlu1 %v5416_v17, %s4901_s28 }
0x1125   :  { %v1828_v38 = vpop.xlane.xlu1 %1827 }
0x1126   :  { %v1829_v40 = vsub.f32 %v1825_v26, %v1828_v38 }
0x1128   :  { %v1830_v35 = vmul.f32 1.442695, %v1829_v40 }
0x1129   :  { %v1838_v41 = vpop.permute.xlu1 %1837  ;;  %v1995_v42 = vpop.xlane.xlu0 %1994 }
0x112a   :  { %4549 = vpow2.f32 %v1830_v35  ;;  %v1996_v49 = vsub.f32 %v1992_v32, %v1995_v42  ;;  %4134 = vmatpush3.msra.mxu1 %v1838_v41 }
0x112b   :  { %4143 = vmatprep.subr.mxu1 %v4897_v36 }
0x112c   :  { %v1997_v43 = vmul.f32 1.442695, %v1996_v49 }
0x112d   :  { %v2228_v0 = vpop.permute.xlu1 %2227 }
0x112e   :  { %4551 = vpow2.f32 %v1997_v43 }
0x1131   :  { %v2395_v4 = vpop.permute.xlu1 %2394 }
0x1134   :  { %v4550_v45 = vpop.eup %4549 }
0x1135   :  { %v1832_v50 = vsel %vm456_vm3, %v4550_v45, 0.0  ;;  %v2393_v5 = vpop.permute.xlu1 %2392 }
0x1136   :  { %1833 = vadd.xlane.f32.xlu0 %v1832_v50 }
0x1138   :  { %v4552_v51 = vpop.eup %4551 }
0x1139   :  { %v1999_v52 = vsel %vm456_vm3, %v4552_v51, 0.0 }
0x113a   :  { %2000 = vadd.xlane.f32.xlu0 %v1999_v52 }
0x1150   :  { %2004 = vrot.lane.b32.xlu0 %v1734_v20, %s4903_s17 }
0x11c3   :  { %v1834_v55 = vpop.xlane.xlu0 %1833 }
0x11c4   :  { %4553 = vrcp.f32 %v1834_v55 }
0x11c7   :  { %v2001_v56 = vpop.xlane.xlu0 %2000 }
0x11c8   :  { %4555 = vrcp.f32 %v2001_v56 }
0x11cb   :  { %v2005_v60 = vpop.permute.xlu0 %2004 }
0x11ce   :  { %v4554_v57 = vpop.eup %4553 }
0x11cf   :  { %v1836_v58 = vmul.f32 %v4554_v57, %v4550_v45 }
0x11d1   :  { %4136 = vmatmul.mubr.msk.f32.vlgmr.msra.gmra.mrb[16].mxu1 %vm456_vm3, %v1836_v58 }
0x11d2   :  { %v4556_v61 = vpop.eup %4555  ;;  %4144 = vmatpush3.msra.mxu1 %v2005_v60  ;;  %4145 = vmatprep.mubr.msk.f32.mxu1 %vm4898_vm1, %v4897_v36 }
0x11d3   :  { %v2003_v63 = vmul.f32 %v4556_v61, %v4552_v51  ;;  %4325 = vmatprep.subr.bf16.mxu1 %v4904_v9 }
0x11d5   :  { %4146 = vmatmul.mubr.msk.f32.vlgmr.msra.gmra.mrb[18].mxu1 %vm456_vm3, %v2003_v63 }
0x11d6   :  { %4327 = vmatpush3.bf16.msra.mxu1 %v5462_v62  ;;  %4159 = vmatprep.mubr.msk.f32.mxu1 %vm4898_vm1, %v4897_v36 }
0x11d7   :  { %4167 = vmatprep.subr.mxu1 %v4897_v36 }
0x12a4   :  { %v1909_v1 = vpop.f32.mrb[16].mxu1 }
0x12a5   :  { %v4137_v33 = vpop.f32.mrb[17].mxu1  ;;  %4160 = vmatmul.mubr.msk.f32.vlgmr.msra.gmra.mrb[20].mxu1 %vm375_vm2, %v1909_v1 }
0x12a6   :  { %4169 = vmatprep.mubr.msk.f32.mxu1 %vm4898_vm1, %v4897_v36 }
0x12a8   :  { %v2076_v2 = vpop.f32.mrb[18].mxu1 }
0x12a9   :  { %v4147_v3 = vpop.f32.mrb[19].mxu1  ;;  %4153 = vmatmul.mubr.msk.f32.vlgmr.msra.gmra.mrb[20].mxu0 %vm375_vm2, %v2076_v2 }
0x12aa   :  { %4163 = vmatpush3.xpose.msk.msra.mxu0 %vm375_vm2, %v2228_v0  ;;  %4164 = vmatprep.mubr.msk.f32.mxu0 %vm4898_vm1, %v4897_v36 }
0x12ab   :  { %4172 = vmatprep.subr.mxu0 %v4897_v36 }
0x12ad   :  { %4165 = vmatmul.mubr.msk.f32.vlgmr.msra.gmra.mrb[22].mxu0 %vm375_vm2, %v5416_v17 }
0x12ae   :  { %4173 = vmatpush3.xpose.msk.msra.mxu0 %vm375_vm2, %v2395_v4  ;;  %4174 = vmatprep.mubr.msk.f32.mxu0 %vm4898_vm1, %v4897_v36 }
0x12af   :  { %4328 = vmatprep.subr.bf16.mxu0 %v4904_v9 }
0x12b1   :  { %4175 = vmatmul.mubr.msk.f32.vlgmr.msra.gmra.mrb[24].mxu0 %vm375_vm2, %v2393_v5 }
0x12b2   :  { %4330 = vmatpush3.bf16.msra.mxu0 %v4323_v54  ;;  %4186 = vmatprep.mubr.msk.f32.mxu0 %vm4898_vm1, %v4897_v36 }
0x1378   :  { %v2222_v6 = vpop.f32.mrb[20].mxu1 }
0x1379   :  { %v4161_v7 = vpop.f32.mrb[21].mxu1 }
0x137c   :  { %v2149_v8 = vpop.f32.mrb[20].mxu0 }
0x137d   :  { %v2223_v39 = vadd.f32 %v2222_v6, %v2149_v8  ;;  %v4154_v10 = vpop.f32.mrb[21].mxu0 }
0x137f   :  { %v2713_v25 = vadd.f32 %v3787_v24, %v2223_v39 }
0x1380   :  { %v2299_v11 = vpop.f32.mrb[22].mxu0 }
0x1381   :  { %v2303_v12 = vmul.f32 0.25, %v2299_v11  ;;  %v4166_v15 = vpop.f32.mrb[23].mxu0  ;;  %v2715_v26 = vadd.f32 %v2713_v25, %v5406_v13 }
0x1383   :  { %v2304_v16 = vadd.f32 %v2303_v12, %v5313_v37  ;;  %v2721_v27 = vsel %vm231_vm0, %v2715_v26, 0.0  ;;  %v3789_v12 = vld [vmem:[#allocation11 + $0x1] ss:$0 sm:$0xff] }
0x1384   :  { %v2466_v18 = vpop.f32.mrb[24].mxu0 }
0x1385   :  { %v2470_v20 = vmul.f32 0.25, %v2466_v18  ;;  %v4176_v21 = vpop.f32.mrb[25].mxu0  ;;  %v2305_v19 = vsel %vm456_vm3, %v2304_v16, -inf  ;;  %v3790_v18 = vld [vmem:[%s5926_s10 + $0x20] sm:$0xff] }
0x1386   :  { %2306 = vmax.xlane.f32.xlu0 %v2305_v19  ;;  %v3792_v19 = vld [vmem:[%s5926_s10 + $0x30] sm:$0xff] }
0x1387   :  { %v2471_v22 = vadd.f32 %v2470_v20, %v5313_v37  ;;  %v3791_v20 = vld [vmem:[%s5926_s10 + $0x28] sm:$0xff] }
0x1388   :  { %v4334_v21 = vpack.c.bf16 %v3791_v20, %v3790_v18  ;;  %v3063_v18 = vld [vmem:[%s5936_s20 + $0x108] sm:$0xff]  ;;  %v3064_v20 = vld [vmem:[%s5936_s20 + $0x110] sm:$0xff] }
0x1389   :  { %v2472_v23 = vsel %vm456_vm3, %v2471_v22, -inf }
0x138a   :  { %2473 = vmax.xlane.f32.xlu1 %v2472_v23  ;;  %4335 = vmatprep.subr.bf16.mxu0 %v4334_v21 }
0x139b   :  { %2483 = vrot.lane.b32.xlu1 %v5416_v17, %s4903_s17 }
0x13bf   :  { %2722 = vadd.xlane.f32.xlu1 %v2721_v27 }
0x1413   :  { %v2307_v28 = vpop.xlane.xlu0 %2306 }
0x1414   :  { %v2308_v29 = vsub.f32 %v2304_v16, %v2307_v28 }
0x1416   :  { %v2309_v31 = vmul.f32 1.442695, %v2308_v29 }
0x1417   :  { %v2474_v32 = vpop.xlane.xlu1 %2473 }
0x1418   :  { %4557 = vpow2.f32 %v2309_v31  ;;  %v2475_v34 = vsub.f32 %v2471_v22, %v2474_v32  ;;  %v3793_v22 = vld [vmem:[%s5926_s10 + $0x38] sm:$0xff]  ;;  %v3797_v32 = vld [vmem:[%s5928_s12 + $0x40] sm:$0xff] }
0x1419   :  { %v4338_v23 = vpack.c.bf16 %v3793_v22, %v3792_v19  ;;  %v3066_v22 = vld [vmem:[%s5936_s20 + $0x120] sm:$0xff] }
0x141a   :  { %v2476_v37 = vmul.f32 1.442695, %v2475_v34  ;;  %v3798_v34 = vld [vmem:[%s5928_s12 + $0x48] sm:$0xff] }
0x141b   :  { %v2484_v50 = vpop.permute.xlu1 %2483 }
0x141c   :  { %4559 = vpow2.f32 %v2476_v37  ;;  %v4342_v37 = vpack.c.bf16 %v3798_v34, %v3797_v32 }
0x1422   :  { %v4558_v38 = vpop.eup %4557 }
0x1423   :  { %v2311_v40 = vsel %vm456_vm3, %v4558_v38, 0.0 }
0x1424   :  { %2312 = vadd.xlane.f32.xlu0 %v2311_v40  ;;  %v3800_v40 = vld [vmem:[%s5928_s12 + $0x58] sm:$0xff] }
0x1426   :  { %v4560_v35 = vpop.eup %4559 }
0x1427   :  { %v2478_v41 = vsel %vm456_vm3, %v4560_v35, 0.0 }
0x1428   :  { %2479 = vadd.xlane.f32.xlu0 %v2478_v41  ;;  %v3801_v41 = vld [vmem:[%s5928_s12 + $0x60] sm:$0xff] }
0x143e   :  { %2316 = vrot.lane.b32.xlu0 %v5416_v17, %s4902_s29 }
0x144c   :  { %v2723_v55 = vpop.xlane.xlu1 %2722 }
0x144d   :  { %v2727_v58 = vmul.f32 0.03125, %v2723_v55 }
0x144f   :  { %v2729_v61 = vsub.f32 %v2715_v26, %v2727_v58 }
0x1451   :  { %v2731_v1 = vmul.f32 %v2729_v61, %v2729_v61 }
0x1453   :  { %v2733_v33 = vsel %vm231_vm0, %v2731_v1, 0.0 }
0x14b1   :  { %v2313_v13 = vpop.xlane.xlu0 %2312 }
0x14b2   :  { %4561 = vrcp.f32 %v2313_v13  ;;  %v3802_v13 = vld [vmem:[%s5928_s12 + $0x68] sm:$0xff] }
0x14b5   :  { %v2480_v42 = vpop.xlane.xlu0 %2479 }
0x14b6   :  { %4563 = vrcp.f32 %v2480_v42  ;;  %v4350_v42 = vpack.c.bf16 %v3802_v13, %v3801_v41 }
0x14b9   :  { %v2317_v49 = vpop.permute.xlu0 %2316 }
0x14ba   :  { %4168 = vmatpush3.msra.mxu1 %v2317_v49  ;;  %v3803_v49 = vld [vmem:[%s5928_s12 + $0x70] sm:$0xff] }
0x14bb   :  { %4177 = vmatprep.subr.mxu1 %v4897_v36 }
0x14bc   :  { %v4562_v43 = vpop.eup %4561 }
0x14bd   :  { %v2315_v45 = vmul.f32 %v4562_v43, %v4558_v38  ;;  %v3799_v38 = vld [vmem:[%s5928_s12 + $0x50] sm:$0xff]  ;;  %v3804_v43 = vld [vmem:[%s5928_s12 + $0x78] sm:$0xff] }
0x14bf   :  { %4170 = vmatmul.mubr.msk.f32.vlgmr.msra.gmra.mrb[22].mxu1 %vm456_vm3, %v2315_v45  ;;  %v4354_v45 = vpack.c.bf16 %v3804_v43, %v3803_v49  ;;  %v3072_v43 = vld [vmem:[%s5936_s20 + $0x150] sm:$0xff] }
0x14c0   :  { %v4564_v51 = vpop.eup %4563  ;;  %4178 = vmatpush3.msra.mxu1 %v2484_v50  ;;  %4179 = vmatprep.mubr.msk.f32.mxu1 %vm4898_vm1, %v4897_v36  ;;  %v3794_v50 = vld [vmem:[#allocation13 + $0x1] ss:$0 sm:$0xff] }
0x14c1   :  { %v2482_v52 = vmul.f32 %v4564_v51, %v4560_v35  ;;  %4331 = vmatprep.subr.bf16.mxu1 %v4904_v9  ;;  %v4346_v35 = vpack.c.bf16 %v3800_v40, %v3799_v38 }
0x14c3   :  { %4180 = vmatmul.mubr.msk.f32.vlgmr.msra.gmra.mrb[24].mxu1 %vm456_vm3, %v2482_v52 }
0x14c4   :  { %4333 = vmatpush3.bf16.msra.mxu1 %v5462_v62  ;;  %4193 = vmatprep.mubr.msk.f32.mxu1 %vm4898_vm1, %v4897_v36 }
0x14c5   :  { %4343 = vmatprep.subr.bf16.mxu1 %v4342_v37 }
0x1592   :  { %v2388_v17 = vpop.f32.mrb[22].mxu1 }
0x1593   :  { %v4171_v48 = vpop.f32.mrb[23].mxu1  ;;  %4194 = vmatmul.mubr.msk.f32.vlgmr.msra.gmra.mrb[26].mxu1 %vm375_vm2, %v2388_v17 }
0x1594   :  { %4345 = vmatpush3.bf16.msra.mxu1 %v4342_v37 }
0x1595   :  { %4347 = vmatprep.subr.bf16.mxu1 %v4346_v35 }
0x1596   :  { %v2555_v53 = vpop.f32.mrb[24].mxu1 }
0x1597   :  { %v4181_v54 = vpop.f32.mrb[25].mxu1  ;;  %4187 = vmatmul.mubr.msk.f32.vlgmr.msra.gmra.mrb[26].mxu0 %vm375_vm2, %v2555_v53 }
0x1598   :  { %4337 = vmatpush3.bf16.msra.mxu0 %v4334_v21  ;;  %4349 = vmatpush3.bf16.msra.mxu1 %v4346_v35 }
0x1599   :  { %4339 = vmatprep.subr.bf16.mxu0 %v4338_v23  ;;  %4351 = vmatprep.subr.bf16.mxu1 %v4350_v42 }
0x159c   :  { %4341 = vmatpush3.bf16.msra.mxu0 %v4338_v23  ;;  %4353 = vmatpush3.bf16.msra.mxu1 %v4350_v42  ;;  %v3067_v23 = vld [vmem:[%s5936_s20 + $0x128] sm:$0xff] }
0x159d   :  { %4358 = vmatprep.subr.bf16.mxu0 %v4904_v9  ;;  %4355 = vmatprep.subr.bf16.mxu1 %v4354_v45 }
0x15a0   :  { %4357 = vmatpush3.bf16.msra.mxu1 %v4354_v45  ;;  %v3073_v45 = vld [vmem:[%s5936_s20 + $0x158] sm:$0xff] }
0x15a1   :  { %4396 = vmatprep.subr.bf16.mxu1 %v4904_v9 }
0x1666   :  { %v2701_v56 = vpop.f32.mrb[26].mxu1 }
0x1667   :  { %v4195_v57 = vpop.f32.mrb[27].mxu1 }
0x166a   :  { %v2628_v44 = vpop.f32.mrb[26].mxu0 }
0x166b   :  { %v2702_v59 = vadd.f32 %v2701_v56, %v2628_v44  ;;  %v4188_v60 = vpop.f32.mrb[27].mxu0 }
0x166d   :  { %v2714_v62 = vadd.f32 %v3787_v24, %v2702_v59 }
0x166f   :  { %v2716_v63 = vadd.f32 %v2714_v62, %v5408_v14  ;;  %v3788_v14 = vld [vmem:[#allocation10 + $0x1] ss:$0 sm:$0xff] }
0x1671   :  { %v2724_v0 = vsel %vm231_vm0, %v2716_v63, 0.0 }
0x1672   :  { %2725 = vadd.xlane.f32.xlu0 %v2724_v0 }
0x1676   :  { %2734 = vadd.xlane.f32.xlu0 %v2733_v33 }
0x16ff   :  { %v2726_v2 = vpop.xlane.xlu0 %2725 }
0x1700   :  { %v2728_v3 = vmul.f32 0.03125, %v2726_v2 }
0x1702   :  { %v2730_v4 = vsub.f32 %v2716_v63, %v2728_v3 }
0x1703   :  { %v2735_v5 = vpop.xlane.xlu0 %2734 }
0x1704   :  { %v2739_v6 = vmul.f32 0.03125, %v2735_v5  ;;  %v2732_v7 = vmul.f32 %v2730_v4, %v2730_v4  ;;  %v3805_v5 = vld [vmem:[#allocation14 + $0x1] ss:$0 sm:$0xff] }
0x1706   :  { %v2741_v8 = vadd.f32 1e-12, %v2739_v6  ;;  %v2736_v39 = vsel %vm231_vm0, %v2732_v7, 0.0 }
0x1707   :  { %2737 = vadd.xlane.f32.xlu1 %v2736_v39 }
0x1708   :  { %4565 = vrsqrt.f32 %v2741_v8 }
0x1712   :  { %v4566_v10 = vpop.eup %4565 }
0x1713   :  { %v2745_v11 = vmul.f32 %v4566_v10, %v2729_v61 }
0x1715   :  { %v2753_v15 = vmul.f32 %v3788_v14, %v2745_v11 }
0x1717   :  { %v5514_v16 = vadd.f32 %v3789_v12, %v2753_v15  ;;  %v3062_v15 = vld [vmem:[%s5936_s20 + $0x100] sm:$0xff] }
0x1718   :  { %v5573_v21 = vpack.c.bf16 %v3063_v18, %v3062_v15  ;;  %v3162_v15 = vsub.s32 2, %v5239_v46 }
0x1719   :  { %4204 = vmatprep.mubr.msk.f32.mxu0 %vm231_vm0, %v5514_v16 }
0x1794   :  { %v2738_v24 = vpop.xlane.xlu1 %2737 }
0x1795   :  { %v2740_v25 = vmul.f32 0.03125, %v2738_v24  ;;  %v5589_v24 = vpack.c.bf16 %v3067_v23, %v3066_v22  ;;  %v3031_v22 = vld [vmem:[%s5936_s20 + $0x8] sm:$0xff] }
0x1797   :  { %v2742_v26 = vadd.f32 1e-12, %v2740_v25  ;;  %v3068_v25 = vld [vmem:[%s5936_s20 + $0x130] sm:$0xff] }
0x1799   :  { %4567 = vrsqrt.f32 %v2742_v26  ;;  %v3069_v26 = vld [vmem:[%s5936_s20 + $0x138] sm:$0xff] }
0x17a3   :  { %v4568_v27 = vpop.eup %4567 }
0x17a4   :  { %v2746_v28 = vmul.f32 %v4568_v27, %v2730_v4  ;;  %v5599_v27 = vpack.c.bf16 %v3069_v26, %v3068_v25  ;;  %v3048_v25 = vld [vmem:[%s5936_s20 + $0x90] sm:$0xff]  ;;  %v3049_v26 = vld [vmem:[%s5936_s20 + $0x98] sm:$0xff] }
0x17a6   :  { %v2754_v29 = vmul.f32 %v3788_v14, %v2746_v28  ;;  %v3070_v28 = vld [vmem:[%s5936_s20 + $0x140] sm:$0xff] }
0x17a8   :  { %v2762_v31 = vadd.f32 %v3789_v12, %v2754_v29  ;;  %v3071_v29 = vld [vmem:[%s5936_s20 + $0x148] sm:$0xff] }
0x17aa   :  { %4205 = vmatmul.mubr.msk.f32.vlgmr.msra.gmra.mrb[28].mxu0 %vm231_vm0, %v2762_v31 }
0x17ab   :  { %4234 = vmatprep.mubr.msk.f32.mxu0 %vm4898_vm1, %v4897_v36 }
0x187d   :  { %v4206_v51 = vpop.f32.mrb[28].mxu0 }
0x187e   :  { %v2854_v52 = vadd.f32 %v4206_v51, %v3794_v50  ;;  %v2848_v17 = vpop.f32.mrb[29].mxu0  ;;  %v3074_v51 = vld [vmem:[%s5936_s20 + $0x160] sm:$0xff] }
0x187f   :  { %v2849_v48 = vadd.f32 %v3794_v50, %v2848_v17  ;;  %v5630_v50 = vpack.c.bf16 %v3073_v45, %v3072_v43  ;;  %v3034_v43 = vld [vmem:[%s5936_s20 + $0x20] sm:$0xff]  ;;  %v3035_v45 = vld [vmem:[%s5936_s20 + $0x28] sm:$0xff] }
0x1880   :  { %v2860_v53 = vmul.f32 0.044715, %v2854_v52  ;;  %v2858_v2 = vmul.f32 0.5, %v2854_v52 }
0x1881   :  { %v2859_v54 = vmul.f32 0.044715, %v2849_v48  ;;  %v2857_v1 = vmul.f32 0.5, %v2849_v48 }
0x1882   :  { %v2862_v55 = vmul.f32 %v2860_v53, %v2854_v52  ;;  %v3077_v53 = vld [vmem:[%s5936_s20 + $0x178] sm:$0xff] }
0x1883   :  { %v2861_v56 = vmul.f32 %v2859_v54, %v2849_v48 }
0x1884   :  { %v2864_v57 = vmul.f32 %v2862_v55, %v2854_v52  ;;  %v3170_v55 = vsub.s32 6, %v5239_v46 }
0x1885   :  { %v2863_v58 = vmul.f32 %v2861_v56, %v2849_v48  ;;  %v5658_v56 = vld [vmem:[%s5934_s18] sm:$0xff] }
0x1886   :  { %v2866_v44 = vadd.f32 %v2864_v57, %v2854_v52  ;;  %v3075_v52 = vld [vmem:[%s5936_s20 + $0x168] sm:$0xff]  ;;  %v3166_v57 = vsub.s32 4, %v5239_v46 }
0x1887   :  { %v2865_v59 = vadd.f32 %v2863_v58, %v2849_v48  ;;  %v5640_v17 = vpack.c.bf16 %v3075_v52, %v3074_v51  ;;  %v3076_v48 = vld [vmem:[%s5936_s20 + $0x170] sm:$0xff]  ;;  %v5664_v58 = vld [vmem:[%s5936_s20 + $0x180] sm:$0x3f]  ;;  %v3053_v51 = vld [vmem:[%s5936_s20 + $0xb8] sm:$0xff]  ;;  %v5754_v52 = vpack.c.bf16 %v3035_v45, %v3034_v43 }
0x1888   :  { %v2868_v60 = vmul.f32 0.7978846, %v2866_v44  ;;  %v5650_v54 = vpack.c.bf16 %v3077_v53, %v3076_v48  ;;  %v3171_v44 = vrot.slane %v5658_v56, %v3170_v55  ;;  %v3036_v53 = vld [vmem:[%s5936_s20 + $0x30] sm:$0xff]  ;;  %v3037_v55 = vld [vmem:[%s5936_s20 + $0x38] sm:$0xff] }
0x1889   :  { %v2867_v61 = vmul.f32 0.7978846, %v2865_v59  ;;  %v3021_v59 = vld [vmem:[%s5932_s16] sm:$0xff] }
0x188a   :  { %4569 = vtanh.f32 %v2868_v60  ;;  %v3022_v60 = vld [vmem:[%s5932_s16 + $0x8] sm:$0xff] }
0x188b   :  { %4571 = vtanh.f32 %v2867_v61  ;;  %v4359_v61 = vpack.c.bf16 %v3022_v60, %v3021_v59  ;;  %v3038_v60 = vld [vmem:[%s5936_s20 + $0x40] sm:$0xff] }
0x188d   :  { %4360 = vmatpush3.bf16.msra.mxu0 %v4359_v61 }
0x188e   :  { %4361 = vmatprep.subr.bf16.mxu0 %v4904_v9 }
0x1894   :  { %v4570_v62 = vpop.eup %4569 }
0x1895   :  { %v4572_v63 = vpop.eup %4571  ;;  %v2872_v0 = vadd.f32 1.0, %v4570_v62  ;;  %v3167_v62 = vrot.slane %v5658_v56, %v3166_v57  ;;  %v3055_v57 = vld [vmem:[%s5936_s20 + $0xc8] sm:$0xff] }
0x1896   :  { %v2871_v33 = vadd.f32 1.0, %v4572_v63  ;;  %v3023_v63 = vld [vmem:[%s5932_s16 + $0x10] sm:$0xff] }
0x1897   :  { %v2874_v4 = vmul.f32 %v2872_v0, %v2858_v2  ;;  %v3024_v0 = vld [vmem:[%s5932_s16 + $0x18] sm:$0xff]  ;;  %v3047_v2 = vld [vmem:[%s5936_s20 + $0x88] sm:$0xff] }
0x1898   :  { %v2873_v3 = vmul.f32 %v2871_v33, %v2857_v1  ;;  %v4362_v1 = vpack.c.bf16 %v3024_v0, %v3023_v63  ;;  %v3046_v33 = vld [vmem:[%s5936_s20 + $0x80] sm:$0xff] }
0x189a   :  { %4223 = vmatprep.mubr.msk.f32.mxu1 %vm1520_vm4, %v2873_v3  ;;  %4363 = vmatpush3.bf16.msra.mxu0 %v4362_v1  ;;  %v5694_v3 = vpack.c.bf16 %v3047_v2, %v3046_v33  ;;  %v3041_v33 = vld [vmem:[%s5936_s20 + $0x58] sm:$0xff]  ;;  %v3059_v2 = vld [vmem:[%s5936_s20 + $0xe8] sm:$0xff] }
0x189b   :  { %4224 = vmatmul.mubr.msk.f32.vlgmr.msra.gmra.mrb[28].mxu1 %vm1520_vm4, %v2874_v4 }
0x189c   :  { %4398 = vmatpush1.bf16.msra.mxu1 %v5573_v21  ;;  %3812 = vmatprep.mubr.msk.f32.mxu1 %vm3175_vm6, %v3171_v44  ;;  %v5774_v44 = vpack.c.bf16 %v3037_v55, %v3036_v53 }
0x189d   :  { %4399 = vmatprep.subr.bf16.mxu1 %v4904_v9  ;;  %4365 = vmatprep.subr.bf16.mxu0 %v5694_v3 }
0x196e   :  { %v4225_v6 = vpop.f32.mrb[28].mxu1 }
0x196f   :  { %v2970_v7 = vadd.f32 %v4225_v6, %v3805_v5  ;;  %v2964_v8 = vpop.f32.mrb[29].mxu1 }
0x1970   :  { %v2965_v39 = vadd.f32 %v3805_v5, %v2964_v8 }
0x1971   :  { %v2974_v10 = vadd.f32 %v2970_v7, %v2762_v31  ;;  %v5609_v31 = vpack.c.bf16 %v3071_v29, %v3070_v28 }
0x1972   :  { %v2973_v14 = vadd.f32 %v2965_v39, %v5514_v16  ;;  %v3065_v16 = vld [vmem:[%s5936_s20 + $0x118] sm:$0xff] }
0x1973   :  { %v2982_v11 = vsel %vm231_vm0, %v2974_v10, 0.0  ;;  %v5579_v19 = vpack.c.bf16 %v3065_v16, %v3064_v20  ;;  %v3809_v20 = vld [vmem:[#allocation17 + $0x1] ss:$0 sm:$0xff]  ;;  %v3030_v16 = vld [vmem:[%s5936_s20] sm:$0xff] }
0x1974   :  { %2983 = vadd.xlane.f32.xlu1 %v2982_v11  ;;  %v2979_v12 = vsel %vm231_vm0, %v2973_v14, 0.0 }
0x1975   :  { %2980 = vadd.xlane.f32.xlu0 %v2979_v12  ;;  %4401 = vmatpush1.bf16.msra.mxu1 %v5579_v19 }
0x1976   :  { %4402 = vmatprep.subr.bf16.mxu1 %v4904_v9 }
0x1979   :  { %4404 = vmatpush1.bf16.msra.mxu1 %v5589_v24 }
0x197a   :  { %4405 = vmatprep.subr.bf16.mxu1 %v4904_v9 }
0x197d   :  { %4407 = vmatpush1.bf16.msra.mxu1 %v5599_v27 }
0x197e   :  { %4408 = vmatprep.subr.bf16.mxu1 %v4904_v9 }
0x1981   :  { %4410 = vmatpush1.bf16.msra.mxu1 %v5609_v31 }
0x1982   :  { %4411 = vmatprep.subr.bf16.mxu1 %v4904_v9 }
0x1985   :  { %4413 = vmatpush1.bf16.msra.mxu1 %v5630_v50 }
0x1986   :  { %4414 = vmatprep.subr.bf16.mxu1 %v4904_v9 }
0x1989   :  { %4416 = vmatpush1.bf16.msra.mxu1 %v5640_v17 }
0x198a   :  { %4417 = vmatprep.subr.bf16.mxu1 %v4904_v9 }
0x198d   :  { %4419 = vmatpush1.bf16.msra.mxu1 %v5650_v54 }
0x198e   :  { %3284 = vmatprep.subr.mxu1 %v4897_v36 }
0x1991   :  { %3811 = vmatpush1.msk.msra.mxu1 %vm3178_vm5, %v5664_v58 }
0x1992   :  { %4426 = vmatprep.subr.bf16.mxu1 %v4904_v9  ;;  %3317 = vmatmul.mubr.f32.vlgmr.msra.gmra.mrb[30].mxu1 %v3167_v62  ;;  %v3057_v62 = vld [vmem:[%s5936_s20 + $0xd8] sm:$0xff] }
0x1993   :  { %4428 = vmatpush3.bf16.msra.mxu1 %v4359_v61  ;;  %4256 = vmatprep.mubr.msk.f32.mxu1 %vm4898_vm1, %v4897_v36  ;;  %v3039_v61 = vld [vmem:[%s5936_s20 + $0x48] sm:$0xff] }
0x1994   :  { %4429 = vmatprep.subr.bf16.mxu1 %v4904_v9  ;;  %v5794_v63 = vpack.c.bf16 %v3039_v61, %v3038_v60 }
0x1997   :  { %4431 = vmatpush3.bf16.msra.mxu1 %v4362_v1  ;;  %v3040_v1 = vld [vmem:[%s5936_s20 + $0x50] sm:$0xff] }
0x1998   :  { %4464 = vmatprep.subr.bf16.mxu1 %v4904_v9 }
0x1a01   :  { %v2984_v32 = vpop.xlane.xlu1 %2983 }
0x1a02   :  { %v2986_v34 = vmul.f32 0.03125, %v2984_v32  ;;  %v2981_v37 = vpop.xlane.xlu0 %2980  ;;  %v5713_v32 = vpack.c.bf16 %v3031_v22, %v3030_v16  ;;  %v3485_v22 = vsub.s32 7, %v5239_v46 }
0x1a03   :  { %v2985_v38 = vmul.f32 0.03125, %v2981_v37 }
0x1a04   :  { %v5614_v40 = vsub.f32 %v2974_v10, %v2986_v34  ;;  %v3163_v34 = vrot.slane %v5658_v56, %v3162_v15 }
0x1a05   :  { %v5616_v35 = vsub.f32 %v2973_v14, %v2985_v38  ;;  %v3808_v14 = vld [vmem:[#allocation16 + $0x1] ss:$0 sm:$0xff]  ;;  %v5716_v38 = vpack.c.bf16 %v3049_v26, %v3048_v25  ;;  %v3486_v25 = vrot.slane %v5658_v56, %v3485_v22 }
0x1a06   :  { %v2990_v41 = vmul.f32 %v5614_v40, %v5614_v40 }
0x1a07   :  { %v2989_v13 = vmul.f32 %v5616_v35, %v5616_v35 }
0x1a08   :  { %v2994_v42 = vsel %vm231_vm0, %v2990_v41, 0.0  ;;  %v3050_v41 = vld [vmem:[%s5936_s20 + $0xa0] sm:$0xff] }
0x1a09   :  { %2995 = vadd.xlane.f32.xlu1 %v2994_v42  ;;  %v2991_v49 = vsel %vm231_vm0, %v2989_v13, 0.0  ;;  %v3051_v13 = vld [vmem:[%s5936_s20 + $0xa8] sm:$0xff] }
0x1a0a   :  { %2992 = vadd.xlane.f32.xlu0 %v2991_v49  ;;  %v5737_v49 = vpack.c.bf16 %v3051_v13, %v3050_v41 }
0x1a96   :  { %v2996_v4 = vpop.xlane.xlu1 %2995 }
0x1a97   :  { %v2998_v5 = vmul.f32 0.03125, %v2996_v4  ;;  %v2993_v6 = vpop.xlane.xlu0 %2992  ;;  %v5814_v4 = vpack.c.bf16 %v3041_v33, %v3040_v1 }
0x1a98   :  { %v2997_v7 = vmul.f32 0.03125, %v2993_v6  ;;  %v3042_v6 = vld [vmem:[%s5936_s20 + $0x60] sm:$0xff] }
0x1a99   :  { %v3000_v8 = vadd.f32 1e-12, %v2998_v5 }
0x1a9a   :  { %v2999_v39 = vadd.f32 1e-12, %v2997_v7  ;;  %v3043_v7 = vld [vmem:[%s5936_s20 + $0x68] sm:$0xff] }
0x1a9b   :  { %4573 = vrsqrt.f32 %v3000_v8  ;;  %v3061_v8 = vld [vmem:[%s5936_s20 + $0xf8] sm:$0xff] }
0x1a9c   :  { %4575 = vrsqrt.f32 %v2999_v39  ;;  %v5834_v39 = vpack.c.bf16 %v3043_v7, %v3042_v6 }
0x1aa5   :  { %v4574_v10 = vpop.eup %4573 }
0x1aa6   :  { %v4576_v11 = vpop.eup %4575  ;;  %v3004_v12 = vmul.f32 %v4574_v10, %v5614_v40  ;;  %v3032_v40 = vld [vmem:[%s5936_s20 + $0x10] sm:$0xff] }
0x1aa7   :  { %v3003_v18 = vmul.f32 %v4576_v11, %v5616_v35  ;;  %v3033_v35 = vld [vmem:[%s5936_s20 + $0x18] sm:$0xff] }
0x1aa8   :  { %v3012_v23 = vmul.f32 %v3808_v14, %v3004_v12  ;;  %v5734_v42 = vpack.c.bf16 %v3033_v35, %v3032_v40  ;;  %v3045_v11 = vld [vmem:[%s5936_s20 + $0x78] sm:$0xff]  ;;  %v3159_v12 = vrot.slane %v5658_v56, %v453_v47  ;;  %v3026_v47 = vld [vmem:[%s5935_s19] sm:$0xff] }
0x1aa9   :  { %v3011_v28 = vmul.f32 %v3808_v14, %v3003_v18  ;;  %v3044_v14 = vld [vmem:[%s5936_s20 + $0x70] sm:$0xff] }
0x1aaa   :  { %v3020_v29 = vadd.f32 %v3809_v20, %v3012_v23  ;;  %v3028_v18 = vld [vmem:[%s5935_s19 + $0x10] sm:$0xff]  ;;  %v3481_v23 = vsub.s32 5, %v5239_v46 }
0x1aab   :  { %v3019_v37 = vadd.f32 %v3809_v20, %v3011_v28  ;;  %v3025_v28 = vld [vmem:[#allocation19] sm:$0x1] }
0x1aac   :  { %4257 = vmatmul.mubr.msk.f32.vlgmr.msra.gmra.mrb[32].mxu1 %vm231_vm0, %v3020_v29  ;;  %v3482_v26 = vrot.slane %v5658_v56, %v3481_v23 }
0x1aad   :  { %4235 = vmatmul.mubr.msk.f32.vlgmr.msra.gmra.mrb[30].mxu0 %vm231_vm0, %v3019_v37  ;;  %4466 = vmatpush1.bf16.msra.mxu1 %v5573_v21  ;;  %v3052_v21 = vld [vmem:[%s5936_s20 + $0xb0] sm:$0xff] }
0x1aae   :  { %4367 = vmatpush3.bf16.msra.mxu0 %v5713_v32  ;;  %3246 = vmatprep.mubr.f32.mxu0 %v3163_v34  ;;  %v5758_v48 = vpack.c.bf16 %v3053_v51, %v3052_v21 }
0x1aaf   :  { %4369 = vmatprep.subr.bf16.mxu0 %v5716_v38  ;;  %4467 = vmatprep.subr.bf16.mxu1 %v4904_v9 }
0x1ab0   :  { %3816 = vmatprep.mubr.msk.f32.mxu1 %vm3175_vm6, %v3486_v25 }
0x1ab1   :  { %4469 = vmatpush1.bf16.msra.mxu1 %v5579_v19  ;;  %v3054_v19 = vld [vmem:[%s5936_s20 + $0xc0] sm:$0xff] }
0x1ab2   :  { %4371 = vmatpush3.bf16.msra.mxu0 %v5734_v42  ;;  %4470 = vmatprep.subr.bf16.mxu1 %v4904_v9  ;;  %v5778_v59 = vpack.c.bf16 %v3055_v57, %v3054_v19 }
0x1ab3   :  { %4373 = vmatprep.subr.bf16.mxu0 %v5737_v49 }
0x1ab5   :  { %4472 = vmatpush1.bf16.msra.mxu1 %v5589_v24  ;;  %v3056_v24 = vld [vmem:[%s5936_s20 + $0xd0] sm:$0xff] }
0x1ab6   :  { %4375 = vmatpush3.bf16.msra.mxu0 %v5754_v52  ;;  %4473 = vmatprep.subr.bf16.mxu1 %v4904_v9  ;;  %v5798_v0 = vpack.c.bf16 %v3057_v62, %v3056_v24 }
0x1ab7   :  { %4377 = vmatprep.subr.bf16.mxu0 %v5758_v48 }
0x1ab9   :  { %4475 = vmatpush1.bf16.msra.mxu1 %v5599_v27  ;;  %v3058_v27 = vld [vmem:[%s5936_s20 + $0xe0] sm:$0xff] }
0x1aba   :  { %4379 = vmatpush3.bf16.msra.mxu0 %v5774_v44  ;;  %4476 = vmatprep.subr.bf16.mxu1 %v4904_v9  ;;  %v5818_v5 = vpack.c.bf16 %v3059_v2, %v3058_v27 }
0x1abb   :  { %4381 = vmatprep.subr.bf16.mxu0 %v5778_v59 }
0x1abd   :  { %4478 = vmatpush1.bf16.msra.mxu1 %v5609_v31  ;;  %v3060_v31 = vld [vmem:[%s5936_s20 + $0xf0] sm:$0xff] }
0x1abe   :  { %4383 = vmatpush3.bf16.msra.mxu0 %v5794_v63  ;;  %4479 = vmatprep.subr.bf16.mxu1 %v4904_v9  ;;  %v5838_v10 = vpack.c.bf16 %v3061_v8, %v3060_v31 }
0x1abf   :  { %4385 = vmatprep.subr.bf16.mxu0 %v5798_v0 }
0x1ac1   :  { %4481 = vmatpush1.bf16.msra.mxu1 %v5630_v50  ;;  %v4394_v50 = vpack.c.bf16 %v3045_v11, %v3044_v14 }
0x1ac2   :  { %4387 = vmatpush3.bf16.msra.mxu0 %v5814_v4  ;;  %4482 = vmatprep.subr.bf16.mxu1 %v4904_v9 }
0x1ac3   :  { %4389 = vmatprep.subr.bf16.mxu0 %v5818_v5 }
0x1ac5   :  { %4484 = vmatpush1.bf16.msra.mxu1 %v5640_v17  ;;  %v3318_v17 = vpop.f32.mrb[30].mxu1 }
0x1ac6   :  { %4391 = vmatpush3.bf16.msra.mxu0 %v5834_v39  ;;  %4485 = vmatprep.subr.bf16.mxu1 %v4904_v9  ;;  %v3320_v15 = vpop.f32.mrb[31].mxu1 }
0x1ac7   :  { %4393 = vmatprep.subr.bf16.mxu0 %v5838_v10 }
0x1ac9   :  { %4487 = vmatpush1.bf16.msra.mxu1 %v5650_v54  ;;  %v3027_v54 = vld [vmem:[%s5935_s19 + $0x8] sm:$0xff] }
0x1aca   :  { %4395 = vmatpush3.bf16.msra.mxu0 %v4394_v50  ;;  %3594 = vmatprep.subr.mxu1 %v4897_v36  ;;  %v4421_v20 = vpack.c.bf16 %v3027_v54, %v3026_v47 }
0x1acb   :  { %4420 = vmatprep.subr.bf16.mxu0 %v4904_v9 }
0x1acd   :  { %3247 = vmatmul.mubr.f32.vlgmr.msra.gmra.mrb[32].mxu0 %v3159_v12  ;;  %3815 = vmatpush1.msk.msra.mxu1 %vm3178_vm5, %v5664_v58  ;;  %v3029_v58 = vld [vmem:[%s5935_s19 + $0x18] sm:$0xff]  ;;  %s4905_s19 = smov [#allocation22]  }
0x1ace   :  { %4245 = vmatprep.mubr.msk.f32.mxu0 %vm4898_vm1, %v4897_v36  ;;  %4422 = vmatpush3.bf16.msra.mxu0 %v4421_v20  ;;  %v4424_v16 = vpack.c.bf16 %v3029_v58, %v3028_v18  ;;  %s3713_s4 = sshll.u32 %s4905_s19, 4  ;;  %s3714_s4 = int_to_ptr.vmem [resolvable:$true] %s3713_s4 }
0x1acf   :  { %4423 = vmatprep.subr.bf16.mxu0 %v4904_v9  ;;  %3627 = vmatmul.mubr.f32.vlgmr.msra.gmra.mrb[34].mxu1 %v3482_v26  ;;  %s4845_s26 = scalar_lea.vmem %s3714_s4, 32  ;;  %p4850_p13 = scmp.lt.s32.totalorder %s3714_s4, %s3714_s4 }
0x1ad0   :  { %p4846_p12 = scmp.ne.s32.totalorder %s3714_s4, %s4845_s26  ;;  %p4851_p0 = scmp.lt.s32.totalorder %s4845_s26, %s4845_s26 }
0x1ad2   :  { %4425 = vmatpush3.bf16.msra.mxu0 %v4424_v16  ;;  %p4852_p1 = por %p4851_p0, %p4850_p13 }
0x1ad3   :  { %4433 = vmatprep.subr.bf16.mxu0 %v5694_v3  ;;  %v3477_v3 = vsub.s32 3, %v5239_v46  ;;  %v3079_v46 = vld [vmem:[#allocation20] sm:$0x1] }
0x1ad4   :  { %p4853_p2 = pnand %p4852_p1, %p4846_p12 }
0x1ad5   :  { %v3478_v41 = vrot.slane %v5658_v56, %v3477_v3 }
0x1b7f   :  { %v3466_v29 = vpop.f32.mrb[32].mxu1 }
0x1b80   :  { %v3150_v34 = vpop.f32.mrb[30].mxu0  ;;  %v4258_v37 = vpop.f32.mrb[33].mxu1 }
0x1b81   :  { %v3151_v40 = vadd.f32 %v3150_v34, %v3025_v28  ;;  %v4236_v35 = vpop.f32.mrb[31].mxu0 }
0x1b83   :  { %4577 = vtanh.f32 %v3151_v40 }
0x1b8d   :  { %v4578_v13 = vpop.eup %4577 }
0x1b8e   :  { %4246 = vmatmul.mubr.msk.f32.vlgmr.msra.gmra.mrb[34].mxu0 %vm231_vm0, %v4578_v13 }
0x1b8f   :  { %4435 = vmatpush3.bf16.msra.mxu0 %v5713_v32  ;;  %3556 = vmatprep.mubr.f32.mxu0 %v3478_v41 }
0x1b90   :  { %4437 = vmatprep.subr.bf16.mxu0 %v5716_v38 }
0x1b93   :  { %4439 = vmatpush3.bf16.msra.mxu0 %v5734_v42  ;;  %v3467_v42 = vadd.f32 %v3466_v29, %v3025_v28 }
0x1b94   :  { %4441 = vmatprep.subr.bf16.mxu0 %v5737_v49  ;;  %v3474_v49 = vrot.slane %v5658_v56, %v937_v30 }
0x1b95   :  { %4579 = vtanh.f32 %v3467_v42 }
0x1b97   :  { %4443 = vmatpush3.bf16.msra.mxu0 %v5754_v52 }
0x1b98   :  { %4445 = vmatprep.subr.bf16.mxu0 %v5758_v48 }
0x1b9b   :  { %4447 = vmatpush3.bf16.msra.mxu0 %v5774_v44 }
0x1b9c   :  { %4449 = vmatprep.subr.bf16.mxu0 %v5778_v59 }
0x1b9f   :  { %4451 = vmatpush3.bf16.msra.mxu0 %v5794_v63  ;;  %v4580_v21 = vpop.eup %4579 }
0x1ba0   :  { %v3955_v43 = vpop.f32.mrb[32].mxu0  ;;  %4453 = vmatprep.subr.bf16.mxu0 %v5798_v0 }
0x1ba1   :  { %v3956_v32 = vpop.f32.mrb[33].mxu0 }
0x1ba2   :  { %v3957_v45 = vadd.f32 %v3956_v32, %v3955_v43  ;;  %v3628_v51 = vpop.f32.mrb[34].mxu1 }
0x1ba3   :  { %4455 = vmatpush3.bf16.msra.mxu0 %v5814_v4  ;;  %v3630_v52 = vpop.f32.mrb[35].mxu1 }
0x1ba4   :  { %4457 = vmatprep.subr.bf16.mxu0 %v5818_v5  ;;  %v3319_v38 = vadd.f32 %v3957_v45, %v3318_v17 }
0x1ba7   :  { %4459 = vmatpush3.bf16.msra.mxu0 %v5834_v39 }
0x1ba8   :  { %4461 = vmatprep.subr.bf16.mxu0 %v5838_v10 }
0x1bab   :  { %4463 = vmatpush3.bf16.msra.mxu0 %v4394_v50 }
0x1bac   :  { %4488 = vmatprep.subr.bf16.mxu0 %v4904_v9 }
0x1bae   :  { %3557 = vmatmul.mubr.f32.vlgmr.msra.gmra.mrb[36].mxu0 %v3474_v49 }
0x1baf   :  { %4490 = vmatpush3.bf16.msra.mxu0 %v4421_v20  ;;  %4267 = vmatprep.mubr.msk.f32.mxu0 %vm4898_vm1, %v4897_v36 }
0x1bb0   :  { %4491 = vmatprep.subr.bf16.mxu0 %v4904_v9 }
0x1bb3   :  { %4493 = vmatpush3.bf16.msra.mxu0 %v4424_v16 }
0x1bb6   :  { %4268 = vmatmul.mubr.msk.f32.vlgmr.msra.gmra.mrb[38].mxu0 %vm231_vm0, %v4580_v21 }
0x1c61   :  { %v3391_v48 = vpop.f32.mrb[34].mxu0 }
0x1c62   :  { %v3392_v30 = vadd.f32 %v3391_v48, %v3319_v38  ;;  %v4247_v56 = vpop.f32.mrb[35].mxu0 }
0x1c64   :  { %v3395_v53 = vadd.f32 %v3392_v30, %v3079_v46 }
0x1c66   :  { %3396 = vst [vmem:[#allocation22] sm:$0x1] %v3395_v53 }
0x1c81   :  { %v4000_v55 = vpop.f32.mrb[36].mxu0 }
0x1c82   :  { %v4001_v19 = vpop.f32.mrb[37].mxu0 }
0x1c83   :  { %v4002_v57 = vadd.f32 %v4001_v19, %v4000_v55 }
0x1c85   :  { %v3629_v44 = vadd.f32 %v4002_v57, %v3628_v51 }
0x1c89   :  { %v3701_v59 = vpop.f32.mrb[38].mxu0 }
0x1c8a   :  { %v3702_v36 = vadd.f32 %v3701_v59, %v3629_v44  ;;  %v4269_v9 = vpop.f32.mrb[39].mxu0 }
0x1c8c   :  { %v3705_v60 = vadd.f32 %v3702_v36, %v3079_v46 }
0x1c8e   :  { %3706 = vst [vmem:[#allocation22 + $0x1] sm:$0x1] %v3705_v60 }
0x1c8f   :  { %4856 = shalt.err (!%p4853_p2)
}
0x1c90   :  { %s4857_s5 = scalar_lea.hbm %s5938_s22, 32 }
0x1c91   :  { %p4858_p3 = scmp.ne.s32.totalorder %s5938_s22, %s4857_s5  ;;  %p4861_p4 = scmp.lt.u32.totalorder %s4857_s5, %s5938_s22 }
0x1c93   :  { %p4863_p5 = pnand %p4861_p4, %p4858_p3 }
0x1c95   :  { %4866 = shalt.err (!%p4863_p5)
}
0x1c96   :  { %3716 = dma.vmem_to_hbm [thread:$0]  %s3714_s4, 32, %s5938_s22, [#allocation4]  }
0x1c97   :  { %4881 = dma.done.wait [#allocation4], 32  }
0x1c98   :  { %4882 = vsyncadd [#allocation4], 4294967264 }
0x1c99   :  { %3720 = vsyncpa [#allocation3], 1 }
0x1c9a   :  { %3721 = vsyncpa [#allocation6], 1 }
0x1c9b   :  { %3722 = vsyncpa [#allocation9], 1 }
0x1c9c   :  { %3723 = vsyncpa [#allocation12], 1 }
0x1c9d   :  { %3724 = vsyncpa [#allocation15], 1 }
0x1c9e   :  { %3725 = vsyncpa [#allocation18], 1 }
0x1c9f   :  { %3726 = vsyncpa [#allocation21], 1 }
0x1ca0   :  { %3727 = vsyncpa [#allocation4], 1 }

</bundles_post_ra>
